<compile_context>
chip_gen: v7x
topology: tpu7x:2x2x1
jax: 0.10.0
libtpu: 0.0.40
codegen_flags: <defaults>
</compile_context>

<pallas_src>
import functools

import jax
import jax.numpy as jnp
from jax.experimental import pallas as pl
from jax.experimental.pallas import tpu as pltpu


# ------------------------------------------------------------------ fused kernel

def _sherlock_kernel(
        x_ref,
        # CharNet (BN folded): w1 (960,300) bf16, b1 (1,300) f32, w2, b2, w3, b3
        cw1, cb1, cw2, cb2, cw3, cb3,
        # WordNet (BN folded): w1 (201,200) bf16, ...
        ww1, wb1, ww2, wb2, ww3, wb3,
        # ParaNet (BN folded): w1 (400,400) bf16, ...
        pw1, pb1, pw2, pb2, pw3, pb3,
        # MajorNet (BN folded); W1 split into concat row-blocks [char|word|para|rest]
        mw1a, mw1b, mw1c, mw1d, mb1, mw2, mb2, mw3, mb3,
        o_ref):
    x = x_ref[...]                                           # (B, 1588) f32

    def mlp(xs, w1, b1, w2, b2, w3, b3):
        # Linear1 (+ folded BatchNorm) -> ReLU -> [Dropout = id] -> Linear2 -> ReLU -> Linear3
        h = jnp.dot(xs.astype(jnp.bfloat16), w1[...],
                    preferred_element_type=jnp.float32) + b1[...]
        h = jnp.maximum(h, 0.0)
        h = jnp.dot(h.astype(jnp.bfloat16), w2[...],
                    preferred_element_type=jnp.float32) + b2[...]
        h = jnp.maximum(h, 0.0)
        return jnp.dot(h.astype(jnp.bfloat16), w3[...],
                       preferred_element_type=jnp.float32) + b3[...]

    x_char = mlp(x[:, 0:960],     cw1, cb1, cw2, cb2, cw3, cb3)   # (B, n_out)
    x_word = mlp(x[:, 960:1161],  ww1, wb1, ww2, wb2, ww3, wb3)   # (B, n_out)
    x_para = mlp(x[:, 1188:1588], pw1, pb1, pw2, pb2, pw3, pb3)   # (B, n_out)
    x_rest = x[:, 1161:1188]                                      # (B, 27)

    # MajorNet Linear1: concat([char, word, para, rest]) @ W1 + b1, computed as a
    # sum of four row-block matmuls (avoids a lane-unaligned 129-wide concat).
    h = (jnp.dot(x_char.astype(jnp.bfloat16), mw1a[...],
                 preferred_element_type=jnp.float32)
         + jnp.dot(x_word.astype(jnp.bfloat16), mw1b[...],
                   preferred_element_type=jnp.float32)
         + jnp.dot(x_para.astype(jnp.bfloat16), mw1c[...],
                   preferred_element_type=jnp.float32)
         + jnp.dot(x_rest.astype(jnp.bfloat16), mw1d[...],
                   preferred_element_type=jnp.float32)
         + mb1[...])
    h = jnp.maximum(h, 0.0)
    h = jnp.dot(h.astype(jnp.bfloat16), mw2[...],
                preferred_element_type=jnp.float32) + mb2[...]
    h = jnp.maximum(h, 0.0)
    o_ref[...] = jnp.dot(h.astype(jnp.bfloat16), mw3[...],
                         preferred_element_type=jnp.float32) + mb3[...]


def sherlock_forward(x, fused):
    """Full Sherlock forward (inference) as a single Pallas kernel call."""
    assert x.shape[1] == 1588
    x = x.astype(jnp.float32)
    batch = x.shape[0]
    num_outputs = fused["major"]["b3"].shape[1]
    c, w, p, m = fused["char"], fused["word"], fused["para"], fused["major"]
    args = (
        x,
        c["w1"], c["b1"], c["w2"], c["b2"], c["w3"], c["b3"],
        w["w1"], w["b1"], w["w2"], w["b2"], w["w3"], w["b3"],
        p["w1"], p["b1"], p["w2"], p["b2"], p["w3"], p["b3"],
        m["w1a"], m["w1b"], m["w1c"], m["w1d"], m["b1"],
        m["w2"], m["b2"], m["w3"], m["b3"],
    )
    vmem = pl.BlockSpec(memory_space=pltpu.MemorySpace.VMEM)
    return pl.pallas_call(
        _sherlock_kernel,
        out_shape=jax.ShapeDtypeStruct((batch, num_outputs), jnp.float32),
        in_specs=[vmem] * len(args),
        out_specs=vmem,
    )(*args)


# ------------------------------------------------ parameter init (PyTorch-style)

def _init_linear(key, n_in, n_out):
    kw, kb = jax.random.split(key)
    bound = 1.0 / float(n_in) ** 0.5
    w = jax.random.uniform(kw, (n_in, n_out), jnp.float32, -bound, bound)
    b = jax.random.uniform(kb, (1, n_out), jnp.float32, -bound, bound)
    return w, b


def _init_subnet(key, n_in, n_out, n_hid):
    k1, k2, k3, k4 = jax.random.split(key, 4)
    w1, b1 = _init_linear(k1, n_in, n_hid)
    w2, b2 = _init_linear(k2, n_hid, n_hid)
    w3, b3 = _init_linear(k3, n_hid, n_out)
    kg, kb_, km, kv = jax.random.split(k4, 4)
    gamma = 1.0 + 0.1 * jax.random.normal(kg, (1, n_hid), jnp.float32)
    beta = 0.1 * jax.random.normal(kb_, (1, n_hid), jnp.float32)
    running_mean = 0.1 * jax.random.normal(km, (1, n_hid), jnp.float32)
    running_var = jnp.abs(jax.random.normal(kv, (1, n_hid), jnp.float32)) + 0.5
    return dict(w1=w1, b1=b1, w2=w2, b2=b2, w3=w3, b3=b3,
                gamma=gamma, beta=beta, mean=running_mean, var=running_var)


def init_sherlock(key, num_outputs):
    kc, kw, kp, km = jax.random.split(key, 4)
    return {
        "char": _init_subnet(kc, 960, num_outputs, 300),
        "word": _init_subnet(kw, 201, num_outputs, 200),
        "para": _init_subnet(kp, 400, num_outputs, 400),
        "major": _init_subnet(km, num_outputs * 3 + 27, num_outputs, 500),
    }


def _fold_subnet(p, wdtype, eps=1e-5):
    """Fold eval-mode BatchNorm into Linear1 and cast weights to `wdtype`."""
    scale = p["gamma"] / jnp.sqrt(p["var"] + eps)          # (1, H)
    shift = p["beta"] - p["mean"] * scale                  # (1, H)
    return dict(
        w1=(p["w1"] * scale).astype(wdtype),               # scale per output column
        b1=p["b1"] * scale + shift,
        w2=p["w2"].astype(wdtype), b2=p["b2"],
        w3=p["w3"].astype(wdtype), b3=p["b3"],
    )


def prepare_fused_params(params, num_outputs, wdtype=jnp.bfloat16):
    """Fold BN, cast weights to bf16, and split MajorNet W1 by concat blocks."""
    fused = {k: _fold_subnet(params[k], wdtype) for k in ("char", "word", "para")}
    m = _fold_subnet(params["major"], wdtype)
    no = num_outputs
    fused["major"] = dict(
        w1a=m["w1"][0 * no:1 * no],          # rows for x_char
        w1b=m["w1"][1 * no:2 * no],          # rows for x_word
        w1c=m["w1"][2 * no:3 * no],          # rows for x_para
        w1d=m["w1"][3 * no:],                # rows for x_rest (27)
        b1=m["b1"], w2=m["w2"], b2=m["b2"], w3=m["w3"], b3=m["b3"],
    )
    return fused


# ------------------------------------------------------ pure-JAX reference check

def sherlock_reference(x, fused):
    def mlp(xs, p):
        h = jnp.maximum(jnp.dot(xs.astype(jnp.bfloat16), p["w1"],
                                preferred_element_type=jnp.float32) + p["b1"], 0.0)
        h = jnp.maximum(jnp.dot(h.astype(jnp.bfloat16), p["w2"],
                                preferred_element_type=jnp.float32) + p["b2"], 0.0)
        return jnp.dot(h.astype(jnp.bfloat16), p["w3"],
                       preferred_element_type=jnp.float32) + p["b3"]

    x = x.astype(jnp.float32)
    xc = mlp(x[:, :960], fused["char"])
    xw = mlp(x[:, 960:1161], fused["word"])
    xp = mlp(x[:, -400:], fused["para"])
    xr = x[:, 1161:1188]
    m = fused["major"]
    h = (jnp.dot(xc.astype(jnp.bfloat16), m["w1a"], preferred_element_type=jnp.float32)
         + jnp.dot(xw.astype(jnp.bfloat16), m["w1b"], preferred_element_type=jnp.float32)
         + jnp.dot(xp.astype(jnp.bfloat16), m["w1c"], preferred_element_type=jnp.float32)
         + jnp.dot(xr.astype(jnp.bfloat16), m["w1d"], preferred_element_type=jnp.float32)
         + m["b1"])
    h = jnp.maximum(h, 0.0)
    h = jnp.maximum(jnp.dot(h.astype(jnp.bfloat16), m["w2"],
                            preferred_element_type=jnp.float32) + m["b2"], 0.0)
    return jnp.dot(h.astype(jnp.bfloat16), m["w3"],
                   preferred_element_type=jnp.float32) + m["b3"]


if __name__ == "__main__":
    # TODO(synk): inference-only — Dropout and BatchNorm training-mode stat updates
    # are not modeled (identity / folded eval-mode affine, respectively).
    num_outputs = 34      # as in the reference: SubNet(960, 34, 300) etc.
    batch = 8
    key = jax.random.PRNGKey(0)
    kx, kp = jax.random.split(key)

    params = init_sherlock(kp, num_outputs)
    fused = prepare_fused_params(params, num_outputs)
    x = jax.random.normal(kx, (batch, 1588), jnp.float32)

    fwd = jax.jit(functools.partial(sherlock_forward, fused=fused))
    out = fwd(x)
    jax.block_until_ready(out)

    assert out.shape == (batch, num_outputs)
    assert out.dtype == jnp.float32

    ref = sherlock_reference(x, fused)
    import numpy as np
    np.testing.assert_allclose(np.asarray(out), np.asarray(ref), rtol=1e-2, atol=1e-2)

    print("KERNEL_OK")
</pallas_src>

<mosaic_0001>
module attributes {stable_mosaic.version = 11 : i64} {
  func.func @_sherlock_kernel(%arg0: memref<8x1588xf32, #tpu.memory_space<vmem>>, %arg1: memref<960x300xbf16, #tpu.memory_space<vmem>>, %arg2: memref<1x300xf32, #tpu.memory_space<vmem>>, %arg3: memref<300x300xbf16, #tpu.memory_space<vmem>>, %arg4: memref<1x300xf32, #tpu.memory_space<vmem>>, %arg5: memref<300x34xbf16, #tpu.memory_space<vmem>>, %arg6: memref<1x34xf32, #tpu.memory_space<vmem>>, %arg7: memref<201x200xbf16, #tpu.memory_space<vmem>>, %arg8: memref<1x200xf32, #tpu.memory_space<vmem>>, %arg9: memref<200x200xbf16, #tpu.memory_space<vmem>>, %arg10: memref<1x200xf32, #tpu.memory_space<vmem>>, %arg11: memref<200x34xbf16, #tpu.memory_space<vmem>>, %arg12: memref<1x34xf32, #tpu.memory_space<vmem>>, %arg13: memref<400x400xbf16, #tpu.memory_space<vmem>>, %arg14: memref<1x400xf32, #tpu.memory_space<vmem>>, %arg15: memref<400x400xbf16, #tpu.memory_space<vmem>>, %arg16: memref<1x400xf32, #tpu.memory_space<vmem>>, %arg17: memref<400x34xbf16, #tpu.memory_space<vmem>>, %arg18: memref<1x34xf32, #tpu.memory_space<vmem>>, %arg19: memref<34x500xbf16, #tpu.memory_space<vmem>>, %arg20: memref<34x500xbf16, #tpu.memory_space<vmem>>, %arg21: memref<34x500xbf16, #tpu.memory_space<vmem>>, %arg22: memref<27x500xbf16, #tpu.memory_space<vmem>>, %arg23: memref<1x500xf32, #tpu.memory_space<vmem>>, %arg24: memref<500x500xbf16, #tpu.memory_space<vmem>>, %arg25: memref<1x500xf32, #tpu.memory_space<vmem>>, %arg26: memref<500x34xbf16, #tpu.memory_space<vmem>>, %arg27: memref<1x34xf32, #tpu.memory_space<vmem>>, %arg28: memref<8x34xf32, #tpu.memory_space<vmem>>) attributes {dimension_semantics = [], scalar_prefetch = 0 : i64, scratch_operands = 0 : i64, tpu.core_type = #tpu.core_type<tc>} {
    %c0 = arith.constant 0 : index
    %c0_0 = arith.constant 0 : index
    %0 = vector.load %arg0[%c0, %c0_0] : memref<8x1588xf32, #tpu.memory_space<vmem>>, vector<8x1588xf32>
    %1 = vector.extract_strided_slice %0 {offsets = [0, 0], sizes = [8, 960], strides = [1, 1]} : vector<8x1588xf32> to vector<8x960xf32>
    %2 = arith.truncf %1 : vector<8x960xf32> to vector<8x960xbf16>
    %c0_1 = arith.constant 0 : index
    %c0_2 = arith.constant 0 : index
    %3 = vector.load %arg1[%c0_1, %c0_2] : memref<960x300xbf16, #tpu.memory_space<vmem>>, vector<960x300xbf16>
    %cst = arith.constant dense<0.000000e+00> : vector<8x300xf32>
    %4 = tpu.matmul %2, %3, %cst {dimension_numbers = #tpu.dot_dimension_numbers<[1], [0], [0], [1], [0, 0, 1, 1], [], []>} : vector<8x960xbf16>, vector<960x300xbf16>, vector<8x300xf32> -> vector<8x300xf32>
    %c0_3 = arith.constant 0 : index
    %c0_4 = arith.constant 0 : index
    %5 = vector.load %arg2[%c0_3, %c0_4] : memref<1x300xf32, #tpu.memory_space<vmem>>, vector<1x300xf32>
    %6 = vector.broadcast %5 : vector<1x300xf32> to vector<8x300xf32>
    %7 = arith.addf %4, %6 : vector<8x300xf32>
    %cst_5 = arith.constant 0.000000e+00 : f32
    %8 = vector.broadcast %cst_5 : f32 to vector<8x300xf32>
    %9 = arith.maximumf %7, %8 : vector<8x300xf32>
    %10 = arith.truncf %9 : vector<8x300xf32> to vector<8x300xbf16>
    %c0_6 = arith.constant 0 : index
    %c0_7 = arith.constant 0 : index
    %11 = vector.load %arg3[%c0_6, %c0_7] : memref<300x300xbf16, #tpu.memory_space<vmem>>, vector<300x300xbf16>
    %cst_8 = arith.constant dense<0.000000e+00> : vector<8x300xf32>
    %12 = tpu.matmul %10, %11, %cst_8 {dimension_numbers = #tpu.dot_dimension_numbers<[1], [0], [0], [1], [0, 0, 1, 1], [], []>} : vector<8x300xbf16>, vector<300x300xbf16>, vector<8x300xf32> -> vector<8x300xf32>
    %c0_9 = arith.constant 0 : index
    %c0_10 = arith.constant 0 : index
    %13 = vector.load %arg4[%c0_9, %c0_10] : memref<1x300xf32, #tpu.memory_space<vmem>>, vector<1x300xf32>
    %14 = vector.broadcast %13 : vector<1x300xf32> to vector<8x300xf32>
    %15 = arith.addf %12, %14 : vector<8x300xf32>
    %cst_11 = arith.constant 0.000000e+00 : f32
    %16 = vector.broadcast %cst_11 : f32 to vector<8x300xf32>
    %17 = arith.maximumf %15, %16 : vector<8x300xf32>
    %18 = arith.truncf %17 : vector<8x300xf32> to vector<8x300xbf16>
    %c0_12 = arith.constant 0 : index
    %c0_13 = arith.constant 0 : index
    %19 = vector.load %arg5[%c0_12, %c0_13] : memref<300x34xbf16, #tpu.memory_space<vmem>>, vector<300x34xbf16>
    %cst_14 = arith.constant dense<0.000000e+00> : vector<8x34xf32>
    %20 = tpu.matmul %18, %19, %cst_14 {dimension_numbers = #tpu.dot_dimension_numbers<[1], [0], [0], [1], [0, 0, 1, 1], [], []>} : vector<8x300xbf16>, vector<300x34xbf16>, vector<8x34xf32> -> vector<8x34xf32>
    %c0_15 = arith.constant 0 : index
    %c0_16 = arith.constant 0 : index
    %21 = vector.load %arg6[%c0_15, %c0_16] : memref<1x34xf32, #tpu.memory_space<vmem>>, vector<1x34xf32>
    %22 = vector.broadcast %21 : vector<1x34xf32> to vector<8x34xf32>
    %23 = arith.addf %20, %22 : vector<8x34xf32>
    %24 = vector.extract_strided_slice %0 {offsets = [0, 960], sizes = [8, 201], strides = [1, 1]} : vector<8x1588xf32> to vector<8x201xf32>
    %25 = arith.truncf %24 : vector<8x201xf32> to vector<8x201xbf16>
    %c0_17 = arith.constant 0 : index
    %c0_18 = arith.constant 0 : index
    %26 = vector.load %arg7[%c0_17, %c0_18] : memref<201x200xbf16, #tpu.memory_space<vmem>>, vector<201x200xbf16>
    %cst_19 = arith.constant dense<0.000000e+00> : vector<8x200xf32>
    %27 = tpu.matmul %25, %26, %cst_19 {dimension_numbers = #tpu.dot_dimension_numbers<[1], [0], [0], [1], [0, 0, 1, 1], [], []>} : vector<8x201xbf16>, vector<201x200xbf16>, vector<8x200xf32> -> vector<8x200xf32>
    %c0_20 = arith.constant 0 : index
    %c0_21 = arith.constant 0 : index
    %28 = vector.load %arg8[%c0_20, %c0_21] : memref<1x200xf32, #tpu.memory_space<vmem>>, vector<1x200xf32>
    %29 = vector.broadcast %28 : vector<1x200xf32> to vector<8x200xf32>
    %30 = arith.addf %27, %29 : vector<8x200xf32>
    %cst_22 = arith.constant 0.000000e+00 : f32
    %31 = vector.broadcast %cst_22 : f32 to vector<8x200xf32>
    %32 = arith.maximumf %30, %31 : vector<8x200xf32>
    %33 = arith.truncf %32 : vector<8x200xf32> to vector<8x200xbf16>
    %c0_23 = arith.constant 0 : index
    %c0_24 = arith.constant 0 : index
    %34 = vector.load %arg9[%c0_23, %c0_24] : memref<200x200xbf16, #tpu.memory_space<vmem>>, vector<200x200xbf16>
    %cst_25 = arith.constant dense<0.000000e+00> : vector<8x200xf32>
    %35 = tpu.matmul %33, %34, %cst_25 {dimension_numbers = #tpu.dot_dimension_numbers<[1], [0], [0], [1], [0, 0, 1, 1], [], []>} : vector<8x200xbf16>, vector<200x200xbf16>, vector<8x200xf32> -> vector<8x200xf32>
    %c0_26 = arith.constant 0 : index
    %c0_27 = arith.constant 0 : index
    %36 = vector.load %arg10[%c0_26, %c0_27] : memref<1x200xf32, #tpu.memory_space<vmem>>, vector<1x200xf32>
    %37 = vector.broadcast %36 : vector<1x200xf32> to vector<8x200xf32>
    %38 = arith.addf %35, %37 : vector<8x200xf32>
    %cst_28 = arith.constant 0.000000e+00 : f32
    %39 = vector.broadcast %cst_28 : f32 to vector<8x200xf32>
    %40 = arith.maximumf %38, %39 : vector<8x200xf32>
    %41 = arith.truncf %40 : vector<8x200xf32> to vector<8x200xbf16>
    %c0_29 = arith.constant 0 : index
    %c0_30 = arith.constant 0 : index
    %42 = vector.load %arg11[%c0_29, %c0_30] : memref<200x34xbf16, #tpu.memory_space<vmem>>, vector<200x34xbf16>
    %cst_31 = arith.constant dense<0.000000e+00> : vector<8x34xf32>
    %43 = tpu.matmul %41, %42, %cst_31 {dimension_numbers = #tpu.dot_dimension_numbers<[1], [0], [0], [1], [0, 0, 1, 1], [], []>} : vector<8x200xbf16>, vector<200x34xbf16>, vector<8x34xf32> -> vector<8x34xf32>
    %c0_32 = arith.constant 0 : index
    %c0_33 = arith.constant 0 : index
    %44 = vector.load %arg12[%c0_32, %c0_33] : memref<1x34xf32, #tpu.memory_space<vmem>>, vector<1x34xf32>
    %45 = vector.broadcast %44 : vector<1x34xf32> to vector<8x34xf32>
    %46 = arith.addf %43, %45 : vector<8x34xf32>
    %47 = vector.extract_strided_slice %0 {offsets = [0, 1188], sizes = [8, 400], strides = [1, 1]} : vector<8x1588xf32> to vector<8x400xf32>
    %48 = arith.truncf %47 : vector<8x400xf32> to vector<8x400xbf16>
    %c0_34 = arith.constant 0 : index
    %c0_35 = arith.constant 0 : index
    %49 = vector.load %arg13[%c0_34, %c0_35] : memref<400x400xbf16, #tpu.memory_space<vmem>>, vector<400x400xbf16>
    %cst_36 = arith.constant dense<0.000000e+00> : vector<8x400xf32>
    %50 = tpu.matmul %48, %49, %cst_36 {dimension_numbers = #tpu.dot_dimension_numbers<[1], [0], [0], [1], [0, 0, 1, 1], [], []>} : vector<8x400xbf16>, vector<400x400xbf16>, vector<8x400xf32> -> vector<8x400xf32>
    %c0_37 = arith.constant 0 : index
    %c0_38 = arith.constant 0 : index
    %51 = vector.load %arg14[%c0_37, %c0_38] : memref<1x400xf32, #tpu.memory_space<vmem>>, vector<1x400xf32>
    %52 = vector.broadcast %51 : vector<1x400xf32> to vector<8x400xf32>
    %53 = arith.addf %50, %52 : vector<8x400xf32>
    %cst_39 = arith.constant 0.000000e+00 : f32
    %54 = vector.broadcast %cst_39 : f32 to vector<8x400xf32>
    %55 = arith.maximumf %53, %54 : vector<8x400xf32>
    %56 = arith.truncf %55 : vector<8x400xf32> to vector<8x400xbf16>
    %c0_40 = arith.constant 0 : index
    %c0_41 = arith.constant 0 : index
    %57 = vector.load %arg15[%c0_40, %c0_41] : memref<400x400xbf16, #tpu.memory_space<vmem>>, vector<400x400xbf16>
    %cst_42 = arith.constant dense<0.000000e+00> : vector<8x400xf32>
    %58 = tpu.matmul %56, %57, %cst_42 {dimension_numbers = #tpu.dot_dimension_numbers<[1], [0], [0], [1], [0, 0, 1, 1], [], []>} : vector<8x400xbf16>, vector<400x400xbf16>, vector<8x400xf32> -> vector<8x400xf32>
    %c0_43 = arith.constant 0 : index
    %c0_44 = arith.constant 0 : index
    %59 = vector.load %arg16[%c0_43, %c0_44] : memref<1x400xf32, #tpu.memory_space<vmem>>, vector<1x400xf32>
    %60 = vector.broadcast %59 : vector<1x400xf32> to vector<8x400xf32>
    %61 = arith.addf %58, %60 : vector<8x400xf32>
    %cst_45 = arith.constant 0.000000e+00 : f32
    %62 = vector.broadcast %cst_45 : f32 to vector<8x400xf32>
    %63 = arith.maximumf %61, %62 : vector<8x400xf32>
    %64 = arith.truncf %63 : vector<8x400xf32> to vector<8x400xbf16>
    %c0_46 = arith.constant 0 : index
    %c0_47 = arith.constant 0 : index
    %65 = vector.load %arg17[%c0_46, %c0_47] : memref<400x34xbf16, #tpu.memory_space<vmem>>, vector<400x34xbf16>
    %cst_48 = arith.constant dense<0.000000e+00> : vector<8x34xf32>
    %66 = tpu.matmul %64, %65, %cst_48 {dimension_numbers = #tpu.dot_dimension_numbers<[1], [0], [0], [1], [0, 0, 1, 1], [], []>} : vector<8x400xbf16>, vector<400x34xbf16>, vector<8x34xf32> -> vector<8x34xf32>
    %c0_49 = arith.constant 0 : index
    %c0_50 = arith.constant 0 : index
    %67 = vector.load %arg18[%c0_49, %c0_50] : memref<1x34xf32, #tpu.memory_space<vmem>>, vector<1x34xf32>
    %68 = vector.broadcast %67 : vector<1x34xf32> to vector<8x34xf32>
    %69 = arith.addf %66, %68 : vector<8x34xf32>
    %70 = vector.extract_strided_slice %0 {offsets = [0, 1161], sizes = [8, 27], strides = [1, 1]} : vector<8x1588xf32> to vector<8x27xf32>
    %71 = arith.truncf %23 : vector<8x34xf32> to vector<8x34xbf16>
    %c0_51 = arith.constant 0 : index
    %c0_52 = arith.constant 0 : index
    %72 = vector.load %arg19[%c0_51, %c0_52] : memref<34x500xbf16, #tpu.memory_space<vmem>>, vector<34x500xbf16>
    %cst_53 = arith.constant dense<0.000000e+00> : vector<8x500xf32>
    %73 = tpu.matmul %71, %72, %cst_53 {dimension_numbers = #tpu.dot_dimension_numbers<[1], [0], [0], [1], [0, 0, 1, 1], [], []>} : vector<8x34xbf16>, vector<34x500xbf16>, vector<8x500xf32> -> vector<8x500xf32>
    %74 = arith.truncf %46 : vector<8x34xf32> to vector<8x34xbf16>
    %c0_54 = arith.constant 0 : index
    %c0_55 = arith.constant 0 : index
    %75 = vector.load %arg20[%c0_54, %c0_55] : memref<34x500xbf16, #tpu.memory_space<vmem>>, vector<34x500xbf16>
    %cst_56 = arith.constant dense<0.000000e+00> : vector<8x500xf32>
    %76 = tpu.matmul %74, %75, %cst_56 {dimension_numbers = #tpu.dot_dimension_numbers<[1], [0], [0], [1], [0, 0, 1, 1], [], []>} : vector<8x34xbf16>, vector<34x500xbf16>, vector<8x500xf32> -> vector<8x500xf32>
    %77 = arith.addf %73, %76 : vector<8x500xf32>
    %78 = arith.truncf %69 : vector<8x34xf32> to vector<8x34xbf16>
    %c0_57 = arith.constant 0 : index
    %c0_58 = arith.constant 0 : index
    %79 = vector.load %arg21[%c0_57, %c0_58] : memref<34x500xbf16, #tpu.memory_space<vmem>>, vector<34x500xbf16>
    %cst_59 = arith.constant dense<0.000000e+00> : vector<8x500xf32>
    %80 = tpu.matmul %78, %79, %cst_59 {dimension_numbers = #tpu.dot_dimension_numbers<[1], [0], [0], [1], [0, 0, 1, 1], [], []>} : vector<8x34xbf16>, vector<34x500xbf16>, vector<8x500xf32> -> vector<8x500xf32>
    %81 = arith.addf %77, %80 : vector<8x500xf32>
    %82 = arith.truncf %70 : vector<8x27xf32> to vector<8x27xbf16>
    %c0_60 = arith.constant 0 : index
    %c0_61 = arith.constant 0 : index
    %83 = vector.load %arg22[%c0_60, %c0_61] : memref<27x500xbf16, #tpu.memory_space<vmem>>, vector<27x500xbf16>
    %cst_62 = arith.constant dense<0.000000e+00> : vector<8x500xf32>
    %84 = tpu.matmul %82, %83, %cst_62 {dimension_numbers = #tpu.dot_dimension_numbers<[1], [0], [0], [1], [0, 0, 1, 1], [], []>} : vector<8x27xbf16>, vector<27x500xbf16>, vector<8x500xf32> -> vector<8x500xf32>
    %85 = arith.addf %81, %84 : vector<8x500xf32>
    %c0_63 = arith.constant 0 : index
    %c0_64 = arith.constant 0 : index
    %86 = vector.load %arg23[%c0_63, %c0_64] : memref<1x500xf32, #tpu.memory_space<vmem>>, vector<1x500xf32>
    %87 = vector.broadcast %86 : vector<1x500xf32> to vector<8x500xf32>
    %88 = arith.addf %85, %87 : vector<8x500xf32>
    %cst_65 = arith.constant 0.000000e+00 : f32
    %89 = vector.broadcast %cst_65 : f32 to vector<8x500xf32>
    %90 = arith.maximumf %88, %89 : vector<8x500xf32>
    %91 = arith.truncf %90 : vector<8x500xf32> to vector<8x500xbf16>
    %c0_66 = arith.constant 0 : index
    %c0_67 = arith.constant 0 : index
    %92 = vector.load %arg24[%c0_66, %c0_67] : memref<500x500xbf16, #tpu.memory_space<vmem>>, vector<500x500xbf16>
    %cst_68 = arith.constant dense<0.000000e+00> : vector<8x500xf32>
    %93 = tpu.matmul %91, %92, %cst_68 {dimension_numbers = #tpu.dot_dimension_numbers<[1], [0], [0], [1], [0, 0, 1, 1], [], []>} : vector<8x500xbf16>, vector<500x500xbf16>, vector<8x500xf32> -> vector<8x500xf32>
    %c0_69 = arith.constant 0 : index
    %c0_70 = arith.constant 0 : index
    %94 = vector.load %arg25[%c0_69, %c0_70] : memref<1x500xf32, #tpu.memory_space<vmem>>, vector<1x500xf32>
    %95 = vector.broadcast %94 : vector<1x500xf32> to vector<8x500xf32>
    %96 = arith.addf %93, %95 : vector<8x500xf32>
    %cst_71 = arith.constant 0.000000e+00 : f32
    %97 = vector.broadcast %cst_71 : f32 to vector<8x500xf32>
    %98 = arith.maximumf %96, %97 : vector<8x500xf32>
    %99 = arith.truncf %98 : vector<8x500xf32> to vector<8x500xbf16>
    %c0_72 = arith.constant 0 : index
    %c0_73 = arith.constant 0 : index
    %100 = vector.load %arg26[%c0_72, %c0_73] : memref<500x34xbf16, #tpu.memory_space<vmem>>, vector<500x34xbf16>
    %cst_74 = arith.constant dense<0.000000e+00> : vector<8x34xf32>
    %101 = tpu.matmul %99, %100, %cst_74 {dimension_numbers = #tpu.dot_dimension_numbers<[1], [0], [0], [1], [0, 0, 1, 1], [], []>} : vector<8x500xbf16>, vector<500x34xbf16>, vector<8x34xf32> -> vector<8x34xf32>
    %c0_75 = arith.constant 0 : index
    %c0_76 = arith.constant 0 : index
    %102 = vector.load %arg27[%c0_75, %c0_76] : memref<1x34xf32, #tpu.memory_space<vmem>>, vector<1x34xf32>
    %103 = vector.broadcast %102 : vector<1x34xf32> to vector<8x34xf32>
    %104 = arith.addf %101, %103 : vector<8x34xf32>
    %c0_77 = arith.constant 0 : index
    %c0_78 = arith.constant 0 : index
    %105 = vector.load %arg28[%c0_77, %c0_78] : memref<8x34xf32, #tpu.memory_space<vmem>>, vector<8x34xf32>
    tpu.vector_store %arg28[%c0_77, %c0_78], %104 {strides = array<i32>} : memref<8x34xf32, #tpu.memory_space<vmem>>, vector<8x34xf32>,
    return
  }
}

</mosaic_0001>

<bundles_post_ra>
// kernel: sherlock_forward.1
= control target key start
LH: loop header
LB: loop body
LE: loop exit
PB: predicated region body
PF: predicated region fallthrough
CT: control target
= control target key end

     0   :  { %s11832_s0 = inlined_call_operand.vmem [shape: f32[8,1588], index: 0, kind: input, shape index: {}]   ;;  %s11833_s1 = inlined_call_operand.vmem [shape: bf16[960,300], index: 1, kind: input, shape index: {}]   ;;  %s11834_s2 = inlined_call_operand.vmem [shape: f32[1,300], index: 2, kind: input, shape index: {}]   ;;  %s11835_s3 = inlined_call_operand.vmem [shape: bf16[300,300], index: 3, kind: input, shape index: {}]   ;;  %s11836_s4 = inlined_call_operand.vmem [shape: f32[1,300], index: 4, kind: input, shape index: {}]   ;;  %s11837_s5 = inlined_call_operand.vmem [shape: bf16[300,34], index: 5, kind: input, shape index: {}]   ;;  %s11838_s6 = inlined_call_operand.vmem [shape: f32[1,34], index: 6, kind: input, shape index: {}]   ;;  %s11839_s7 = inlined_call_operand.vmem [shape: bf16[201,200], index: 7, kind: input, shape index: {}]   ;;  %s11840_s8 = inlined_call_operand.vmem [shape: f32[1,200], index: 8, kind: input, shape index: {}]   ;;  %s11841_s9 = inlined_call_operand.vmem [shape: bf16[200,200], index: 9, kind: input, shape index: {}]   ;;  %s11842_s10 = inlined_call_operand.vmem [shape: f32[1,200], index: 10, kind: input, shape index: {}]   ;;  %s11843_s11 = inlined_call_operand.vmem [shape: bf16[200,34], index: 11, kind: input, shape index: {}]   ;;  %s11844_s12 = inlined_call_operand.vmem [shape: f32[1,34], index: 12, kind: input, shape index: {}]   ;;  %s11845_s13 = inlined_call_operand.vmem [shape: bf16[400,400], index: 13, kind: input, shape index: {}]   ;;  %s11846_s14 = inlined_call_operand.vmem [shape: f32[1,400], index: 14, kind: input, shape index: {}]   ;;  %s11847_s15 = inlined_call_operand.vmem [shape: bf16[400,400], index: 15, kind: input, shape index: {}]   ;;  %s11848_s16 = inlined_call_operand.vmem [shape: f32[1,400], index: 16, kind: input, shape index: {}]   ;;  %s11849_s17 = inlined_call_operand.vmem [shape: bf16[400,34], index: 17, kind: input, shape index: {}]   ;;  %s11850_s18 = inlined_call_operand.vmem [shape: f32[1,34], index: 18, kind: input, shape index: {}]   ;;  %s11851_s19 = inlined_call_operand.vmem [shape: bf16[34,500], index: 19, kind: input, shape index: {}]   ;;  %s11852_s20 = inlined_call_operand.vmem [shape: bf16[34,500], index: 20, kind: input, shape index: {}]   ;;  %s11853_s21 = inlined_call_operand.vmem [shape: bf16[34,500], index: 21, kind: input, shape index: {}]   ;;  %s11854_s22 = inlined_call_operand.vmem [shape: bf16[27,500], index: 22, kind: input, shape index: {}]   ;;  %s11855_s23 = inlined_call_operand.vmem [shape: f32[1,500], index: 23, kind: input, shape index: {}]   ;;  %s11856_s24 = inlined_call_operand.vmem [shape: bf16[500,500], index: 24, kind: input, shape index: {}]   ;;  %s11857_s25 = inlined_call_operand.vmem [shape: f32[1,500], index: 25, kind: input, shape index: {}]   ;;  %s11858_s26 = inlined_call_operand.vmem [shape: bf16[500,34], index: 26, kind: input, shape index: {}]   ;;  %s11859_s27 = inlined_call_operand.vmem [shape: f32[1,34], index: 27, kind: input, shape index: {}]   ;;  %s11860_s28 = inlined_call_operand.hbm [shape: f32[8,34], index: 28, kind: output, shape index: {}]  }
   0x1   :  { %11868 = sst [smem:[#allocation5_spill]] %s11832_s0 }
   0x2   :  { %11869 = sst [smem:[#allocation6_spill]] %s11833_s1 }
   0x3   :  { %11870 = sst [smem:[#allocation7_spill]] %s11834_s2 }
   0x4   :  { %11871 = sst [smem:[#allocation8_spill]] %s11835_s3 }
   0x5   :  { %11872 = sst [smem:[#allocation9_spill]] %s11836_s4 }
   0x6   :  { %11873 = sst [smem:[#allocation10_spill]] %s11837_s5 }
   0x7   :  { %11874 = sst [smem:[#allocation11_spill]] %s11838_s6 }
   0x8   :  { %11875 = sst [smem:[#allocation12_spill]] %s11839_s7 }
   0x9   :  { %11876 = sst [smem:[#allocation13_spill]] %s11840_s8 }
   0xa   :  { %11877 = sst [smem:[#allocation14_spill]] %s11841_s9 }
   0xb   :  { %11878 = sst [smem:[#allocation15_spill]] %s11842_s10 }
   0xc   :  { %11879 = sst [smem:[#allocation16_spill]] %s11843_s11 }
   0xd   :  { %11880 = sst [smem:[#allocation17_spill]] %s11844_s12 }
   0xe   :  { %s11881_s9 = sld [smem:[#allocation6_spill]]  ;;  %s11882_s7 = sld [smem:[#allocation5_spill]]  ;;  %vm1329_vm0 = vcmask 523264   ;;  %vm9105_vm1 = vmmov 0   ;;  %vm2061_vm2 = vcmask 1045504   ;;  %vm2057_vm3 = vcmask 359424  }
   0xf   :  { %s11883_s12 = sld [smem:[#allocation8_spill]] }
  0x14   :  { %v8047_v0 = vld [vmem:[%s11881_s9 + $0x4] ss:$12 sps:$4 sm:$0xff]   ;;  %v8049_v1 = vld [vmem:[%s11881_s9] ss:$12 sps:$4 sm:$0xff]   ;;  %v8050_v2 = vld [vmem:[%s11881_s9 + $0x1c] ss:$12 sps:$4 sm:$0xff]  }
  0x15   :  { %1333 = vmatprep.subr.bf16.mxu0 %v8047_v0  ;;  %v8052_v3 = vld [vmem:[%s11881_s9 + $0xc8] ss:$12 sps:$4 sm:$0xff]   ;;  %v8053_v4 = vld [vmem:[%s11881_s9 + $0x18] ss:$12 sps:$4 sm:$0xff]   ;;  %v8057_v7 = vld [vmem:[%s11881_s9 + $0xe0] ss:$12 sps:$4 sm:$0xff]  }
  0x16   :  { %1334 = vmatpush1.bf16.msra.mxu0 %v8049_v1  ;;  %v8054_v5 = vld [vmem:[%s11881_s9 + $0x8] ss:$12 sps:$4 sm:$0xff]   ;;  %7778 = vmatprep.subr.bf16.mxu1 %v8052_v3  ;;  %v8058_v8 = vld [vmem:[%s11881_s9 + $0x30] ss:$12 sps:$4 sm:$0xff]   ;;  %v8059_v9 = vld [vmem:[%s11881_s9 + $0x20] ss:$12 sps:$4 sm:$0xff]  }
  0x17   :  { %1335 = vmatprep.subr.bf16.mxu0 %v8050_v2  ;;  %v8055_v6 = vld [vmem:[%s11881_s9 + $0x34] ss:$12 sps:$4 sm:$0xff]   ;;  %7779 = vmatpush3.bf16.msra.mxu1 %v8054_v5  ;;  %v8060_v10 = vld [vmem:[%s11881_s9 + $0x4c] ss:$12 sps:$4 sm:$0xff]   ;;  %v8065_v14 = vld [vmem:[%s11881_s9 + $0x64] ss:$12 sps:$4 sm:$0xff]  }
  0x18   :  { %7780 = vmatprep.subr.bf16.mxu1 %v8057_v7  ;;  %v8062_v11 = vld [vmem:[%s11881_s9 + $0xf8] ss:$12 sps:$4 sm:$0xff]   ;;  %v8063_v12 = vld [vmem:[%s11881_s9 + $0x48] ss:$12 sps:$4 sm:$0xff]   ;;  %v8067_v15 = vld [vmem:[%s11881_s9 + $0x110] ss:$12 sps:$4 sm:$0xff]  }
  0x19   :  { %v8064_v13 = vld [vmem:[%s11881_s9 + $0x38] ss:$12 sps:$4 sm:$0xff]   ;;  %v8069_v16 = vld [vmem:[%s11881_s9 + $0x50] ss:$12 sps:$4 sm:$0xff]   ;;  %v8068_v17 = vld [vmem:[%s11881_s9 + $0x60] ss:$12 sps:$4 sm:$0xff]  }
  0x1a   :  { %1336 = vmatpush1.bf16.msra.mxu0 %v8053_v4  ;;  %v8070_v18 = vld [vmem:[%s11881_s9 + $0x7c] ss:$12 sps:$4 sm:$0xff]   ;;  %v8073_v20 = vld [vmem:[%s11881_s9 + $0x78] ss:$12 sps:$4 sm:$0xff]   ;;  %v8077_v22 = vld [vmem:[%s11881_s9 + $0x140] ss:$12 sps:$4 sm:$0xff]  }
  0x1b   :  { %1337 = vmatprep.subr.bf16.mxu0 %v8055_v6  ;;  %7781 = vmatpush3.bf16.msra.mxu1 %v8059_v9  ;;  %v8072_v19 = vld [vmem:[%s11881_s9 + $0x128] ss:$12 sps:$4 sm:$0xff]   ;;  %v8079_v24 = vld [vmem:[%s11881_s9 + $0x80] ss:$12 sps:$4 sm:$0xff]   ;;  %v8078_v25 = vld [vmem:[%s11881_s9 + $0x90] ss:$12 sps:$4 sm:$0xff]  }
  0x1c   :  { %7782 = vmatprep.subr.bf16.mxu1 %v8062_v11  ;;  %v8074_v21 = vld [vmem:[%s11881_s9 + $0x68] ss:$12 sps:$4 sm:$0xff]   ;;  %v8082_v26 = vld [vmem:[%s11881_s9 + $0x158] ss:$12 sps:$4 sm:$0xff]   ;;  %v8087_v30 = vld [vmem:[%s11881_s9 + $0x170] ss:$12 sps:$4 sm:$0xff]  }
  0x1d   :  { %v8075_v23 = vld [vmem:[%s11881_s9 + $0x94] ss:$12 sps:$4 sm:$0xff]   ;;  %v8080_v27 = vld [vmem:[%s11881_s9 + $0xac] ss:$12 sps:$4 sm:$0xff]   ;;  %v8085_v31 = vld [vmem:[%s11881_s9 + $0xc4] ss:$12 sps:$4 sm:$0xff]  }
  0x1e   :  { %1338 = vmatpush1.bf16.msra.mxu0 %v8058_v8  ;;  %v8083_v28 = vld [vmem:[%s11881_s9 + $0xa8] ss:$12 sps:$4 sm:$0xff]   ;;  %v8084_v29 = vld [vmem:[%s11881_s9 + $0x98] ss:$12 sps:$4 sm:$0xff]   ;;  %v8088_v33 = vld [vmem:[%s11881_s9 + $0xc0] ss:$12 sps:$4 sm:$0xff]  }
  0x1f   :  { %1339 = vmatprep.subr.bf16.mxu0 %v8060_v10  ;;  %7783 = vmatpush3.bf16.msra.mxu1 %v8064_v13  ;;  %v92_v32 = vld [vmem:[%s11882_s7 + $0x8] sm:$0xff]  ;;  %v8089_v34 = vld [vmem:[%s11881_s9 + $0xb0] ss:$12 sps:$4 sm:$0xff]   ;;  %v91_v36 = vld [vmem:[%s11882_s7] sm:$0xff] }
  0x20   :  { %7784 = vmatprep.subr.bf16.mxu1 %v8067_v15  ;;  %v105_v35 = vpack.c.bf16 %v92_v32, %v92_v32  ;;  %v8092_v37 = vld [vmem:[%s11881_s9 + $0x248] ss:$12 sps:$4 sm:$0xff]   ;;  %v8093_v39 = vld [vmem:[%s11881_s9 + $0xd8] ss:$12 sps:$4 sm:$0xff]   ;;  %v9373_v40 = vpack.c.bf16 %v91_v36, %v91_v36  ;;  %v8097_v42 = vld [vmem:[%s11881_s9 + $0x260] ss:$12 sps:$4 sm:$0xff]  }
  0x21   :  { %v8090_v38 = vld [vmem:[%s11881_s9 + $0xdc] ss:$12 sps:$4 sm:$0xff]   ;;  %v8095_v43 = vld [vmem:[%s11881_s9 + $0xf4] ss:$12 sps:$4 sm:$0xff]   ;;  %v8102_v46 = vld [vmem:[%s11881_s9 + $0x278] ss:$12 sps:$4 sm:$0xff]  }
  0x22   :  { %1340 = vmatpush1.bf16.msra.mxu0 %v8063_v12  ;;  %1529 = vmatprep.mubr.bf16.mxu1 %v105_v35  ;;  %v8094_v41 = vld [vmem:[%s11881_s9 + $0x188] ss:$12 sps:$4 sm:$0xff]   ;;  %v8098_v44 = vld [vmem:[%s11881_s9 + $0xf0] ss:$12 sps:$4 sm:$0xff]   ;;  %v8099_v45 = vld [vmem:[%s11881_s9 + $0x1a0] ss:$12 sps:$4 sm:$0xff]  }
  0x23   :  { %1341 = vmatprep.subr.bf16.mxu0 %v8065_v14  ;;  %7785 = vmatpush3.bf16.msra.mxu1 %v8069_v16  ;;  %v8100_v47 = vld [vmem:[%s11881_s9 + $0x10c] ss:$12 sps:$4 sm:$0xff]   ;;  %v8103_v48 = vld [vmem:[%s11881_s9 + $0x108] ss:$12 sps:$4 sm:$0xff]   ;;  %v8107_v50 = vld [vmem:[%s11881_s9 + $0x290] ss:$12 sps:$4 sm:$0xff]  }
  0x24   :  { %7786 = vmatprep.subr.bf16.mxu1 %v8072_v19  ;;  %1365 = vmatprep.mubr.bf16.mxu0 %v105_v35  ;;  %v8104_v49 = vld [vmem:[%s11881_s9 + $0x1b8] ss:$12 sps:$4 sm:$0xff]   ;;  %v8109_v52 = vld [vmem:[%s11881_s9 + $0x1d0] ss:$12 sps:$4 sm:$0xff]   ;;  %v8108_v53 = vld [vmem:[%s11881_s9 + $0x120] ss:$12 sps:$4 sm:$0xff]  }
  0x25   :  { %v8105_v51 = vld [vmem:[%s11881_s9 + $0x124] ss:$12 sps:$4 sm:$0xff]   ;;  %v8112_v54 = vld [vmem:[%s11881_s9 + $0x2a8] ss:$12 sps:$4 sm:$0xff]   ;;  %v8117_v58 = vld [vmem:[%s11881_s9 + $0x2c0] ss:$12 sps:$4 sm:$0xff]  }
  0x26   :  { %1342 = vmatpush1.bf16.msra.mxu0 %v8068_v17  ;;  %v8110_v55 = vld [vmem:[%s11881_s9 + $0x13c] ss:$12 sps:$4 sm:$0xff]   ;;  %v8113_v56 = vld [vmem:[%s11881_s9 + $0x138] ss:$12 sps:$4 sm:$0xff]   ;;  %v8115_v59 = vld [vmem:[%s11881_s9 + $0x154] ss:$12 sps:$4 sm:$0xff]  }
  0x27   :  { %1343 = vmatprep.subr.bf16.mxu0 %v8070_v18  ;;  %7787 = vmatpush3.bf16.msra.mxu1 %v8074_v21  ;;  %v8114_v57 = vld [vmem:[%s11881_s9 + $0x1e8] ss:$12 sps:$4 sm:$0xff]   ;;  %v8118_v60 = vld [vmem:[%s11881_s9 + $0x150] ss:$12 sps:$4 sm:$0xff]   ;;  %v8119_v61 = vld [vmem:[%s11881_s9 + $0x200] ss:$12 sps:$4 sm:$0xff]  }
  0x28   :  { %7788 = vmatprep.subr.bf16.mxu1 %v8077_v22  ;;  %v8122_v62 = vld [vmem:[%s11881_s9 + $0x2d8] ss:$12 sps:$4 sm:$0xff]   ;;  %v8123_v1 = vld [vmem:[%s11881_s9 + $0x168] ss:$12 sps:$4 sm:$0xff]   ;;  %v8128_v4 = vld [vmem:[%s11881_s9 + $0x2f0] ss:$12 sps:$4 sm:$0xff]  }
  0x29   :  { %v8120_v63 = vld [vmem:[%s11881_s9 + $0x16c] ss:$12 sps:$4 sm:$0xff]   ;;  %v8127_v5 = vld [vmem:[%s11881_s9 + $0x184] ss:$12 sps:$4 sm:$0xff]   ;;  %v8133_v9 = vld [vmem:[%s11881_s9 + $0x3c8] ss:$12 sps:$4 sm:$0xff]  }
  0x2a   :  { %1344 = vmatpush1.bf16.msra.mxu0 %v8073_v20  ;;  %v94_v0 = vld [vmem:[%s11882_s7 + $0x18] sm:$0xff]  ;;  %v93_v7 = vld [vmem:[%s11882_s7 + $0x10] sm:$0xff]  ;;  %v8125_v8 = vld [vmem:[%s11881_s9 + $0x180] ss:$12 sps:$4 sm:$0xff]  }
  0x2b   :  { %1345 = vmatprep.subr.bf16.mxu0 %v8075_v23  ;;  %7789 = vmatpush3.bf16.msra.mxu1 %v8079_v24  ;;  %v107_v2 = vpack.c.bf16 %v94_v0, %v94_v0  ;;  %v8124_v3 = vld [vmem:[%s11881_s9 + $0x218] ss:$12 sps:$4 sm:$0xff]   ;;  %v8129_v6 = vld [vmem:[%s11881_s9 + $0x230] ss:$12 sps:$4 sm:$0xff]   ;;  %v9478_v12 = vpack.c.bf16 %v93_v7, %v93_v7  ;;  %v8134_v13 = vld [vmem:[%s11881_s9 + $0x308] ss:$12 sps:$4 sm:$0xff]  }
  0x2c   :  { %7790 = vmatprep.subr.bf16.mxu1 %v8082_v26  ;;  %v8132_v10 = vld [vmem:[%s11881_s9 + $0x19c] ss:$12 sps:$4 sm:$0xff]   ;;  %v8130_v11 = vld [vmem:[%s11881_s9 + $0x198] ss:$12 sps:$4 sm:$0xff]   ;;  %v8138_v14 = vld [vmem:[%s11881_s9 + $0x3e0] ss:$12 sps:$4 sm:$0xff]  }
  0x2d   :  { %v8137_v15 = vld [vmem:[%s11881_s9 + $0x1b4] ss:$12 sps:$4 sm:$0xff]   ;;  %v8135_v16 = vld [vmem:[%s11881_s9 + $0x1b0] ss:$12 sps:$4 sm:$0xff]   ;;  %v8143_v18 = vld [vmem:[%s11881_s9 + $0x3f8] ss:$12 sps:$4 sm:$0xff]  }
  0x2e   :  { %1346 = vmatpush1.bf16.msra.mxu0 %v8078_v25  ;;  %v8139_v17 = vld [vmem:[%s11881_s9 + $0x320] ss:$12 sps:$4 sm:$0xff]   ;;  %v8140_v20 = vld [vmem:[%s11881_s9 + $0x1c8] ss:$12 sps:$4 sm:$0xff]   ;;  %v8144_v21 = vld [vmem:[%s11881_s9 + $0x338] ss:$12 sps:$4 sm:$0xff]  }
  0x2f   :  { %1347 = vmatprep.subr.bf16.mxu0 %v8080_v27  ;;  %7791 = vmatpush3.bf16.msra.mxu1 %v8084_v29  ;;  %v8142_v19 = vld [vmem:[%s11881_s9 + $0x1cc] ss:$12 sps:$4 sm:$0xff]   ;;  %v8148_v22 = vld [vmem:[%s11881_s9 + $0x410] ss:$12 sps:$4 sm:$0xff]   ;;  %v8153_v26 = vld [vmem:[%s11881_s9 + $0x428] ss:$12 sps:$4 sm:$0xff]  }
  0x30   :  { %7792 = vmatprep.subr.bf16.mxu1 %v8087_v30  ;;  %v8147_v23 = vld [vmem:[%s11881_s9 + $0x1e4] ss:$12 sps:$4 sm:$0xff]   ;;  %v8145_v24 = vld [vmem:[%s11881_s9 + $0x1e0] ss:$12 sps:$4 sm:$0xff]   ;;  %v8152_v27 = vld [vmem:[%s11881_s9 + $0x1fc] ss:$12 sps:$4 sm:$0xff]  }
  0x31   :  { %v8149_v25 = vld [vmem:[%s11881_s9 + $0x350] ss:$12 sps:$4 sm:$0xff]   ;;  %v8150_v29 = vld [vmem:[%s11881_s9 + $0x1f8] ss:$12 sps:$4 sm:$0xff]   ;;  %v8158_v30 = vld [vmem:[%s11881_s9 + $0x440] ss:$12 sps:$4 sm:$0xff]  }
  0x32   :  { %1348 = vmatpush1.bf16.msra.mxu0 %v8083_v28  ;;  %v8154_v28 = vld [vmem:[%s11881_s9 + $0x368] ss:$12 sps:$4 sm:$0xff]   ;;  %v8159_v35 = vld [vmem:[%s11881_s9 + $0x380] ss:$12 sps:$4 sm:$0xff]   ;;  %v8163_v36 = vld [vmem:[%s11881_s9 + $0x458] ss:$12 sps:$4 sm:$0xff]  }
  0x33   :  { %1349 = vmatprep.subr.bf16.mxu0 %v8085_v31  ;;  %7793 = vmatpush3.bf16.msra.mxu1 %v8089_v34  ;;  %v8157_v31 = vld [vmem:[%s11881_s9 + $0x214] ss:$12 sps:$4 sm:$0xff]   ;;  %v96_v32 = vld [vmem:[%s11882_s7 + $0x28] sm:$0xff]  ;;  %v8155_v34 = vld [vmem:[%s11881_s9 + $0x210] ss:$12 sps:$4 sm:$0xff]  }
  0x34   :  { %7800 = vmatprep.subr.bf16.mxu1 %v8092_v37  ;;  %v8162_v37 = vld [vmem:[%s11881_s9 + $0x22c] ss:$12 sps:$4 sm:$0xff]   ;;  %v8192_v0 = vld [vmem:[%s11881_s9 + $0x2d4] ss:$12 sps:$4 sm:$0xff]   ;;  %v8201_v7 = vld [vmem:[%s11881_s9 + $0x530] ss:$12 sps:$4 sm:$0xff]  }
  0x36   :  { %1350 = vmatpush1.bf16.msra.mxu0 %v8088_v33  ;;  %1530 = vmatmul.mubr.bf16.vlgmr.msra.gmra.mrb[0].mxu1 %v9373_v40  ;;  %v9542_v33 = vpack.c.bf16 %v96_v32, %v96_v32  ;;  %v8230_v32 = vld [vmem:[%s11881_s9 + $0x3d8] ss:$12 sps:$4 sm:$0xff]  }
  0x37   :  { %1351 = vmatprep.subr.bf16.mxu0 %v8090_v38  ;;  %7801 = vmatpush3.bf16.msra.mxu1 %v8094_v41  ;;  %v8164_v38 = vld [vmem:[%s11881_s9 + $0x398] ss:$12 sps:$4 sm:$0xff]  }
  0x38   :  { %7802 = vmatprep.subr.bf16.mxu1 %v8097_v42  ;;  %1569 = vmatprep.mubr.bf16.mxu1 %v107_v2  ;;  %v8167_v41 = vld [vmem:[%s11881_s9 + $0x244] ss:$12 sps:$4 sm:$0xff]  }
  0x39   :  { %v8169_v42 = vld [vmem:[%s11881_s9 + $0x3b0] ss:$12 sps:$4 sm:$0xff]  }
  0x3a   :  { %1352 = vmatpush1.bf16.msra.mxu0 %v8093_v39  ;;  %v8160_v39 = vld [vmem:[%s11881_s9 + $0x228] ss:$12 sps:$4 sm:$0xff]  }
  0x3b   :  { %1353 = vmatprep.subr.bf16.mxu0 %v8095_v43  ;;  %7803 = vmatpush3.bf16.msra.mxu1 %v8099_v45  ;;  %v95_v43 = vld [vmem:[%s11882_s7 + $0x20] sm:$0xff]  ;;  %v8172_v45 = vld [vmem:[%s11881_s9 + $0x25c] ss:$12 sps:$4 sm:$0xff]  }
  0x3c   :  { %7804 = vmatprep.subr.bf16.mxu1 %v8102_v46  ;;  %v9581_v46 = vpack.c.bf16 %v95_v43, %v95_v43  ;;  %v8250_v43 = vld [vmem:[%s11881_s9 + $0x46c] ss:$12 sps:$4 sm:$0xff]  }
  0x3e   :  { %1354 = vmatpush1.bf16.msra.mxu0 %v8098_v44  ;;  %v8165_v44 = vld [vmem:[%s11881_s9 + $0x240] ss:$12 sps:$4 sm:$0xff]  }
  0x3f   :  { %1355 = vmatprep.subr.bf16.mxu0 %v8100_v47  ;;  %7805 = vmatpush3.bf16.msra.mxu1 %v8104_v49  ;;  %v8173_v47 = vld [vmem:[%s11881_s9 + $0x488] ss:$12 sps:$4 sm:$0xff]   ;;  %v9103_v49 = vmov 0  }
  0x40   :  { %7806 = vmatprep.subr.bf16.mxu1 %v8107_v50  ;;  %v8176_v50 = vld [vmem:[%s11881_s9 + $0x274] ss:$12 sps:$4 sm:$0xff]  }
  0x42   :  { %1356 = vmatpush1.bf16.msra.mxu0 %v8103_v48  ;;  %v8170_v48 = vld [vmem:[%s11881_s9 + $0x258] ss:$12 sps:$4 sm:$0xff]  }
  0x43   :  { %1357 = vmatprep.subr.bf16.mxu0 %v8105_v51  ;;  %7807 = vmatpush3.bf16.msra.mxu1 %v8109_v52  ;;  %v8177_v51 = vld [vmem:[%s11881_s9 + $0x4a0] ss:$12 sps:$4 sm:$0xff]   ;;  %v8174_v52 = vld [vmem:[%s11881_s9 + $0x270] ss:$12 sps:$4 sm:$0xff]  }
  0x44   :  { %7808 = vmatprep.subr.bf16.mxu1 %v8112_v54  ;;  %v8181_v54 = vld [vmem:[%s11881_s9 + $0x4b8] ss:$12 sps:$4 sm:$0xff]  }
  0x46   :  { %1358 = vmatpush1.bf16.msra.mxu0 %v8108_v53  ;;  %v8180_v53 = vld [vmem:[%s11881_s9 + $0x28c] ss:$12 sps:$4 sm:$0xff]  }
  0x47   :  { %1359 = vmatprep.subr.bf16.mxu0 %v8110_v55  ;;  %7809 = vmatpush3.bf16.msra.mxu1 %v8114_v57  ;;  %v8178_v55 = vld [vmem:[%s11881_s9 + $0x288] ss:$12 sps:$4 sm:$0xff]   ;;  %v8185_v57 = vld [vmem:[%s11881_s9 + $0x4d0] ss:$12 sps:$4 sm:$0xff]  }
  0x48   :  { %7810 = vmatprep.subr.bf16.mxu1 %v8117_v58  ;;  %v8182_v58 = vld [vmem:[%s11881_s9 + $0x2a0] ss:$12 sps:$4 sm:$0xff]  }
  0x4a   :  { %1360 = vmatpush1.bf16.msra.mxu0 %v8113_v56  ;;  %v8184_v56 = vld [vmem:[%s11881_s9 + $0x2a4] ss:$12 sps:$4 sm:$0xff]  }
  0x4b   :  { %1361 = vmatprep.subr.bf16.mxu0 %v8115_v59  ;;  %7811 = vmatpush3.bf16.msra.mxu1 %v8119_v61  ;;  %v98_v59 = vld [vmem:[%s11882_s7 + $0x38] sm:$0xff] }
  0x4c   :  { %7812 = vmatprep.subr.bf16.mxu1 %v8122_v62  ;;  %v9627_v61 = vpack.c.bf16 %v98_v59, %v98_v59  ;;  %v8189_v62 = vld [vmem:[%s11881_s9 + $0x4e8] ss:$12 sps:$4 sm:$0xff]   ;;  %v8269_v59 = vld [vmem:[%s11881_s9 + $0x510] ss:$12 sps:$4 sm:$0xff]  }
  0x4e   :  { %1362 = vmatpush1.bf16.msra.mxu0 %v8118_v60  ;;  %v8188_v60 = vld [vmem:[%s11881_s9 + $0x2bc] ss:$12 sps:$4 sm:$0xff]  }
  0x4f   :  { %1363 = vmatprep.subr.bf16.mxu0 %v8120_v63  ;;  %7813 = vmatpush3.bf16.msra.mxu1 %v8124_v3  ;;  %v8186_v63 = vld [vmem:[%s11881_s9 + $0x2b8] ss:$12 sps:$4 sm:$0xff]  }
  0x50   :  { %7814 = vmatprep.subr.bf16.mxu1 %v8128_v4  ;;  %v8196_v3 = vld [vmem:[%s11881_s9 + $0x2ec] ss:$12 sps:$4 sm:$0xff]  }
  0x51   :  { %v8197_v4 = vld [vmem:[%s11881_s9 + $0x518] ss:$12 sps:$4 sm:$0xff]  }
  0x52   :  { %1364 = vmatpush1.bf16.msra.mxu0 %v8123_v1  ;;  %v8193_v1 = vld [vmem:[%s11881_s9 + $0x500] ss:$12 sps:$4 sm:$0xff]  }
  0x53   :  { %1374 = vmatprep.subr.bf16.mxu0 %v8127_v5  ;;  %7815 = vmatpush3.bf16.msra.mxu1 %v8129_v6  ;;  %v8194_v5 = vld [vmem:[%s11881_s9 + $0x2e8] ss:$12 sps:$4 sm:$0xff]   ;;  %v8200_v6 = vld [vmem:[%s11881_s9 + $0x304] ss:$12 sps:$4 sm:$0xff]  }
  0x54   :  { %7822 = vmatprep.subr.bf16.mxu1 %v8133_v9  ;;  %v8204_v9 = vld [vmem:[%s11881_s9 + $0x31c] ss:$12 sps:$4 sm:$0xff]  }
  0x55   :  { %1366 = vmatmul.mubr.bf16.vlgmr.msra.gmra.mrb[0].mxu0 %v9373_v40  ;;  %v8168_v40 = vld [vmem:[%s11881_s9 + $0x470] ss:$12 sps:$4 sm:$0xff]  }
  0x56   :  { %1375 = vmatpush1.bf16.msra.mxu0 %v8125_v8  ;;  %1406 = vmatprep.mubr.bf16.mxu0 %v107_v2  ;;  %v8190_v2 = vld [vmem:[%s11881_s9 + $0x2d0] ss:$12 sps:$4 sm:$0xff]   ;;  %v8198_v8 = vld [vmem:[%s11881_s9 + $0x300] ss:$12 sps:$4 sm:$0xff]  }
  0x57   :  { %1376 = vmatprep.subr.bf16.mxu0 %v8132_v10  ;;  %1570 = vmatmul.mubr.bf16.vlgmr.msra.gmra.mrb[4].mxu1 %v9478_v12  ;;  %v8205_v10 = vld [vmem:[%s11881_s9 + $0x548] ss:$12 sps:$4 sm:$0xff]  }
  0x58   :  { %7823 = vmatpush3.bf16.msra.mxu1 %v8134_v13  ;;  %1609 = vmatprep.mubr.bf16.mxu1 %v9542_v33  ;;  %v8208_v13 = vld [vmem:[%s11881_s9 + $0x334] ss:$12 sps:$4 sm:$0xff]  }
  0x59   :  { %7824 = vmatprep.subr.bf16.mxu1 %v8138_v14  ;;  %v8206_v14 = vld [vmem:[%s11881_s9 + $0x330] ss:$12 sps:$4 sm:$0xff]  }
  0x5a   :  { %1377 = vmatpush1.bf16.msra.mxu0 %v8130_v11  ;;  %v8202_v11 = vld [vmem:[%s11881_s9 + $0x318] ss:$12 sps:$4 sm:$0xff]  }
  0x5b   :  { %1378 = vmatprep.subr.bf16.mxu0 %v8137_v15  ;;  %v8212_v15 = vld [vmem:[%s11881_s9 + $0x34c] ss:$12 sps:$4 sm:$0xff]  }
  0x5c   :  { %7825 = vmatpush3.bf16.msra.mxu1 %v8139_v17  ;;  %v8210_v17 = vld [vmem:[%s11881_s9 + $0x348] ss:$12 sps:$4 sm:$0xff]  }
  0x5d   :  { %7826 = vmatprep.subr.bf16.mxu1 %v8143_v18  ;;  %v8216_v18 = vld [vmem:[%s11881_s9 + $0x364] ss:$12 sps:$4 sm:$0xff]  }
  0x5e   :  { %1379 = vmatpush1.bf16.msra.mxu0 %v8135_v16  ;;  %v8213_v16 = vld [vmem:[%s11881_s9 + $0x578] ss:$12 sps:$4 sm:$0xff]  }
  0x5f   :  { %1380 = vmatprep.subr.bf16.mxu0 %v8142_v19  ;;  %v8214_v19 = vld [vmem:[%s11881_s9 + $0x360] ss:$12 sps:$4 sm:$0xff]  }
  0x60   :  { %7827 = vmatpush3.bf16.msra.mxu1 %v8144_v21  ;;  %v8220_v21 = vld [vmem:[%s11881_s9 + $0x37c] ss:$12 sps:$4 sm:$0xff]  }
  0x61   :  { %7828 = vmatprep.subr.bf16.mxu1 %v8148_v22  ;;  %v97_v22 = vld [vmem:[%s11882_s7 + $0x30] sm:$0xff] }
  0x62   :  { %1381 = vmatpush1.bf16.msra.mxu0 %v8140_v20  ;;  %v8217_v20 = vld [vmem:[%s11881_s9 + $0x590] ss:$12 sps:$4 sm:$0xff]  }
  0x63   :  { %1382 = vmatprep.subr.bf16.mxu0 %v8147_v23  ;;  %v8218_v23 = vld [vmem:[%s11881_s9 + $0x378] ss:$12 sps:$4 sm:$0xff]  }
  0x64   :  { %7829 = vmatpush3.bf16.msra.mxu1 %v8149_v25  ;;  %v8223_v25 = vld [vmem:[%s11881_s9 + $0x394] ss:$12 sps:$4 sm:$0xff]  }
  0x65   :  { %7830 = vmatprep.subr.bf16.mxu1 %v8153_v26  ;;  %v8221_v26 = vld [vmem:[%s11881_s9 + $0x390] ss:$12 sps:$4 sm:$0xff]  }
  0x66   :  { %1383 = vmatpush1.bf16.msra.mxu0 %v8145_v24  ;;  %v9719_v24 = vpack.c.bf16 %v97_v22, %v97_v22  ;;  %v8304_v22 = vld [vmem:[%s11883_s12 + $0x64] ss:$12 sps:$4 sm:$0xff]  }
  0x67   :  { %1384 = vmatprep.subr.bf16.mxu0 %v8152_v27  ;;  %v8226_v27 = vld [vmem:[%s11881_s9 + $0x3ac] ss:$12 sps:$4 sm:$0xff]  }
  0x68   :  { %7831 = vmatpush3.bf16.msra.mxu1 %v8154_v28  ;;  %v8224_v28 = vld [vmem:[%s11881_s9 + $0x3a8] ss:$12 sps:$4 sm:$0xff]  }
  0x69   :  { %7832 = vmatprep.subr.bf16.mxu1 %v8158_v30  ;;  %v8227_v30 = vld [vmem:[%s11881_s9 + $0x3c0] ss:$12 sps:$4 sm:$0xff]  }
  0x6a   :  { %1385 = vmatpush1.bf16.msra.mxu0 %v8150_v29  ;;  %v8229_v29 = vld [vmem:[%s11881_s9 + $0x3c4] ss:$12 sps:$4 sm:$0xff]  }
  0x6b   :  { %1386 = vmatprep.subr.bf16.mxu0 %v8157_v31  ;;  %v8232_v31 = vld [vmem:[%s11881_s9 + $0x3dc] ss:$12 sps:$4 sm:$0xff]  }
  0x6c   :  { %7833 = vmatpush3.bf16.msra.mxu1 %v8159_v35  ;;  %v8238_v35 = vld [vmem:[%s11881_s9 + $0x40c] ss:$12 sps:$4 sm:$0xff]  }
  0x6d   :  { %7834 = vmatprep.subr.bf16.mxu1 %v8163_v36  ;;  %v8236_v36 = vld [vmem:[%s11881_s9 + $0x408] ss:$12 sps:$4 sm:$0xff]  }
  0x6e   :  { %1387 = vmatpush1.bf16.msra.mxu0 %v8155_v34  ;;  %v8233_v34 = vld [vmem:[%s11881_s9 + $0x3f0] ss:$12 sps:$4 sm:$0xff]  }
  0x6f   :  { %1388 = vmatprep.subr.bf16.mxu0 %v8162_v37  ;;  %v8241_v37 = vld [vmem:[%s11881_s9 + $0x424] ss:$12 sps:$4 sm:$0xff]  }
  0x70   :  { %7835 = vmatpush3.bf16.msra.mxu1 %v8164_v38  ;;  %v8239_v38 = vld [vmem:[%s11881_s9 + $0x420] ss:$12 sps:$4 sm:$0xff]  }
  0x71   :  { %7836 = vmatprep.subr.bf16.mxu1 %v8168_v40  ;;  %v8242_v40 = vld [vmem:[%s11881_s9 + $0x438] ss:$12 sps:$4 sm:$0xff]  }
  0x72   :  { %1389 = vmatpush1.bf16.msra.mxu0 %v8160_v39  ;;  %v8244_v39 = vld [vmem:[%s11881_s9 + $0x43c] ss:$12 sps:$4 sm:$0xff]  }
  0x73   :  { %1390 = vmatprep.subr.bf16.mxu0 %v8167_v41  ;;  %v8247_v41 = vld [vmem:[%s11881_s9 + $0x454] ss:$12 sps:$4 sm:$0xff]  }
  0x74   :  { %7837 = vmatpush3.bf16.msra.mxu1 %v8169_v42  ;;  %v8245_v42 = vld [vmem:[%s11881_s9 + $0x450] ss:$12 sps:$4 sm:$0xff]  }
  0x75   :  { %1617 = vmatprep.subr.bf16.mxu1 %v9103_v49 }
  0x76   :  { %1391 = vmatpush1.bf16.msra.mxu0 %v8165_v44  ;;  %v8248_v44 = vld [vmem:[%s11881_s9 + $0x468] ss:$12 sps:$4 sm:$0xff]  }
  0x77   :  { %1392 = vmatprep.subr.bf16.mxu0 %v8172_v45  ;;  %1610 = vmatmul.mubr.bf16.vlgmr.msra.gmra.mrb[8].mxu1 %v9581_v46  ;;  %v8253_v45 = vld [vmem:[%s11881_s9 + $0x484] ss:$12 sps:$4 sm:$0xff]  }
  0x78   :  { %1618 = vmatpush1.bf16.msra.mxu1 %v8173_v47  ;;  %7171 = vmatprep.mubr.msk.bf16.mxu1 %vm1329_vm0, %v9627_v61  ;;  %v8251_v47 = vld [vmem:[%s11881_s9 + $0x480] ss:$12 sps:$4 sm:$0xff]  }
  0x79   :  { %1619 = vmatprep.subr.bf16.mxu1 %v9103_v49 }
  0x7a   :  { %1393 = vmatpush1.bf16.msra.mxu0 %v8170_v48  ;;  %v8256_v48 = vld [vmem:[%s11881_s9 + $0x49c] ss:$12 sps:$4 sm:$0xff]  }
  0x7b   :  { %1394 = vmatprep.subr.bf16.mxu0 %v8176_v50  ;;  %v8254_v50 = vld [vmem:[%s11881_s9 + $0x498] ss:$12 sps:$4 sm:$0xff]  }
  0x7c   :  { %1620 = vmatpush1.bf16.msra.mxu1 %v8177_v51  ;;  %v8259_v51 = vld [vmem:[%s11881_s9 + $0x4b4] ss:$12 sps:$4 sm:$0xff]  }
  0x7d   :  { %1621 = vmatprep.subr.bf16.mxu1 %v9103_v49 }
  0x7e   :  { %1395 = vmatpush1.bf16.msra.mxu0 %v8174_v52  ;;  %v8257_v52 = vld [vmem:[%s11881_s9 + $0x4b0] ss:$12 sps:$4 sm:$0xff]  }
  0x7f   :  { %1396 = vmatprep.subr.bf16.mxu0 %v8180_v53  ;;  %v8262_v53 = vld [vmem:[%s11881_s9 + $0x4cc] ss:$12 sps:$4 sm:$0xff]  }
  0x80   :  { %1622 = vmatpush1.bf16.msra.mxu1 %v8181_v54  ;;  %v8265_v54 = vld [vmem:[%s11881_s9 + $0x4e4] ss:$12 sps:$4 sm:$0xff]  }
  0x81   :  { %1623 = vmatprep.subr.bf16.mxu1 %v9103_v49 }
  0x82   :  { %1397 = vmatpush1.bf16.msra.mxu0 %v8178_v55  ;;  %v8263_v55 = vld [vmem:[%s11881_s9 + $0x4e0] ss:$12 sps:$4 sm:$0xff]  }
  0x83   :  { %1398 = vmatprep.subr.bf16.mxu0 %v8184_v56  ;;  %v8268_v56 = vld [vmem:[%s11881_s9 + $0x4fc] ss:$12 sps:$4 sm:$0xff]  }
  0x84   :  { %1624 = vmatpush1.bf16.msra.mxu1 %v8185_v57  ;;  %v8266_v57 = vld [vmem:[%s11881_s9 + $0x4f8] ss:$12 sps:$4 sm:$0xff]  }
  0x85   :  { %1625 = vmatprep.subr.bf16.mxu1 %v9103_v49 }
  0x86   :  { %1399 = vmatpush1.bf16.msra.mxu0 %v8182_v58  ;;  %v8271_v58 = vld [vmem:[%s11881_s9 + $0x514] ss:$12 sps:$4 sm:$0xff]  }
  0x87   :  { %1400 = vmatprep.subr.bf16.mxu0 %v8188_v60  ;;  %v8274_v60 = vld [vmem:[%s11881_s9 + $0x52c] ss:$12 sps:$4 sm:$0xff]  }
  0x88   :  { %1626 = vmatpush1.bf16.msra.mxu1 %v8189_v62  ;;  %v8272_v62 = vld [vmem:[%s11881_s9 + $0x528] ss:$12 sps:$4 sm:$0xff]  }
  0x89   :  { %1627 = vmatprep.subr.bf16.mxu1 %v9103_v49 }
  0x8a   :  { %1401 = vmatpush1.bf16.msra.mxu0 %v8186_v63  ;;  %v8277_v63 = vld [vmem:[%s11881_s9 + $0x544] ss:$12 sps:$4 sm:$0xff]  }
  0x8b   :  { %1402 = vmatprep.subr.bf16.mxu0 %v8192_v0  ;;  %v8275_v0 = vld [vmem:[%s11881_s9 + $0x540] ss:$12 sps:$4 sm:$0xff]  }
  0x8c   :  { %1628 = vmatpush1.bf16.msra.mxu1 %v8193_v1  ;;  %v8280_v1 = vld [vmem:[%s11881_s9 + $0x55c] ss:$12 sps:$4 sm:$0xff]  }
  0x8d   :  { %1629 = vmatprep.subr.bf16.mxu1 %v9103_v49 }
  0x8e   :  { %1403 = vmatpush1.bf16.msra.mxu0 %v8190_v2  ;;  %v8278_v2 = vld [vmem:[%s11881_s9 + $0x558] ss:$12 sps:$4 sm:$0xff]  }
  0x8f   :  { %1404 = vmatprep.subr.bf16.mxu0 %v8196_v3  ;;  %v8283_v3 = vld [vmem:[%s11881_s9 + $0x574] ss:$12 sps:$4 sm:$0xff]  }
  0x90   :  { %1630 = vmatpush1.bf16.msra.mxu1 %v8197_v4  ;;  %v8281_v4 = vld [vmem:[%s11881_s9 + $0x570] ss:$12 sps:$4 sm:$0xff]  }
  0x91   :  { %1631 = vmatprep.subr.bf16.mxu1 %v9103_v49 }
  0x92   :  { %1405 = vmatpush1.bf16.msra.mxu0 %v8194_v5  ;;  %v8286_v5 = vld [vmem:[%s11881_s9 + $0x58c] ss:$12 sps:$4 sm:$0xff]  }
  0x93   :  { %1415 = vmatprep.subr.bf16.mxu0 %v8200_v6  ;;  %v8284_v6 = vld [vmem:[%s11881_s9 + $0x588] ss:$12 sps:$4 sm:$0xff]  }
  0x94   :  { %1632 = vmatpush1.bf16.msra.mxu1 %v8201_v7  ;;  %v8287_v7 = vld [vmem:[%s11883_s12 + $0x188] ss:$12 sps:$4 sm:$0xff]  }
  0x95   :  { %1407 = vmatmul.mubr.bf16.vlgmr.msra.gmra.mrb[0].mxu0 %v9478_v12  ;;  %1633 = vmatprep.subr.bf16.mxu1 %v9103_v49  ;;  %v8209_v12 = vld [vmem:[%s11881_s9 + $0x560] ss:$12 sps:$4 sm:$0xff]  }
  0x96   :  { %1416 = vmatpush1.bf16.msra.mxu0 %v8198_v8  ;;  %1447 = vmatprep.mubr.bf16.mxu0 %v9542_v33  ;;  %v8235_v33 = vld [vmem:[%s11881_s9 + $0x3f4] ss:$12 sps:$4 sm:$0xff]  }
  0x97   :  { %1417 = vmatprep.subr.bf16.mxu0 %v8204_v9  ;;  %v8290_v8 = vld [vmem:[%s11883_s12] ss:$12 sps:$4 sm:$0xff]   ;;  %v8292_v9 = vld [vmem:[%s11883_s12 + $0x4] ss:$12 sps:$4 sm:$0xff]  }
  0x98   :  { %1634 = vmatpush1.bf16.msra.mxu1 %v8205_v10  ;;  %v9104_v10 = vmov 0.0  }
  0x99   :  { %1635 = vmatprep.subr.bf16.mxu1 %v9103_v49 }
  0x9a   :  { %1418 = vmatpush1.bf16.msra.mxu0 %v8202_v11  ;;  %v8295_v11 = vld [vmem:[%s11883_s12 + $0x1c] ss:$12 sps:$4 sm:$0xff]  }
  0x9b   :  { %1419 = vmatprep.subr.bf16.mxu0 %v8208_v13  ;;  %v8293_v13 = vld [vmem:[%s11883_s12 + $0x18] ss:$12 sps:$4 sm:$0xff]  }
  0x9c   :  { %1636 = vmatpush1.bf16.msra.mxu1 %v8209_v12  ;;  %v8288_v12 = vld [vmem:[%s11883_s12 + $0x1a0] ss:$12 sps:$4 sm:$0xff]  }
  0x9d   :  { %1637 = vmatprep.subr.bf16.mxu1 %v9103_v49 }
  0x9e   :  { %1420 = vmatpush1.bf16.msra.mxu0 %v8206_v14  ;;  %v8298_v14 = vld [vmem:[%s11883_s12 + $0x34] ss:$12 sps:$4 sm:$0xff]  }
  0x9f   :  { %1421 = vmatprep.subr.bf16.mxu0 %v8212_v15  ;;  %v8289_v15 = vld [vmem:[%s11883_s12 + $0x1b8] ss:$12 sps:$4 sm:$0x3f]  }
  0xa0   :  { %1638 = vmatpush1.bf16.msra.mxu1 %v8213_v16  ;;  %v8296_v16 = vld [vmem:[%s11883_s12 + $0x30] ss:$12 sps:$4 sm:$0xff]  }
  0xa1   :  { %1639 = vmatprep.subr.bf16.mxu1 %v9103_v49 }
  0xa2   :  { %1422 = vmatpush1.bf16.msra.mxu0 %v8210_v17  ;;  %v8301_v17 = vld [vmem:[%s11883_s12 + $0x4c] ss:$12 sps:$4 sm:$0xff]  }
  0xa3   :  { %1423 = vmatprep.subr.bf16.mxu0 %v8216_v18 }
  0xa4   :  { %1640 = vmatpush1.bf16.msra.mxu1 %v8217_v20  ;;  %v8299_v20 = vld [vmem:[%s11883_s12 + $0x48] ss:$12 sps:$4 sm:$0xff]  }
  0xa5   :  { %2071 = vmatprep.subr.bf16.mxu1 %v8292_v9 }
  0xa6   :  { %1424 = vmatpush1.bf16.msra.mxu0 %v8214_v19  ;;  %v2069_v19 = vsel %vm2061_vm2, %v8289_v15, 0 }
  0xa7   :  { %1425 = vmatprep.subr.bf16.mxu0 %v8220_v21  ;;  %1650 = vmatmul.mubr.bf16.vlgmr.msra.gmra.mrb[12].mxu1 %v9719_v24 }
  0xa8   :  { %2072 = vmatpush1.bf16.msra.mxu1 %v8290_v8 }
  0xa9   :  { %2073 = vmatprep.subr.bf16.mxu1 %v8295_v11 }
  0xaa   :  { %1426 = vmatpush1.bf16.msra.mxu0 %v8218_v23 }
  0xab   :  { %1427 = vmatprep.subr.bf16.mxu0 %v8223_v25 }
  0xac   :  { %2074 = vmatpush1.bf16.msra.mxu1 %v8293_v13 }
  0xad   :  { %2075 = vmatprep.subr.bf16.mxu1 %v8298_v14 }
  0xae   :  { %1428 = vmatpush1.bf16.msra.mxu0 %v8221_v26  ;;  %v8302_v26 = vld [vmem:[%s11883_s12 + $0x60] ss:$12 sps:$4 sm:$0xff]  }
  0xaf   :  { %1429 = vmatprep.subr.bf16.mxu0 %v8226_v27  ;;  %v8307_v27 = vld [vmem:[%s11883_s12 + $0x7c] ss:$12 sps:$4 sm:$0xff]  }
  0xb0   :  { %2076 = vmatpush1.bf16.msra.mxu1 %v8296_v16 }
  0xb1   :  { %2077 = vmatprep.subr.bf16.mxu1 %v8301_v17 }
  0xb2   :  { %1430 = vmatpush1.bf16.msra.mxu0 %v8224_v28  ;;  %v8305_v28 = vld [vmem:[%s11883_s12 + $0x78] ss:$12 sps:$4 sm:$0xff]  }
  0xb3   :  { %1431 = vmatprep.subr.bf16.mxu0 %v8229_v29  ;;  %v8310_v29 = vld [vmem:[%s11883_s12 + $0x94] ss:$12 sps:$4 sm:$0xff]  }
  0xb4   :  { %2078 = vmatpush1.bf16.msra.mxu1 %v8299_v20 }
  0xb5   :  { %2079 = vmatprep.subr.bf16.mxu1 %v8304_v22 }
  0xb6   :  { %1432 = vmatpush1.bf16.msra.mxu0 %v8227_v30  ;;  %v8308_v30 = vld [vmem:[%s11883_s12 + $0x90] ss:$12 sps:$4 sm:$0xff]  }
  0xb7   :  { %1433 = vmatprep.subr.bf16.mxu0 %v8232_v31  ;;  %v8313_v31 = vld [vmem:[%s11883_s12 + $0xac] ss:$12 sps:$4 sm:$0xff]  }
  0xb8   :  { %2080 = vmatpush1.bf16.msra.mxu1 %v8302_v26 }
  0xb9   :  { %2081 = vmatprep.subr.bf16.mxu1 %v8307_v27 }
  0xba   :  { %1434 = vmatpush1.bf16.msra.mxu0 %v8230_v32  ;;  %v354_v32 = vlaneseq }
  0xbb   :  { %1435 = vmatprep.subr.bf16.mxu0 %v8235_v33  ;;  %v8311_v33 = vld [vmem:[%s11883_s12 + $0xa8] ss:$12 sps:$4 sm:$0xff]  }
  0xbc   :  { %2082 = vmatpush1.bf16.msra.mxu1 %v8305_v28 }
  0xbd   :  { %2083 = vmatprep.subr.bf16.mxu1 %v8310_v29 }
  0xbe   :  { %1436 = vmatpush1.bf16.msra.mxu0 %v8233_v34  ;;  %v8316_v34 = vld [vmem:[%s11883_s12 + $0xc4] ss:$12 sps:$4 sm:$0xff]  }
  0xbf   :  { %1437 = vmatprep.subr.bf16.mxu0 %v8238_v35  ;;  %v9924_v35 = vshrl.u32 %v354_v32, 7 }
  0xc0   :  { %2084 = vmatpush1.bf16.msra.mxu1 %v8308_v30 }
  0xc1   :  { %2085 = vmatprep.subr.bf16.mxu1 %v8313_v31 }
  0xc2   :  { %1438 = vmatpush1.bf16.msra.mxu0 %v8236_v36  ;;  %v8314_v36 = vld [vmem:[%s11883_s12 + $0xc0] ss:$12 sps:$4 sm:$0xff]  }
  0xc3   :  { %1439 = vmatprep.subr.bf16.mxu0 %v8241_v37  ;;  %v8319_v37 = vld [vmem:[%s11883_s12 + $0xdc] ss:$12 sps:$4 sm:$0xff]  }
  0xc4   :  { %2086 = vmatpush1.bf16.msra.mxu1 %v8311_v33 }
  0xc5   :  { %2087 = vmatprep.subr.bf16.mxu1 %v8316_v34 }
  0xc6   :  { %1440 = vmatpush1.bf16.msra.mxu0 %v8239_v38 }
  0xc7   :  { %1441 = vmatprep.subr.bf16.mxu0 %v8244_v39  ;;  %v9938_v39 = vsub.s32 2, %v9924_v35 }
  0xc8   :  { %2088 = vmatpush1.bf16.msra.mxu1 %v8314_v36 }
  0xc9   :  { %2089 = vmatprep.subr.bf16.mxu1 %v8319_v37 }
  0xca   :  { %1442 = vmatpush1.bf16.msra.mxu0 %v8242_v40  ;;  %v8317_v40 = vld [vmem:[%s11883_s12 + $0xd8] ss:$12 sps:$4 sm:$0xff]  }
  0xcb   :  { %1443 = vmatprep.subr.bf16.mxu0 %v8247_v41  ;;  %v8322_v41 = vld [vmem:[%s11883_s12 + $0xf4] ss:$12 sps:$4 sm:$0xff]  }
  0xcc   :  { %2090 = vmatpush1.bf16.msra.mxu1 %v8317_v40 }
  0xcd   :  { %2091 = vmatprep.subr.bf16.mxu1 %v8322_v41 }
  0xce   :  { %1444 = vmatpush1.bf16.msra.mxu0 %v8245_v42 }
  0xcf   :  { %1445 = vmatprep.subr.bf16.mxu0 %v8250_v43  ;;  %v8320_v43 = vld [vmem:[%s11883_s12 + $0xf0] ss:$12 sps:$4 sm:$0xff]  }
  0xd0   :  { %2092 = vmatpush1.bf16.msra.mxu1 %v8320_v43 }
  0xd2   :  { %1446 = vmatpush1.bf16.msra.mxu0 %v8248_v44  ;;  %v8325_v44 = vld [vmem:[%s11883_s12 + $0x10c] ss:$12 sps:$4 sm:$0xff]  }
  0xd3   :  { %1456 = vmatprep.subr.bf16.mxu0 %v8253_v45  ;;  %2093 = vmatprep.subr.bf16.mxu1 %v8325_v44 }
  0xd5   :  { %1448 = vmatmul.mubr.bf16.vlgmr.msra.gmra.mrb[0].mxu0 %v9581_v46  ;;  %v8260_v46 = vld [vmem:[%s11881_s9 + $0x4c8] ss:$12 sps:$4 sm:$0xff]   ;;  %s11884_s9 = sld [smem:[#allocation7_spill]] }
  0xd6   :  { %1457 = vmatpush1.bf16.msra.mxu0 %v8251_v47  ;;  %7170 = vmatprep.mubr.msk.bf16.mxu0 %vm1329_vm0, %v9627_v61 }
  0xd7   :  { %1458 = vmatprep.subr.bf16.mxu0 %v8256_v48  ;;  %v8323_v48 = vld [vmem:[%s11883_s12 + $0x108] ss:$12 sps:$4 sm:$0xff]  }
  0xd8   :  { %2094 = vmatpush1.bf16.msra.mxu1 %v8323_v48 }
  0xda   :  { %1459 = vmatpush1.bf16.msra.mxu0 %v8254_v50 }
  0xdb   :  { %1460 = vmatprep.subr.bf16.mxu0 %v8259_v51  ;;  %v9935_v38 = vld [vmem:[%s11884_s9] sm:$0x7]  ;;  %v8328_v51 = vld [vmem:[%s11883_s12 + $0x124] ss:$12 sps:$4 sm:$0xff]  }
  0xdc   :  { %v365_v42 = vrot.slane %v9935_v38, %v9938_v39  ;;  %2095 = vmatprep.subr.bf16.mxu1 %v8328_v51 }
  0xde   :  { %1461 = vmatpush1.bf16.msra.mxu0 %v8257_v52 }
  0xdf   :  { %1462 = vmatprep.subr.bf16.mxu0 %v8262_v53 }
  0xe2   :  { %1463 = vmatpush1.bf16.msra.mxu0 %v8260_v46 }
  0xe3   :  { %1464 = vmatprep.subr.bf16.mxu0 %v8265_v54 }
  0xe6   :  { %1465 = vmatpush1.bf16.msra.mxu0 %v8263_v55  ;;  %v8326_v55 = vld [vmem:[%s11883_s12 + $0x120] ss:$12 sps:$4 sm:$0xff]  }
  0xe7   :  { %1466 = vmatprep.subr.bf16.mxu0 %v8268_v56  ;;  %v8331_v56 = vld [vmem:[%s11883_s12 + $0x13c] ss:$12 sps:$4 sm:$0xff]   ;;  %2096 = vmatpush1.bf16.msra.mxu1 %v8326_v55 }
  0xe8   :  { %2097 = vmatprep.subr.bf16.mxu1 %v8331_v56 }
  0xea   :  { %1467 = vmatpush1.bf16.msra.mxu0 %v8266_v57  ;;  %v8329_v57 = vld [vmem:[%s11883_s12 + $0x138] ss:$12 sps:$4 sm:$0xff]  }
  0xeb   :  { %1468 = vmatprep.subr.bf16.mxu0 %v8271_v58  ;;  %2098 = vmatpush1.bf16.msra.mxu1 %v8329_v57 }
  0xee   :  { %1469 = vmatpush1.bf16.msra.mxu0 %v8269_v59 }
  0xef   :  { %1470 = vmatprep.subr.bf16.mxu0 %v8274_v60 }
  0xf2   :  { %1471 = vmatpush1.bf16.msra.mxu0 %v8272_v62 }
  0xf3   :  { %1472 = vmatprep.subr.bf16.mxu0 %v8277_v63 }
  0xf6   :  { %1473 = vmatpush1.bf16.msra.mxu0 %v8275_v0 }
  0xf7   :  { %1474 = vmatprep.subr.bf16.mxu0 %v8280_v1  ;;  %v8334_v1 = vld [vmem:[%s11883_s12 + $0x154] ss:$12 sps:$4 sm:$0xff]  }
  0xf8   :  { %2099 = vmatprep.subr.bf16.mxu1 %v8334_v1 }
  0xfa   :  { %1475 = vmatpush1.bf16.msra.mxu0 %v8278_v2  ;;  %v8332_v2 = vld [vmem:[%s11883_s12 + $0x150] ss:$12 sps:$4 sm:$0xff]  }
  0xfb   :  { %1476 = vmatprep.subr.bf16.mxu0 %v8283_v3  ;;  %2100 = vmatpush1.bf16.msra.mxu1 %v8332_v2  ;;  %v8337_v3 = vld [vmem:[%s11883_s12 + $0x16c] ss:$12 sps:$4 sm:$0xff]  }
  0xfc   :  { %2101 = vmatprep.subr.bf16.mxu1 %v8337_v3 }
  0xfe   :  { %1477 = vmatpush1.bf16.msra.mxu0 %v8281_v4  ;;  %v8335_v4 = vld [vmem:[%s11883_s12 + $0x168] ss:$12 sps:$4 sm:$0xff]  }
  0xff   :  { %1478 = vmatprep.subr.bf16.mxu0 %v8286_v5  ;;  %2102 = vmatpush1.bf16.msra.mxu1 %v8335_v4  ;;  %v8340_v5 = vld [vmem:[%s11883_s12 + $0x184] ss:$12 sps:$4 sm:$0xff]  }
 0x100   :  { %2112 = vmatprep.subr.bf16.mxu1 %v8340_v5 }
 0x102   :  { %1479 = vmatpush1.bf16.msra.mxu0 %v8284_v6 }
 0x103   :  { %7962 = vmatprep.subr.bf16.mxu0 %v9104_v10 }
 0x105   :  { %1489 = vmatmul.mubr.bf16.vlgmr.msra.gmra.mrb[0].mxu0 %v9719_v24 }
 0x106   :  { %7963 = vmatpush3.bf16.msra.mxu0 %v8287_v7  ;;  %7968 = vmatprep.mubr.msk.bf16.mxu0 %vm9105_vm1, %v9104_v10 }
 0x107   :  { %7964 = vmatprep.subr.bf16.mxu0 %v9104_v10 }
 0x109   :  { %v7794_v18 = vpop.f32.mrb[0].mxu1 }
 0x10a   :  { %7965 = vmatpush3.bf16.msra.mxu0 %v8288_v12  ;;  %v7795_v21 = vpop.f32.mrb[1].mxu1 }
 0x10b   :  { %7966 = vmatprep.subr.bf16.mxu0 %v9104_v10  ;;  %v7796_v23 = vadd.f32 %v7795_v21, %v7794_v18  ;;  %v7797_v24 = vpop.f32.mrb[2].mxu1 }
 0x10c   :  { %v7798_v25 = vpop.f32.mrb[3].mxu1 }
 0x10d   :  { %v1532_v45 = vadd.f32 %v7796_v23, %v365_v42 }
 0x10e   :  { %7967 = vmatpush3.bf16.msra.mxu0 %v2069_v19 }
 0x12a   :  { %v7816_v47 = vpop.f32.mrb[4].mxu1 }
 0x12b   :  { %v7817_v50 = vpop.f32.mrb[5].mxu1 }
 0x12c   :  { %v7818_v52 = vadd.f32 %v7817_v50, %v7816_v47  ;;  %v7819_v53 = vpop.f32.mrb[6].mxu1 }
 0x12d   :  { %v7820_v46 = vpop.f32.mrb[7].mxu1 }
 0x12e   :  { %v1572_v54 = vadd.f32 %v7818_v52, %v1532_v45 }
 0x14a   :  { %v7838_v58 = vpop.f32.mrb[8].mxu1 }
 0x14b   :  { %v7839_v59 = vpop.f32.mrb[9].mxu1 }
 0x14c   :  { %v7840_v60 = vadd.f32 %v7839_v59, %v7838_v58  ;;  %v7841_v62 = vpop.f32.mrb[10].mxu1 }
 0x14d   :  { %v7842_v63 = vpop.f32.mrb[11].mxu1 }
 0x14e   :  { %v1612_v0 = vadd.f32 %v7840_v60, %v1572_v54 }
 0x17a   :  { %v1651_v6 = vpop.f32.mrb[12].mxu1 }
 0x17b   :  { %v1652_v7 = vadd.f32 %v1651_v6, %v1612_v0  ;;  %v1653_v8 = vpop.f32.mrb[13].mxu1 }
 0x17c   :  { %v1654_v9 = vpop.f32.mrb[14].mxu1 }
 0x17d   :  { %v1659_v11 = vmax.f32 %v1652_v7, 0.0  ;;  %v1655_v13 = vpop.f32.mrb[15].mxu1 }
 0x17f   :  { %v9984_v12 = vpack.c.bf16 %v1659_v11, %v1659_v11 }
 0x181   :  { %7969 = vmatmul.mubr.msk.bf16.vlgmr.msra.gmra.mrb[4].mxu0 %vm2057_vm3, %v9984_v12 }
 0x182   :  { %33 = vsyncpa [#allocation3], 0  ;;  %v9989_v14 = vsub.s32 0, %v9924_v35  ;;  %v9992_v15 = vsub.s32 1, %v9924_v35  ;;  %v99_v19 = vld [vmem:[%s11882_s7 + $0x40] sm:$0xff]  ;;  %v100_v20 = vld [vmem:[%s11882_s7 + $0x48] sm:$0xff] }
 0x183   :  { %s11885_s4 = sld [smem:[#allocation10_spill]]  ;;  %v2483_v24 = vpack.c.bf16 %v99_v19, %v99_v19  ;;  %s9106_s8 = smov 64   ;;  %v10014_v31 = vpack.c.bf16 %v100_v20, %v100_v20  ;;  %v8338_v36 = vld [vmem:[%s11883_s12 + $0x180] ss:$12 sps:$4 sm:$0xff]   ;;  %v8341_v42 = vld [vmem:[%s11883_s12 + $0x198] ss:$12 sps:$4 sm:$0xff]  }
 0x184   :  { %v357_v16 = vrot.slane %v9935_v38, %v9989_v14  ;;  %v361_v17 = vrot.slane %v9935_v38, %v9992_v15  ;;  %2526 = vrot.lane.b32.xlu1 %v9627_v61, %s9106_s8  ;;  %v8343_v38 = vld [vmem:[%s11883_s12 + $0x19c] ss:$12 sps:$4 sm:$0xff]   ;;  %v8344_v43 = vld [vmem:[%s11883_s12 + $0x1b4] ss:$12 sps:$4 sm:$0x3f]   ;;  %vm2669_vm4 = vcmask 1044480  }
 0x185   :  { %2528 = vrot.lane.b32.xlu0 %v2483_v24, %s9106_s8  ;;  %v8346_v44 = vld [vmem:[%s11883_s12 + $0x1b0] ss:$12 sps:$4 sm:$0x3f]   ;;  %v8347_v50 = vld [vmem:[%s11883_s12 + $0xc8] ss:$12 sps:$4 sm:$0xff]   ;;  %s11887_s2 = sld [smem:[#allocation9_spill]] }
 0x186   :  { %v2063_v48 = vsel %vm2061_vm2, %v8346_v44, 0  ;;  %v8348_v53 = vld [vmem:[%s11883_s12 + $0x8] ss:$12 sps:$4 sm:$0xff]   ;;  %v8349_v46 = vld [vmem:[%s11883_s12 + $0xe0] ss:$12 sps:$4 sm:$0xff]   ;;  %vm2664_vm5 = vcmask 596992  }
 0x187   :  { %v8350_v55 = vld [vmem:[%s11883_s12 + $0x20] ss:$12 sps:$4 sm:$0xff]   ;;  %v8351_v56 = vld [vmem:[%s11883_s12 + $0xf8] ss:$12 sps:$4 sm:$0xff]   ;;  %v8353_v58 = vld [vmem:[%s11883_s12 + $0x110] ss:$12 sps:$4 sm:$0xff]  }
 0x188   :  { %v8352_v57 = vld [vmem:[%s11883_s12 + $0x38] ss:$12 sps:$4 sm:$0xff]   ;;  %v8354_v59 = vld [vmem:[%s11883_s12 + $0x50] ss:$12 sps:$4 sm:$0xff]   ;;  %v8355_v60 = vld [vmem:[%s11883_s12 + $0x128] ss:$12 sps:$4 sm:$0xff]  }
 0x189   :  { %v8363_v21 = vld [vmem:[%s11885_s4 + $0x40] sm:$0xff]   ;;  %v8365_v26 = vld [vmem:[%s11885_s4 + $0x48] sm:$0xff]   ;;  %v8367_v33 = vld [vmem:[%s11885_s4 + $0x50] sm:$0xff]   ;;  %2530 = vrot.lane.b32.xlu0 %v10014_v31, %s9106_s8  ;;  %s11886_s8 = sld [smem:[#allocation12_spill]]  ;;  %vm2668_vm6 = vcmask 1043456   ;;  %s9108_s30 = smov 92  }
 0x18a   :  { %v8364_v25 = vld [vmem:[%s11885_s4] sm:$0xff]   ;;  %7870 = vmatprep.subr.bf16.mxu0 %v8363_v21  ;;  %v8366_v61 = vld [vmem:[%s11885_s4 + $0x8] sm:$0xff]   ;;  %v8368_v40 = vld [vmem:[%s11885_s4 + $0x10] sm:$0xff]   ;;  %v9107_v21 = vmov 65535   ;;  %s11889_s6 = sld [smem:[#allocation16_spill]]  ;;  %vm3229_vm7 = vcmask 752640  }
 0x18b   :  { %7871 = vmatpush3.bf16.msra.mxu0 %v8364_v25  ;;  %v8369_v41 = vld [vmem:[%s11885_s4 + $0x58] sm:$0xff]   ;;  %v8371_v47 = vld [vmem:[%s11885_s4 + $0x60] sm:$0xff]   ;;  %v8373_v52 = vld [vmem:[%s11885_s4 + $0x68] sm:$0xff]   ;;  %vm2885_vm8 = vcmask 588800   ;;  %vm3736_vm9 = vcmask 130048   ;;  %s11892_s29 = sld [smem:[#allocation15_spill]] }
 0x18c   :  { %7872 = vmatprep.subr.bf16.mxu0 %v8365_v26  ;;  %v8370_v45 = vld [vmem:[%s11885_s4 + $0x18] sm:$0xff]   ;;  %v8372_v51 = vld [vmem:[%s11885_s4 + $0x20] sm:$0xff]   ;;  %v8374_v54 = vld [vmem:[%s11885_s4 + $0x28] sm:$0xff]   ;;  %vm5075_vm10 = vcmask 1040384   ;;  %vm5071_vm11 = vcmask 277504   ;;  %vm5525_vm12 = vcmask 220160  }
 0x18d   :  { %v8356_v62 = vld [vmem:[%s11883_s12 + $0x68] ss:$12 sps:$4 sm:$0xff]   ;;  %v8357_v63 = vld [vmem:[%s11883_s12 + $0x140] ss:$12 sps:$4 sm:$0xff]   ;;  %v8359_v1 = vld [vmem:[%s11883_s12 + $0x158] ss:$12 sps:$4 sm:$0xff]  }
 0x18e   :  { %v8358_v0 = vld [vmem:[%s11883_s12 + $0x80] ss:$12 sps:$4 sm:$0xff]   ;;  %v8360_v2 = vld [vmem:[%s11883_s12 + $0x98] ss:$12 sps:$4 sm:$0xff]   ;;  %v8361_v3 = vld [vmem:[%s11883_s12 + $0x170] ss:$12 sps:$4 sm:$0xff]  }
 0x18f   :  { %7873 = vmatpush3.bf16.msra.mxu0 %v8366_v61  ;;  %v8362_v4 = vld [vmem:[%s11883_s12 + $0xb0] ss:$12 sps:$4 sm:$0xff]   ;;  %v8384_v20 = vld [vmem:[%s11886_s8 + $0x4] ss:$8 sps:$4 sm:$0xff]   ;;  %vm6441_vm13 = vcmask 949248   ;;  %vm6445_vm14 = vcmask 1041408  }
 0x190   :  { %7874 = vmatprep.subr.bf16.mxu0 %v8367_v33  ;;  %v8375_v5 = vld [vmem:[%s11885_s4 + $0x70] sm:$0xff]   ;;  %v8377_v7 = vld [vmem:[%s11885_s4 + $0x78] sm:$0xff]   ;;  %s9110_s11 = smov [#allocation2]  }
 0x191   :  { %v8376_v6 = vld [vmem:[%s11885_s4 + $0x30] sm:$0xff]   ;;  %v8378_v8 = vld [vmem:[%s11885_s4 + $0x38] sm:$0xff]   ;;  %s6982_s12 = sshll.u32 %s9110_s11, 4  ;;  %s6983_s12 = int_to_ptr.vmem [resolvable:$true] %s6982_s12 }
 0x192   :  { %p9084_p1 = scmp.lt.s32.totalorder %s6983_s12, %s6983_s12 }
 0x193   :  { %7875 = vmatpush3.bf16.msra.mxu0 %v8368_v40 }
 0x194   :  { %7876 = vmatprep.subr.bf16.mxu0 %v8369_v41 }
 0x197   :  { %7877 = vmatpush3.bf16.msra.mxu0 %v8370_v45 }
 0x198   :  { %7878 = vmatprep.subr.bf16.mxu0 %v8371_v47 }
 0x19b   :  { %7879 = vmatpush3.bf16.msra.mxu0 %v8372_v51 }
 0x19c   :  { %7880 = vmatprep.subr.bf16.mxu0 %v8373_v52  ;;  %v8387_v52 = vld [vmem:[%s11886_s8 + $0x14] ss:$8 sps:$4 sm:$0xff]  }
 0x19f   :  { %7881 = vmatpush3.bf16.msra.mxu0 %v8374_v54  ;;  %v8390_v54 = vld [vmem:[%s11886_s8 + $0x24] ss:$8 sps:$4 sm:$0xff]  }
 0x1a0   :  { %7882 = vmatprep.subr.bf16.mxu0 %v8375_v5  ;;  %v8411_v5 = vld [vmem:[%s11886_s8 + $0x94] ss:$8 sps:$4 sm:$0xff]  }
 0x1a3   :  { %7883 = vmatpush3.bf16.msra.mxu0 %v8376_v6  ;;  %v8409_v6 = vld [vmem:[%s11886_s8 + $0x90] ss:$8 sps:$4 sm:$0xff]  }
 0x1a4   :  { %7884 = vmatprep.subr.bf16.mxu0 %v8377_v7  ;;  %v8414_v7 = vld [vmem:[%s11886_s8 + $0xa4] ss:$8 sps:$4 sm:$0xff]  }
 0x1a7   :  { %7885 = vmatpush3.bf16.msra.mxu0 %v8378_v8  ;;  %v2670_v8 = vsel %vm2668_vm6, 4294967295, %v9107_v21 }
 0x1d8   :  { %v1490_v18 = vpop.f32.mrb[0].mxu0 }
 0x1d9   :  { %v7982_v22 = vadd.f32 %v1490_v18, %v357_v16  ;;  %v1492_v23 = vpop.f32.mrb[1].mxu0  ;;  %v8379_v16 = vld [vmem:[%s11885_s4 + $0x80] sm:$0xff]   ;;  %v8381_v18 = vld [vmem:[%s11885_s4 + $0x90] sm:$0x3f]  }
 0x1da   :  { %v7983_v27 = vadd.f32 %v1492_v23, %v361_v17  ;;  %v1494_v28 = vpop.f32.mrb[2].mxu0  ;;  %v8380_v17 = vld [vmem:[%s11885_s4 + $0x88] sm:$0xff]   ;;  %v2401_v19 = vsel %vm2061_vm2, %v8381_v18, 0  ;;  %s11888_s4 = sld [smem:[#allocation14_spill]] }
 0x1db   :  { %v1657_v29 = vmax.f32 %v7982_v22, 0.0  ;;  %v1495_v30 = vpop.f32.mrb[3].mxu0  ;;  %v10148_v22 = vsel %vm2669_vm4, 4294967295, %v9107_v21 }
 0x1dc   :  { %v1658_v32 = vmax.f32 %v7983_v27, 0.0 }
 0x1dd   :  { %v10025_v37 = vpack.c.bf16 %v1657_v29, %v1657_v29 }
 0x1de   :  { %v1661_v34 = vpack.c.bf16 %v1658_v32, %v1658_v32 }
 0x1e0   :  { %2103 = vmatprep.mubr.bf16.mxu1 %v1661_v34 }
 0x1e1   :  { %2104 = vmatmul.mubr.bf16.vlgmr.msra.gmra.mrb[16].mxu1 %v10025_v37 }
 0x1e2   :  { %2113 = vmatpush1.bf16.msra.mxu1 %v8338_v36  ;;  %2144 = vmatprep.mubr.bf16.mxu1 %v9103_v49 }
 0x1e3   :  { %2114 = vmatprep.subr.bf16.mxu1 %v8343_v38 }
 0x1e6   :  { %2115 = vmatpush1.bf16.msra.mxu1 %v8341_v42 }
 0x1e7   :  { %7229 = vmatprep.subr.msk.bf16.mxu1 %vm2061_vm2, %v8344_v43 }
 0x1ea   :  { %2117 = vmatpush1.bf16.msra.mxu1 %v2063_v48 }
 0x1eb   :  { %7844 = vmatprep.subr.bf16.mxu1 %v8347_v50  ;;  %v8382_v50 = vld [vmem:[%s11886_s8] ss:$8 sps:$4 sm:$0xff]  }
 0x1ed   :  { %7230 = vmatmul.mubr.msk.bf16.vlgmr.msra.gmra.mrb[16].mxu1 %vm2057_vm3, %v9984_v12 }
 0x1ee   :  { %7845 = vmatpush3.bf16.msra.mxu1 %v8348_v53  ;;  %2185 = vmatprep.mubr.bf16.mxu1 %v1661_v34 }
 0x1ef   :  { %7846 = vmatprep.subr.bf16.mxu1 %v8349_v46  ;;  %v8385_v46 = vld [vmem:[%s11886_s8 + $0x10] ss:$8 sps:$4 sm:$0xff]  }
 0x1f2   :  { %7847 = vmatpush3.bf16.msra.mxu1 %v8350_v55  ;;  %v8388_v55 = vld [vmem:[%s11886_s8 + $0x20] ss:$8 sps:$4 sm:$0xff]  }
 0x1f3   :  { %7848 = vmatprep.subr.bf16.mxu1 %v8351_v56  ;;  %v8393_v56 = vld [vmem:[%s11886_s8 + $0x34] ss:$8 sps:$4 sm:$0xff]  }
 0x1f6   :  { %7849 = vmatpush3.bf16.msra.mxu1 %v8352_v57  ;;  %v8391_v57 = vld [vmem:[%s11886_s8 + $0x30] ss:$8 sps:$4 sm:$0xff]  }
 0x1f7   :  { %7850 = vmatprep.subr.bf16.mxu1 %v8353_v58  ;;  %v10156_v40 = vpop.permute.xlu0 %2528  ;;  %v8396_v58 = vld [vmem:[%s11886_s8 + $0x44] ss:$8 sps:$4 sm:$0xff]  }
 0x1fa   :  { %7851 = vmatpush3.bf16.msra.mxu1 %v8354_v59  ;;  %v8394_v59 = vld [vmem:[%s11886_s8 + $0x40] ss:$8 sps:$4 sm:$0xff]  }
 0x1fb   :  { %7852 = vmatprep.subr.bf16.mxu1 %v8355_v60  ;;  %v2531_v47 = vpop.permute.xlu0 %2530  ;;  %v8399_v60 = vld [vmem:[%s11886_s8 + $0x54] ss:$8 sps:$4 sm:$0xff]  }
 0x1fc   :  { %v2534_v53 = vsel %vm1329_vm0, %v10156_v40, %v2531_v47  ;;  %v8456_v47 = vld [vmem:[%s11888_s4 + $0xb4] ss:$8 sps:$4 sm:$0xff]  }
 0x1fe   :  { %7853 = vmatpush3.bf16.msra.mxu1 %v8356_v62  ;;  %v8397_v62 = vld [vmem:[%s11886_s8 + $0x50] ss:$8 sps:$4 sm:$0xff]  }
 0x1ff   :  { %7854 = vmatprep.subr.bf16.mxu1 %v8357_v63  ;;  %v8402_v63 = vld [vmem:[%s11886_s8 + $0x64] ss:$8 sps:$4 sm:$0xff]  }
 0x202   :  { %7855 = vmatpush3.bf16.msra.mxu1 %v8358_v0  ;;  %v8400_v0 = vld [vmem:[%s11886_s8 + $0x60] ss:$8 sps:$4 sm:$0xff]  }
 0x203   :  { %7856 = vmatprep.subr.bf16.mxu1 %v8359_v1  ;;  %v8405_v1 = vld [vmem:[%s11886_s8 + $0x74] ss:$8 sps:$4 sm:$0xff]  }
 0x206   :  { %7857 = vmatpush3.bf16.msra.mxu1 %v8360_v2  ;;  %v8403_v2 = vld [vmem:[%s11886_s8 + $0x70] ss:$8 sps:$4 sm:$0xff]  }
 0x207   :  { %7858 = vmatprep.subr.bf16.mxu1 %v8361_v3  ;;  %v8408_v3 = vld [vmem:[%s11886_s8 + $0x84] ss:$8 sps:$4 sm:$0xff]  }
 0x20a   :  { %7859 = vmatpush3.bf16.msra.mxu1 %v8362_v4  ;;  %v8406_v4 = vld [vmem:[%s11886_s8 + $0x80] ss:$8 sps:$4 sm:$0xff]  }
 0x20b   :  { %7972 = vmatprep.subr.bf16.mxu1 %v9104_v10 }
 0x20d   :  { %2186 = vmatmul.mubr.bf16.vlgmr.msra.gmra.mrb[20].mxu1 %v10025_v37 }
 0x20e   :  { %7978 = vmatprep.mubr.msk.bf16.mxu1 %vm9105_vm1, %v9104_v10  ;;  %7973 = vmatpush3.bf16.msra.mxu1 %v8379_v16  ;;  %v8415_v16 = vld [vmem:[%s11886_s8 + $0xb0] ss:$8 sps:$4 sm:$0xff]  }
 0x20f   :  { %7974 = vmatprep.subr.bf16.mxu1 %v9104_v10 }
 0x212   :  { %7975 = vmatpush3.bf16.msra.mxu1 %v8380_v17  ;;  %v8418_v17 = vld [vmem:[%s11886_s8 + $0xc0] ss:$8 sps:$4 sm:$0x1f]  }
 0x213   :  { %7976 = vmatprep.subr.bf16.mxu1 %v9104_v10  ;;  %v1739_v10 = vld [vmem:[%s11887_s2] sm:$0x7]  ;;  %s11890_s2 = sld [smem:[#allocation11_spill]] }
 0x214   :  { %v1744_v23 = vrot.slane %v1739_v10, %v9989_v14  ;;  %v1748_v24 = vrot.slane %v1739_v10, %v9992_v15  ;;  %v1752_v37 = vrot.slane %v1739_v10, %v9938_v39  ;;  %v8421_v10 = vld [vmem:[%s11888_s4] ss:$8 sps:$4 sm:$0xff]  }
 0x216   :  { %7977 = vmatpush3.bf16.msra.mxu1 %v2401_v19 }
 0x217   :  { %2678 = vmatprep.subr.bf16.mxu1 %v8384_v20  ;;  %v2527_v20 = vpop.permute.xlu1 %2526 }
 0x218   :  { %v2533_v21 = vsel %vm1329_vm0, %v2527_v20, %v10156_v40  ;;  %v8447_v40 = vld [vmem:[%s11888_s4 + $0x84] ss:$8 sps:$4 sm:$0xff]  }
 0x254   :  { %v2227_v9 = vpop.f32.mrb[4].mxu0 }
 0x255   :  { %v7970_v11 = vpop.f32.mrb[5].mxu0 }
 0x256   :  { %v2230_v13 = vpop.f32.mrb[6].mxu0  ;;  %v8417_v11 = vld [vmem:[%s11886_s8 + $0xb4] ss:$8 sps:$4 sm:$0xff]  }
 0x257   :  { %v7971_v12 = vpop.f32.mrb[7].mxu0  ;;  %v8420_v13 = vld [vmem:[%s11886_s8 + $0xc4] ss:$8 sps:$4 sm:$0x1f]  }
 0x258   :  { %v2671_v12 = vsel %vm2669_vm4, %v2670_v8, 0  ;;  %v8504_v8 = vld [vmem:[%s11889_s6 + $0x30] sm:$0xff]  }
 0x259   :  { %v2676_v18 = vand.u32 %v8420_v13, %v2671_v12  ;;  %v2673_v19 = vand.u32 %v8418_v17, %v2671_v12  ;;  %v8516_v13 = vld [vmem:[%s11889_s6 + $0x48] sm:$0xff]   ;;  %v7232_v12 = vld [vmem:[%s11890_s2] ss:$0 sm:$0xff] }
 0x2c0   :  { %v2146_v25 = vpop.f32.mrb[16].mxu1 }
 0x2c1   :  { %v7984_v26 = vadd.f32 %v2146_v25, %v1744_v23  ;;  %v2148_v27 = vpop.f32.mrb[17].mxu1  ;;  %v8423_v23 = vld [vmem:[%s11888_s4 + $0x4] ss:$8 sps:$4 sm:$0xff]   ;;  %v8424_v25 = vld [vmem:[%s11888_s4 + $0x10] ss:$8 sps:$4 sm:$0xff]  }
 0x2c2   :  { %v7985_v28 = vadd.f32 %v2148_v27, %v1748_v24  ;;  %v2150_v29 = vpop.f32.mrb[18].mxu1  ;;  %v8426_v24 = vld [vmem:[%s11888_s4 + $0x14] ss:$8 sps:$4 sm:$0xff]   ;;  %2895 = vmatprep.subr.bf16.mxu0 %v8423_v23  ;;  %v8427_v27 = vld [vmem:[%s11888_s4 + $0x20] ss:$8 sps:$4 sm:$0xff]  }
 0x2c3   :  { %v2233_v30 = vmax.f32 %v7984_v26, 0.0  ;;  %v2151_v61 = vpop.f32.mrb[19].mxu1  ;;  %v8429_v26 = vld [vmem:[%s11888_s4 + $0x24] ss:$8 sps:$4 sm:$0xff]   ;;  %v8430_v29 = vld [vmem:[%s11888_s4 + $0x30] ss:$8 sps:$4 sm:$0xff]  }
 0x2c4   :  { %v2234_v32 = vmax.f32 %v7985_v28, 0.0  ;;  %v8432_v28 = vld [vmem:[%s11888_s4 + $0x34] ss:$8 sps:$4 sm:$0xff]   ;;  %v8433_v61 = vld [vmem:[%s11888_s4 + $0x40] ss:$8 sps:$4 sm:$0xff]  }
 0x2c5   :  { %v2236_v34 = vpack.c.bf16 %v2233_v30, %v2233_v30  ;;  %v8435_v30 = vld [vmem:[%s11888_s4 + $0x44] ss:$8 sps:$4 sm:$0xff]  }
 0x2c6   :  { %v2237_v33 = vpack.c.bf16 %v2234_v32, %v2234_v32  ;;  %v8438_v32 = vld [vmem:[%s11888_s4 + $0x54] ss:$8 sps:$4 sm:$0xff]  }
 0x2c8   :  { %2435 = vmatprep.mubr.bf16.mxu0 %v2237_v33  ;;  %v8436_v33 = vld [vmem:[%s11888_s4 + $0x50] ss:$8 sps:$4 sm:$0xff]  }
 0x2c9   :  { %2436 = vmatmul.mubr.bf16.vlgmr.msra.gmra.mrb[8].mxu0 %v2236_v34  ;;  %v8441_v34 = vld [vmem:[%s11888_s4 + $0x64] ss:$8 sps:$4 sm:$0xff]  }
 0x2ca   :  { %2896 = vmatpush1.bf16.msra.mxu0 %v8421_v10 }
 0x2cb   :  { %2897 = vmatprep.subr.bf16.mxu0 %v8426_v24 }
 0x2ce   :  { %2898 = vmatpush1.bf16.msra.mxu0 %v8424_v25 }
 0x2cf   :  { %2899 = vmatprep.subr.bf16.mxu0 %v8429_v26 }
 0x2d2   :  { %2900 = vmatpush1.bf16.msra.mxu0 %v8427_v27 }
 0x2d3   :  { %2901 = vmatprep.subr.bf16.mxu0 %v8432_v28 }
 0x2d6   :  { %2902 = vmatpush1.bf16.msra.mxu0 %v8430_v29 }
 0x2d7   :  { %2903 = vmatprep.subr.bf16.mxu0 %v8435_v30 }
 0x2da   :  { %2904 = vmatpush1.bf16.msra.mxu0 %v8433_v61 }
 0x2db   :  { %2905 = vmatprep.subr.bf16.mxu0 %v8438_v32 }
 0x2de   :  { %2906 = vmatpush1.bf16.msra.mxu0 %v8436_v33 }
 0x2df   :  { %2907 = vmatprep.subr.bf16.mxu0 %v8441_v34 }
 0x2e0   :  { %v7860_v36 = vpop.f32.mrb[20].mxu1 }
 0x2e1   :  { %v7861_v38 = vpop.f32.mrb[21].mxu1 }
 0x2e2   :  { %v7862_v41 = vadd.f32 %v7861_v38, %v7860_v36  ;;  %v7863_v42 = vpop.f32.mrb[22].mxu1  ;;  %v8439_v36 = vld [vmem:[%s11888_s4 + $0x60] ss:$8 sps:$4 sm:$0xff]   ;;  %v8442_v38 = vld [vmem:[%s11888_s4 + $0x70] ss:$8 sps:$4 sm:$0xff]  }
 0x2e3   :  { %v7864_v43 = vpop.f32.mrb[23].mxu1  ;;  %2908 = vmatpush1.bf16.msra.mxu0 %v8439_v36  ;;  %v8450_v42 = vld [vmem:[%s11888_s4 + $0x94] ss:$8 sps:$4 sm:$0xff]  }
 0x2e4   :  { %v2188_v44 = vadd.f32 %v7862_v41, %v1752_v37  ;;  %v8444_v37 = vld [vmem:[%s11888_s4 + $0x74] ss:$8 sps:$4 sm:$0xff]   ;;  %v8445_v41 = vld [vmem:[%s11888_s4 + $0x80] ss:$8 sps:$4 sm:$0xff]   ;;  %v8448_v43 = vld [vmem:[%s11888_s4 + $0x90] ss:$8 sps:$4 sm:$0xff]  }
 0x2e5   :  { %2909 = vmatprep.subr.bf16.mxu0 %v8444_v37  ;;  %v8459_v37 = vld [vmem:[%s11845_s13] ss:$16 sps:$4 sm:$0xff]  }
 0x2e6   :  { %v2228_v45 = vadd.f32 %v2227_v9, %v2188_v44  ;;  %v8412_v9 = vld [vmem:[%s11886_s8 + $0xa0] ss:$8 sps:$4 sm:$0xff]   ;;  %v8453_v44 = vld [vmem:[%s11888_s4 + $0xa4] ss:$8 sps:$4 sm:$0xff]  }
 0x2e7   :  { %2910 = vmatpush1.bf16.msra.mxu0 %v8442_v38 }
 0x2e8   :  { %v2235_v48 = vmax.f32 %v2228_v45, 0.0  ;;  %2911 = vmatprep.subr.bf16.mxu0 %v8447_v40  ;;  %v8451_v45 = vld [vmem:[%s11888_s4 + $0xa0] ss:$8 sps:$4 sm:$0xff]  }
 0x2ea   :  { %v2238_v51 = vpack.c.bf16 %v2235_v48, %v2235_v48  ;;  %v8454_v48 = vld [vmem:[%s11888_s4 + $0xb0] ss:$8 sps:$4 sm:$0xff]  }
 0x2eb   :  { %2912 = vmatpush1.bf16.msra.mxu0 %v8445_v41  ;;  %v8464_v41 = vld [vmem:[%s11845_s13 + $0x24] ss:$16 sps:$4 sm:$0xff]  }
 0x2ec   :  { %7979 = vmatmul.mubr.msk.bf16.vlgmr.msra.gmra.mrb[24].mxu1 %vm2057_vm3, %v2238_v51  ;;  %2913 = vmatprep.subr.bf16.mxu0 %v8450_v42 }
 0x2ed   :  { %2679 = vmatpush1.bf16.msra.mxu1 %v8382_v50  ;;  %7279 = vmatprep.mubr.msk.bf16.mxu1 %vm2664_vm5, %v2534_v53  ;;  %v2747_v50 = vld [vmem:[%s11888_s4 + $0xc0] sm:$0xff]  ;;  %s9109_s4 = smov 119  }
 0x2ee   :  { %2680 = vmatprep.subr.bf16.mxu1 %v8387_v52  ;;  %v7305_v51 = vcombine.high %v2747_v50, %v2747_v50  ;;  %v7304_v52 = vcombine.low %v2747_v50, %v2747_v50  ;;  %v8473_v50 = vld [vmem:[%s11845_s13 + $0x84] ss:$16 sps:$4 sm:$0xff]  }
 0x2ef   :  { %2914 = vmatpush1.bf16.msra.mxu0 %v8448_v43  ;;  %v8462_v43 = vld [vmem:[%s11845_s13 + $0x20] ss:$16 sps:$4 sm:$0xff]  }
 0x2f0   :  { %2915 = vmatprep.subr.bf16.mxu0 %v8453_v44  ;;  %v2890_v53 = vsel %vm2668_vm6, %v7304_v52, 0  ;;  %v8467_v44 = vld [vmem:[%s11845_s13 + $0x44] ss:$16 sps:$4 sm:$0xff]  }
 0x2f1   :  { %2681 = vmatpush1.bf16.msra.mxu1 %v8385_v46  ;;  %v101_v46 = vld [vmem:[%s11882_s7 + $0x50] sm:$0xff] }
 0x2f2   :  { %2682 = vmatprep.subr.bf16.mxu1 %v8390_v54  ;;  %v102_v54 = vld [vmem:[%s11882_s7 + $0x58] sm:$0xff]  ;;  %v8476_v52 = vld [vmem:[%s11845_s13 + $0xa4] ss:$16 sps:$4 sm:$0xff]  }
 0x2f3   :  { %2916 = vmatpush1.bf16.msra.mxu0 %v8451_v45  ;;  %v8465_v45 = vld [vmem:[%s11845_s13 + $0x40] ss:$16 sps:$4 sm:$0xff]  }
 0x2f4   :  { %2917 = vmatprep.subr.bf16.mxu0 %v8456_v47  ;;  %v8470_v47 = vld [vmem:[%s11845_s13 + $0x64] ss:$16 sps:$4 sm:$0xff]  }
 0x2f5   :  { %2683 = vmatpush1.bf16.msra.mxu1 %v8388_v55  ;;  %v103_v55 = vld [vmem:[%s11882_s7 + $0x60] sm:$0xff] }
 0x2f6   :  { %2684 = vmatprep.subr.bf16.mxu1 %v8393_v56  ;;  %v3093_v56 = vpack.c.bf16 %v101_v46, %v101_v46  ;;  %v8479_v46 = vld [vmem:[%s11845_s13 + $0xc4] ss:$16 sps:$4 sm:$0xff]  }
 0x2f7   :  { %2918 = vmatpush1.bf16.msra.mxu0 %v8454_v48  ;;  %v8468_v48 = vld [vmem:[%s11845_s13 + $0x60] ss:$16 sps:$4 sm:$0xff]  }
 0x2f8   :  { %7306 = vmatprep.subr.msk.bf16.mxu0 %vm2668_vm6, %v7305_v51  ;;  %3223 = vrot.lane.b32.xlu1 %v3093_v56, %s9108_s30  ;;  %v8471_v51 = vld [vmem:[%s11845_s13 + $0x80] ss:$16 sps:$4 sm:$0xff]  }
 0x2f9   :  { %2685 = vmatpush1.bf16.msra.mxu1 %v8391_v57  ;;  %v3094_v57 = vpack.c.bf16 %v102_v54, %v102_v54  ;;  %v8477_v54 = vld [vmem:[%s11845_s13 + $0xc0] ss:$16 sps:$4 sm:$0xff]  }
 0x2fa   :  { %2686 = vmatprep.subr.bf16.mxu1 %v8396_v58  ;;  %v8461_v58 = vld [vmem:[%s11845_s13 + $0x4] ss:$16 sps:$4 sm:$0xff]   ;;  %v8481_v56 = vld [vmem:[%s11845_s13 + $0xe0] ss:$16 sps:$4 sm:$0xff]  }
 0x2fb   :  { %2920 = vmatpush1.bf16.msra.mxu0 %v2890_v53  ;;  %3225 = vrot.lane.b32.xlu0 %v3094_v57, %s9108_s30  ;;  %v8474_v53 = vld [vmem:[%s11845_s13 + $0xa0] ss:$16 sps:$4 sm:$0xff]   ;;  %v8487_v57 = vld [vmem:[%s11845_s13 + $0x104] ss:$16 sps:$4 sm:$0xff]  }
 0x2fc   :  { %3740 = vmatprep.subr.bf16.mxu0 %v8461_v58  ;;  %3221 = vrot.lane.b32.xlu1 %v10014_v31, %s9108_s30  ;;  %v8485_v58 = vld [vmem:[%s11845_s13 + $0x100] ss:$16 sps:$4 sm:$0xff]  }
 0x2fd   :  { %2687 = vmatpush1.bf16.msra.mxu1 %v8394_v59  ;;  %v3095_v59 = vpack.c.bf16 %v103_v55, %v103_v55  ;;  %v8483_v55 = vld [vmem:[%s11845_s13 + $0xe4] ss:$16 sps:$4 sm:$0xff]  }
 0x2fe   :  { %2688 = vmatprep.subr.bf16.mxu1 %v8399_v60  ;;  %v8480_v60 = vld [vmem:[%s11889_s6] sm:$0xff]  }
 0x2ff   :  { %3227 = vrot.lane.b32.xlu0 %v3095_v59, %s9108_s30  ;;  %s11891_s30 = sld [smem:[#allocation13_spill]]  ;;  %v8491_v59 = vld [vmem:[%s11845_s13 + $0x124] ss:$16 sps:$4 sm:$0xff]  }
 0x300   :  { %5487 = vrot.lane.b32.xlu1 %v10014_v31, %s9109_s4 }
 0x301   :  { %2689 = vmatpush1.bf16.msra.mxu1 %v8397_v62  ;;  %v8484_v62 = vld [vmem:[%s11889_s6 + $0x8] sm:$0xff]  }
 0x302   :  { %2690 = vmatprep.subr.bf16.mxu1 %v8402_v63 }
 0x305   :  { %2691 = vmatpush1.bf16.msra.mxu1 %v8400_v0  ;;  %v2511_v23 = vld [vmem:[%s11891_s30] sm:$0x3] }
 0x306   :  { %2692 = vmatprep.subr.bf16.mxu1 %v8405_v1  ;;  %v8488_v1 = vld [vmem:[%s11889_s6 + $0x10] sm:$0xff]   ;;  %v2516_v24 = vrot.slane %v2511_v23, %v9989_v14  ;;  %v2520_v25 = vrot.slane %v2511_v23, %v9992_v15  ;;  %v8528_v23 = vld [vmem:[%s11889_s6 + $0x60] ss:$0 sps:$4 sm:$0xff]  }
 0x309   :  { %2693 = vmatpush1.bf16.msra.mxu1 %v8403_v2 }
 0x30a   :  { %2694 = vmatprep.subr.bf16.mxu1 %v8408_v3 }
 0x30d   :  { %2695 = vmatpush1.bf16.msra.mxu1 %v8406_v4 }
 0x30e   :  { %2696 = vmatprep.subr.bf16.mxu1 %v8411_v5  ;;  %v8492_v5 = vld [vmem:[%s11889_s6 + $0x18] sm:$0xff]  }
 0x311   :  { %2697 = vmatpush1.bf16.msra.mxu1 %v8409_v6  ;;  %v8496_v6 = vld [vmem:[%s11889_s6 + $0x20] sm:$0xff]  }
 0x312   :  { %2698 = vmatprep.subr.bf16.mxu1 %v8414_v7  ;;  %v8500_v7 = vld [vmem:[%s11889_s6 + $0x28] sm:$0xff]  }
 0x315   :  { %2699 = vmatpush1.bf16.msra.mxu1 %v8412_v9  ;;  %v8508_v9 = vld [vmem:[%s11889_s6 + $0x38] sm:$0xff]  }
 0x316   :  { %2700 = vmatprep.subr.bf16.mxu1 %v8417_v11  ;;  %v8512_v11 = vld [vmem:[%s11889_s6 + $0x40] sm:$0xff]  }
 0x319   :  { %2701 = vmatpush1.bf16.msra.mxu1 %v8415_v16  ;;  %v8520_v16 = vld [vmem:[%s11889_s6 + $0x50] sm:$0xff]  }
 0x31a   :  { %2702 = vmatprep.subr.bf16.mxu1 %v2676_v18 }
 0x31d   :  { %2703 = vmatpush1.bf16.msra.mxu1 %v2673_v19 }
 0x31e   :  { %3053 = vmatprep.subr.bf16.mxu1 %v9103_v49 }
 0x320   :  { %2711 = vmatmul.mubr.bf16.vlgmr.msra.gmra.mrb[28].mxu1 %v2533_v21 }
 0x321   :  { %3054 = vmatpush1.bf16.msra.mxu1 %v8480_v60  ;;  %v8489_v60 = vld [vmem:[%s11845_s13 + $0x120] ss:$16 sps:$4 sm:$0xff]  }
 0x322   :  { %3055 = vmatprep.subr.bf16.mxu1 %v9103_v49 }
 0x325   :  { %3056 = vmatpush1.bf16.msra.mxu1 %v8484_v62  ;;  %v8495_v62 = vld [vmem:[%s11845_s13 + $0x144] ss:$16 sps:$4 sm:$0xff]  }
 0x326   :  { %3057 = vmatprep.subr.bf16.mxu1 %v9103_v49 }
 0x329   :  { %3058 = vmatpush1.bf16.msra.mxu1 %v8488_v1  ;;  %v8497_v1 = vld [vmem:[%s11845_s13 + $0x160] ss:$16 sps:$4 sm:$0xff]  }
 0x32a   :  { %3059 = vmatprep.subr.bf16.mxu1 %v9103_v49 }
 0x32d   :  { %3060 = vmatpush1.bf16.msra.mxu1 %v8492_v5  ;;  %v8505_v5 = vld [vmem:[%s11845_s13 + $0x1a0] ss:$16 sps:$4 sm:$0xff]  }
 0x32e   :  { %3061 = vmatprep.subr.bf16.mxu1 %v9103_v49 }
 0x331   :  { %3062 = vmatpush1.bf16.msra.mxu1 %v8496_v6  ;;  %v8511_v6 = vld [vmem:[%s11845_s13 + $0x1c4] ss:$16 sps:$4 sm:$0xff]  }
 0x332   :  { %3063 = vmatprep.subr.bf16.mxu1 %v9103_v49 }
 0x335   :  { %3064 = vmatpush1.bf16.msra.mxu1 %v8500_v7  ;;  %v8509_v7 = vld [vmem:[%s11845_s13 + $0x1c0] ss:$16 sps:$4 sm:$0xff]  }
 0x336   :  { %3065 = vmatprep.subr.bf16.mxu1 %v9103_v49 }
 0x339   :  { %3066 = vmatpush1.bf16.msra.mxu1 %v8504_v8  ;;  %v8515_v8 = vld [vmem:[%s11845_s13 + $0x1e4] ss:$16 sps:$4 sm:$0xff]  }
 0x33a   :  { %3067 = vmatprep.subr.bf16.mxu1 %v9103_v49 }
 0x33d   :  { %3068 = vmatpush1.bf16.msra.mxu1 %v8508_v9  ;;  %v8513_v9 = vld [vmem:[%s11845_s13 + $0x1e0] ss:$16 sps:$4 sm:$0xff]  }
 0x33e   :  { %3069 = vmatprep.subr.bf16.mxu1 %v9103_v49 }
 0x341   :  { %3070 = vmatpush1.bf16.msra.mxu1 %v8512_v11 }
 0x342   :  { %3071 = vmatprep.subr.bf16.mxu1 %v9103_v49 }
 0x345   :  { %3072 = vmatpush1.bf16.msra.mxu1 %v8516_v13  ;;  %v8519_v13 = vld [vmem:[%s11845_s13 + $0x204] ss:$16 sps:$4 sm:$0xff]  }
 0x346   :  { %3073 = vmatprep.subr.bf16.mxu1 %v9103_v49 }
 0x349   :  { %3074 = vmatpush1.bf16.msra.mxu1 %v8520_v16  ;;  %v8517_v16 = vld [vmem:[%s11845_s13 + $0x200] ss:$16 sps:$4 sm:$0xff]  }
 0x34a   :  { %3075 = vmatprep.subr.bf16.mxu1 %v9103_v49 }
 0x36a   :  { %v10391_v38 = vpop.permute.xlu1 %3223 }
 0x36d   :  { %v10386_v34 = vpop.permute.xlu0 %3225 }
 0x36e   :  { %v10399_v42 = vsel %vm3229_vm7, %v10391_v38, %v10386_v34  ;;  %v3222_v11 = vpop.permute.xlu1 %3221 }
 0x39c   :  { %v7886_v63 = vpop.f32.mrb[8].mxu0 }
 0x39d   :  { %v7887_v0 = vpop.f32.mrb[9].mxu0 }
 0x39e   :  { %v7888_v2 = vadd.f32 %v7887_v0, %v7886_v63  ;;  %v7889_v3 = vpop.f32.mrb[10].mxu0  ;;  %v8493_v63 = vld [vmem:[%s11845_s13 + $0x140] ss:$16 sps:$4 sm:$0xff]   ;;  %v8499_v0 = vld [vmem:[%s11845_s13 + $0x164] ss:$16 sps:$4 sm:$0xff]  }
 0x39f   :  { %v7890_v4 = vpop.f32.mrb[11].mxu0  ;;  %v8501_v3 = vld [vmem:[%s11845_s13 + $0x180] ss:$16 sps:$4 sm:$0xff]  }
 0x3a0   :  { %v2438_v17 = vadd.f32 %v7888_v2, %v7232_v12  ;;  %v8503_v2 = vld [vmem:[%s11845_s13 + $0x184] ss:$16 sps:$4 sm:$0xff]   ;;  %v10495_v12 = vsel %vm3229_vm7, %v3222_v11, %v10391_v38  ;;  %v8559_v38 = vld [vmem:[%s11845_s13 + $0x300] ss:$16 sps:$4 sm:$0xff]   ;;  %v8540_v11 = vld [vmem:[%s11845_s13 + $0x2c] ss:$16 sps:$4 sm:$0xff]  }
 0x3a1   :  { %v8507_v4 = vld [vmem:[%s11845_s13 + $0x1a4] ss:$16 sps:$4 sm:$0xff]  }
 0x3bf   :  { %v2477_v18 = vpop.f32.mrb[24].mxu1 }
 0x3c0   :  { %v10378_v19 = vadd.f32 %v2477_v18, %v2438_v17  ;;  %v7980_v20 = vpop.f32.mrb[25].mxu1  ;;  %v8523_v17 = vld [vmem:[%s11845_s13 + $0x224] ss:$16 sps:$4 sm:$0xff]   ;;  %v8521_v18 = vld [vmem:[%s11845_s13 + $0x220] ss:$16 sps:$4 sm:$0xff]  }
 0x3c1   :  { %v2480_v21 = vpop.f32.mrb[26].mxu1  ;;  %v8524_v20 = vld [vmem:[%s11889_s6 + $0x58] sm:$0xff]  }
 0x3c2   :  { %v7981_v10 = vpop.f32.mrb[27].mxu1  ;;  %3076 = vmatpush1.bf16.msra.mxu1 %v8524_v20  ;;  %v8527_v21 = vld [vmem:[%s11845_s13 + $0x244] ss:$16 sps:$4 sm:$0xff]   ;;  %v8552_v20 = vld [vmem:[%s11845_s13 + $0x6c] ss:$16 sps:$4 sm:$0xff]  }
 0x3c3   :  { %v8525_v10 = vld [vmem:[%s11845_s13 + $0x240] ss:$16 sps:$4 sm:$0xff]   ;;  %3077 = vmatprep.subr.bf16.mxu1 %v9103_v49 }
 0x3f3   :  { %v2712_v26 = vpop.f32.mrb[28].mxu1 }
 0x3f4   :  { %v2713_v27 = vadd.f32 %v2712_v26, %v2516_v24  ;;  %v2714_v28 = vpop.f32.mrb[29].mxu1  ;;  %v3051_v24 = vsel %vm2668_vm6, %v8528_v23, 0  ;;  %v8529_v26 = vld [vmem:[%s11845_s13 + $0x260] ss:$16 sps:$4 sm:$0xff]   ;;  %v8564_v23 = vld [vmem:[%s11845_s13 + $0xac] ss:$16 sps:$4 sm:$0xff]  }
 0x3f5   :  { %v2715_v29 = vadd.f32 %v2714_v28, %v2520_v25  ;;  %v2716_v30 = vpop.f32.mrb[30].mxu1  ;;  %3078 = vmatpush1.bf16.msra.mxu1 %v3051_v24  ;;  %v8531_v25 = vld [vmem:[%s11845_s13 + $0x264] ss:$16 sps:$4 sm:$0xff]   ;;  %v8535_v28 = vld [vmem:[%s11845_s13 + $0x280] ss:$16 sps:$4 sm:$0xff]  }
 0x3f6   :  { %v2719_v61 = vmax.f32 %v2713_v27, 0.0  ;;  %v2717_v32 = vpop.f32.mrb[31].mxu1  ;;  %v8534_v27 = vld [vmem:[%s11845_s13 + $0xc] ss:$16 sps:$4 sm:$0xff]   ;;  %v8541_v30 = vld [vmem:[%s11845_s13 + $0x2a0] ss:$16 sps:$4 sm:$0xff]  }
 0x3f7   :  { %v2720_v33 = vmax.f32 %v2715_v29, 0.0  ;;  %3822 = vmatprep.subr.bf16.mxu1 %v8534_v27  ;;  %v8537_v29 = vld [vmem:[%s11845_s13 + $0x284] ss:$16 sps:$4 sm:$0xff]   ;;  %v8547_v32 = vld [vmem:[%s11845_s13 + $0x2c0] ss:$16 sps:$4 sm:$0xff]  }
 0x3f8   :  { %v2721_v40 = vpack.c.bf16 %v2719_v61, %v2719_v61  ;;  %v8543_v61 = vld [vmem:[%s11845_s13 + $0x2a4] ss:$16 sps:$4 sm:$0xff]   ;;  %v8562_v24 = vld [vmem:[%s11845_s13 + $0xa8] ss:$16 sps:$4 sm:$0xff]   ;;  %v8570_v27 = vld [vmem:[%s11845_s13 + $0xec] ss:$16 sps:$4 sm:$0xff]  }
 0x3f9   :  { %v2722_v36 = vpack.c.bf16 %v2720_v33, %v2720_v33  ;;  %v8549_v33 = vld [vmem:[%s11845_s13 + $0x2c4] ss:$16 sps:$4 sm:$0xff]  }
 0x3fb   :  { %7307 = vmatprep.mubr.msk.bf16.mxu0 %vm2885_vm8, %v2722_v36  ;;  %v8553_v36 = vld [vmem:[%s11845_s13 + $0x2e0] ss:$16 sps:$4 sm:$0xff]  }
 0x3fc   :  { %2928 = vmatmul.mubr.bf16.vlgmr.msra.gmra.mrb[12].mxu0 %v2721_v40  ;;  %v8561_v40 = vld [vmem:[%s11845_s13 + $0x304] ss:$16 sps:$4 sm:$0xff]  }
 0x3fd   :  { %3741 = vmatpush1.bf16.msra.mxu0 %v8459_v37  ;;  %3772 = vmatprep.mubr.bf16.mxu0 %v10399_v42  ;;  %v8555_v37 = vld [vmem:[%s11845_s13 + $0x2e4] ss:$16 sps:$4 sm:$0xff]  }
 0x3fe   :  { %3742 = vmatprep.subr.bf16.mxu0 %v8464_v41  ;;  %v10560_v41 = vpop.permute.xlu0 %3227 }
 0x401   :  { %3743 = vmatpush1.bf16.msra.mxu0 %v8462_v43  ;;  %v10565_v43 = vsel %vm3229_vm7, %v10386_v34, %v10560_v41  ;;  %v8628_v34 = vld [vmem:[%s11847_s15 + $0x20] ss:$16 sps:$4 sm:$0xff]  }
 0x402   :  { %3744 = vmatprep.subr.bf16.mxu0 %v8467_v44  ;;  %v8622_v44 = vld [vmem:[%s11847_s15] ss:$16 sps:$4 sm:$0xff]  }
 0x405   :  { %3745 = vmatpush1.bf16.msra.mxu0 %v8465_v45  ;;  %v8624_v45 = vld [vmem:[%s11847_s15 + $0x4] ss:$16 sps:$4 sm:$0xff]  }
 0x406   :  { %3746 = vmatprep.subr.bf16.mxu0 %v8470_v47  ;;  %v8630_v47 = vld [vmem:[%s11847_s15 + $0x24] ss:$16 sps:$4 sm:$0xff]  }
 0x409   :  { %3747 = vmatpush1.bf16.msra.mxu0 %v8468_v48  ;;  %v8636_v48 = vld [vmem:[%s11847_s15 + $0x44] ss:$16 sps:$4 sm:$0xff]  }
 0x40a   :  { %3748 = vmatprep.subr.bf16.mxu0 %v8473_v50  ;;  %v8634_v50 = vld [vmem:[%s11847_s15 + $0x40] ss:$16 sps:$4 sm:$0xff]  }
 0x40d   :  { %3749 = vmatpush1.bf16.msra.mxu0 %v8471_v51  ;;  %v8642_v51 = vld [vmem:[%s11847_s15 + $0x64] ss:$16 sps:$4 sm:$0xff]  }
 0x40e   :  { %3750 = vmatprep.subr.bf16.mxu0 %v8476_v52  ;;  %v8640_v52 = vld [vmem:[%s11847_s15 + $0x60] ss:$16 sps:$4 sm:$0xff]  }
 0x411   :  { %3751 = vmatpush1.bf16.msra.mxu0 %v8474_v53  ;;  %v2748_v53 = vld [vmem:[%s11892_s29] sm:$0x3]  ;;  %s11893_s29 = sld [smem:[#allocation17_spill]] }
 0x412   :  { %3752 = vmatprep.subr.bf16.mxu0 %v8479_v46  ;;  %v8648_v46 = vld [vmem:[%s11847_s15 + $0x84] ss:$16 sps:$4 sm:$0xff]  }
 0x415   :  { %3753 = vmatpush1.bf16.msra.mxu0 %v8477_v54  ;;  %v8646_v54 = vld [vmem:[%s11847_s15 + $0x80] ss:$16 sps:$4 sm:$0xff]  }
 0x416   :  { %3754 = vmatprep.subr.bf16.mxu0 %v8483_v55  ;;  %v2753_v55 = vrot.slane %v2748_v53, %v9989_v14 }
 0x419   :  { %3755 = vmatpush1.bf16.msra.mxu0 %v8481_v56  ;;  %v2757_v56 = vrot.slane %v2748_v53, %v9992_v15  ;;  %v8595_v53 = vld [vmem:[%s11845_s13 + $0x208] ss:$16 sps:$4 sm:$0xff]  }
 0x41a   :  { %3756 = vmatprep.subr.bf16.mxu0 %v8487_v57  ;;  %v8654_v57 = vld [vmem:[%s11847_s15 + $0xa4] ss:$16 sps:$4 sm:$0xff]  }
 0x41d   :  { %3757 = vmatpush1.bf16.msra.mxu0 %v8485_v58 }
 0x41e   :  { %3758 = vmatprep.subr.bf16.mxu0 %v8491_v59  ;;  %v8652_v59 = vld [vmem:[%s11847_s15 + $0xa0] ss:$16 sps:$4 sm:$0xff]  }
 0x421   :  { %3759 = vmatpush1.bf16.msra.mxu0 %v8489_v60 }
 0x422   :  { %3760 = vmatprep.subr.bf16.mxu0 %v8495_v62 }
 0x425   :  { %3761 = vmatpush1.bf16.msra.mxu0 %v8493_v63 }
 0x426   :  { %3762 = vmatprep.subr.bf16.mxu0 %v8499_v0 }
 0x429   :  { %3763 = vmatpush1.bf16.msra.mxu0 %v8497_v1  ;;  %v8660_v1 = vld [vmem:[%s11847_s15 + $0xc4] ss:$16 sps:$4 sm:$0xff]  }
 0x42a   :  { %3764 = vmatprep.subr.bf16.mxu0 %v8503_v2 }
 0x42d   :  { %3765 = vmatpush1.bf16.msra.mxu0 %v8501_v3 }
 0x42e   :  { %3766 = vmatprep.subr.bf16.mxu0 %v8507_v4 }
 0x431   :  { %3767 = vmatpush1.bf16.msra.mxu0 %v8505_v5  ;;  %v8658_v5 = vld [vmem:[%s11847_s15 + $0xc0] ss:$16 sps:$4 sm:$0xff]  }
 0x432   :  { %3768 = vmatprep.subr.bf16.mxu0 %v8511_v6 }
 0x435   :  { %3769 = vmatpush1.bf16.msra.mxu0 %v8509_v7  ;;  %v8532_v7 = vld [vmem:[%s11845_s13 + $0x8] ss:$16 sps:$4 sm:$0xff]  }
 0x436   :  { %3770 = vmatprep.subr.bf16.mxu0 %v8515_v8  ;;  %v8666_v8 = vld [vmem:[%s11847_s15 + $0xe4] ss:$16 sps:$4 sm:$0xff]  }
 0x439   :  { %3771 = vmatpush1.bf16.msra.mxu0 %v8513_v9 }
 0x43a   :  { %3781 = vmatprep.subr.bf16.mxu0 %v8519_v13  ;;  %v8664_v13 = vld [vmem:[%s11847_s15 + $0xe0] ss:$16 sps:$4 sm:$0xff]  }
 0x43c   :  { %3773 = vmatmul.mubr.bf16.vlgmr.msra.gmra.mrb[16].mxu0 %v10495_v12 }
 0x43d   :  { %3782 = vmatpush1.bf16.msra.mxu0 %v8517_v16  ;;  %7423 = vmatprep.mubr.msk.bf16.mxu0 %vm3736_vm9, %v10560_v41  ;;  %v8538_v16 = vld [vmem:[%s11845_s13 + $0x28] ss:$16 sps:$4 sm:$0xff]  }
 0x43e   :  { %3783 = vmatprep.subr.bf16.mxu0 %v8523_v17  ;;  %v8546_v17 = vld [vmem:[%s11845_s13 + $0x4c] ss:$16 sps:$4 sm:$0xff]  }
 0x441   :  { %3784 = vmatpush1.bf16.msra.mxu0 %v8521_v18  ;;  %v8544_v18 = vld [vmem:[%s11845_s13 + $0x48] ss:$16 sps:$4 sm:$0xff]  }
 0x442   :  { %3785 = vmatprep.subr.bf16.mxu0 %v8527_v21  ;;  %v8558_v21 = vld [vmem:[%s11845_s13 + $0x8c] ss:$16 sps:$4 sm:$0xff]  }
 0x445   :  { %3786 = vmatpush1.bf16.msra.mxu0 %v8525_v10  ;;  %v8556_v10 = vld [vmem:[%s11845_s13 + $0x88] ss:$16 sps:$4 sm:$0xff]  }
 0x446   :  { %3787 = vmatprep.subr.bf16.mxu0 %v8531_v25  ;;  %v8567_v25 = vld [vmem:[%s11845_s13 + $0xcc] ss:$16 sps:$4 sm:$0xff]  }
 0x449   :  { %3788 = vmatpush1.bf16.msra.mxu0 %v8529_v26  ;;  %v8565_v26 = vld [vmem:[%s11845_s13 + $0xc8] ss:$16 sps:$4 sm:$0xff]  }
 0x44a   :  { %3789 = vmatprep.subr.bf16.mxu0 %v8537_v29  ;;  %v8573_v29 = vld [vmem:[%s11845_s13 + $0x10c] ss:$16 sps:$4 sm:$0xff]  }
 0x44d   :  { %3790 = vmatpush1.bf16.msra.mxu0 %v8535_v28  ;;  %v8568_v28 = vld [vmem:[%s11845_s13 + $0xe8] ss:$16 sps:$4 sm:$0xff]  }
 0x44e   :  { %3791 = vmatprep.subr.bf16.mxu0 %v8543_v61  ;;  %v8576_v61 = vld [vmem:[%s11845_s13 + $0x12c] ss:$16 sps:$4 sm:$0xff]  }
 0x451   :  { %3792 = vmatpush1.bf16.msra.mxu0 %v8541_v30  ;;  %v8571_v30 = vld [vmem:[%s11845_s13 + $0x108] ss:$16 sps:$4 sm:$0xff]  }
 0x452   :  { %3793 = vmatprep.subr.bf16.mxu0 %v8549_v33  ;;  %v8579_v33 = vld [vmem:[%s11845_s13 + $0x14c] ss:$16 sps:$4 sm:$0xff]  }
 0x455   :  { %3794 = vmatpush1.bf16.msra.mxu0 %v8547_v32  ;;  %v8574_v32 = vld [vmem:[%s11845_s13 + $0x128] ss:$16 sps:$4 sm:$0xff]  }
 0x456   :  { %3795 = vmatprep.subr.bf16.mxu0 %v8555_v37  ;;  %v8582_v37 = vld [vmem:[%s11845_s13 + $0x16c] ss:$16 sps:$4 sm:$0xff]  }
 0x459   :  { %3796 = vmatpush1.bf16.msra.mxu0 %v8553_v36  ;;  %v8577_v36 = vld [vmem:[%s11845_s13 + $0x148] ss:$16 sps:$4 sm:$0xff]  }
 0x45a   :  { %3797 = vmatprep.subr.bf16.mxu0 %v8561_v40  ;;  %v8585_v40 = vld [vmem:[%s11845_s13 + $0x18c] ss:$16 sps:$4 sm:$0xff]  }
 0x45d   :  { %3798 = vmatpush1.bf16.msra.mxu0 %v8559_v38  ;;  %v8580_v38 = vld [vmem:[%s11845_s13 + $0x168] ss:$16 sps:$4 sm:$0xff]  }
 0x45e   :  { %4537 = vmatprep.subr.bf16.mxu0 %v8624_v45  ;;  %v8588_v45 = vld [vmem:[%s11845_s13 + $0x1ac] ss:$16 sps:$4 sm:$0xff]  }
 0x460   :  { %3814 = vmatmul.mubr.bf16.vlgmr.msra.gmra.mrb[16].mxu0 %v10565_v43 }
 0x461   :  { %4538 = vmatpush1.bf16.msra.mxu0 %v8622_v44  ;;  %v8583_v44 = vld [vmem:[%s11845_s13 + $0x188] ss:$16 sps:$4 sm:$0xff]  }
 0x462   :  { %4539 = vmatprep.subr.bf16.mxu0 %v8630_v47  ;;  %v8586_v47 = vld [vmem:[%s11845_s13 + $0x1a8] ss:$16 sps:$4 sm:$0xff]  }
 0x465   :  { %4540 = vmatpush1.bf16.msra.mxu0 %v8628_v34  ;;  %v8591_v34 = vld [vmem:[%s11845_s13 + $0x1cc] ss:$16 sps:$4 sm:$0xff]  }
 0x466   :  { %4541 = vmatprep.subr.bf16.mxu0 %v8636_v48  ;;  %v8589_v48 = vld [vmem:[%s11845_s13 + $0x1c8] ss:$16 sps:$4 sm:$0xff]  }
 0x469   :  { %4542 = vmatpush1.bf16.msra.mxu0 %v8634_v50  ;;  %v8594_v50 = vld [vmem:[%s11845_s13 + $0x1ec] ss:$16 sps:$4 sm:$0xff]  }
 0x46a   :  { %4543 = vmatprep.subr.bf16.mxu0 %v8642_v51  ;;  %v8592_v51 = vld [vmem:[%s11845_s13 + $0x1e8] ss:$16 sps:$4 sm:$0xff]  }
 0x46d   :  { %4544 = vmatpush1.bf16.msra.mxu0 %v8640_v52  ;;  %v8597_v52 = vld [vmem:[%s11845_s13 + $0x20c] ss:$16 sps:$4 sm:$0xff]  }
 0x46e   :  { %4545 = vmatprep.subr.bf16.mxu0 %v8648_v46  ;;  %v8600_v46 = vld [vmem:[%s11845_s13 + $0x22c] ss:$16 sps:$4 sm:$0xff]  }
 0x471   :  { %4546 = vmatpush1.bf16.msra.mxu0 %v8646_v54  ;;  %v8598_v54 = vld [vmem:[%s11845_s13 + $0x228] ss:$16 sps:$4 sm:$0xff]  }
 0x472   :  { %4547 = vmatprep.subr.bf16.mxu0 %v8654_v57  ;;  %v8609_v57 = vld [vmem:[%s11845_s13 + $0x28c] ss:$16 sps:$4 sm:$0xff]  }
 0x475   :  { %4548 = vmatpush1.bf16.msra.mxu0 %v8652_v59  ;;  %v8612_v59 = vld [vmem:[%s11845_s13 + $0x2ac] ss:$16 sps:$4 sm:$0xff]  }
 0x476   :  { %4549 = vmatprep.subr.bf16.mxu0 %v8660_v1  ;;  %v8613_v1 = vld [vmem:[%s11845_s13 + $0x2c8] ss:$16 sps:$4 sm:$0xff]  }
 0x479   :  { %4550 = vmatpush1.bf16.msra.mxu0 %v8658_v5  ;;  %v8684_v5 = vld [vmem:[%s11847_s15 + $0x144] ss:$16 sps:$4 sm:$0xff]  }
 0x47a   :  { %4551 = vmatprep.subr.bf16.mxu0 %v8666_v8  ;;  %v8621_v8 = vld [vmem:[%s11845_s13 + $0x30c] ss:$16 sps:$4 sm:$0xff]  }
 0x47d   :  { %4552 = vmatpush1.bf16.msra.mxu0 %v8664_v13  ;;  %v8688_v13 = vld [vmem:[%s11847_s15 + $0x160] ss:$16 sps:$4 sm:$0xff]  }
 0x4cf   :  { %v2929_v58 = vpop.f32.mrb[12].mxu0 }
 0x4d0   :  { %v2930_v60 = vadd.f32 %v2929_v58, %v2753_v55  ;;  %v2931_v62 = vpop.f32.mrb[13].mxu0  ;;  %v8603_v55 = vld [vmem:[%s11845_s13 + $0x24c] ss:$16 sps:$4 sm:$0xff]   ;;  %v8607_v58 = vld [vmem:[%s11845_s13 + $0x288] ss:$16 sps:$4 sm:$0xff]  }
 0x4d1   :  { %v2932_v63 = vadd.f32 %v2931_v62, %v2757_v56  ;;  %v2933_v0 = vpop.f32.mrb[14].mxu0  ;;  %v8601_v56 = vld [vmem:[%s11845_s13 + $0x248] ss:$16 sps:$4 sm:$0xff]   ;;  %v8615_v62 = vld [vmem:[%s11845_s13 + $0x2cc] ss:$16 sps:$4 sm:$0xff]  }
 0x4d2   :  { %v2936_v2 = vmax.f32 %v2930_v60, 0.0  ;;  %v2934_v3 = vpop.f32.mrb[15].mxu0  ;;  %v8610_v60 = vld [vmem:[%s11845_s13 + $0x2a8] ss:$16 sps:$4 sm:$0xff]   ;;  %v8670_v0 = vld [vmem:[%s11847_s15 + $0x100] ss:$16 sps:$4 sm:$0xff]  }
 0x4d3   :  { %v2937_v4 = vmax.f32 %v2932_v63, 0.0  ;;  %v8672_v63 = vld [vmem:[%s11847_s15 + $0x104] ss:$16 sps:$4 sm:$0xff]   ;;  %v8676_v3 = vld [vmem:[%s11847_s15 + $0x120] ss:$16 sps:$4 sm:$0xff]  }
 0x4d4   :  { %v2938_v9 = vpack.c.bf16 %v2936_v2, %v2936_v2  ;;  %4553 = vmatprep.subr.bf16.mxu0 %v8672_v63  ;;  %v8618_v2 = vld [vmem:[%s11845_s13 + $0x2ec] ss:$16 sps:$4 sm:$0xff]   ;;  %v8667_v63 = vld [vmem:[%s11847_s15 + $0xe8] ss:$16 sps:$4 sm:$0xff]  }
 0x4d5   :  { %v2939_v6 = vpack.c.bf16 %v2937_v4, %v2937_v4  ;;  %4554 = vmatpush1.bf16.msra.mxu0 %v8670_v0  ;;  %v8678_v4 = vld [vmem:[%s11847_s15 + $0x124] ss:$16 sps:$4 sm:$0xff]   ;;  %v8739_v0 = vld [vmem:[%s11847_s15 + $0x260] ss:$16 sps:$4 sm:$0xff]  }
 0x4d6   :  { %4555 = vmatprep.subr.bf16.mxu0 %v8678_v4  ;;  %v8745_v4 = vld [vmem:[%s11847_s15 + $0x280] ss:$16 sps:$4 sm:$0xff]  }
 0x4d7   :  { %7322 = vmatprep.mubr.msk.bf16.mxu1 %vm2885_vm8, %v2939_v6  ;;  %v8616_v6 = vld [vmem:[%s11845_s13 + $0x2e8] ss:$16 sps:$4 sm:$0xff]  }
 0x4d8   :  { %3086 = vmatmul.mubr.bf16.vlgmr.msra.gmra.mrb[32].mxu1 %v2938_v9  ;;  %v8690_v9 = vld [vmem:[%s11847_s15 + $0x164] ss:$16 sps:$4 sm:$0xff]  }
 0x4d9   :  { %3823 = vmatpush1.bf16.msra.mxu1 %v8532_v7  ;;  %3854 = vmatprep.mubr.bf16.mxu1 %v10399_v42  ;;  %v8550_v42 = vld [vmem:[%s11845_s13 + $0x68] ss:$16 sps:$4 sm:$0xff]   ;;  %v8682_v7 = vld [vmem:[%s11847_s15 + $0x140] ss:$16 sps:$4 sm:$0xff]  }
 0x4da   :  { %3824 = vmatprep.subr.bf16.mxu1 %v8540_v11  ;;  %4556 = vmatpush1.bf16.msra.mxu0 %v8676_v3  ;;  %v8619_v11 = vld [vmem:[%s11845_s13 + $0x308] ss:$16 sps:$4 sm:$0xff]  }
 0x4db   :  { %4557 = vmatprep.subr.bf16.mxu0 %v8684_v5  ;;  %v8673_v3 = vld [vmem:[%s11847_s15 + $0x108] ss:$16 sps:$4 sm:$0xff]   ;;  %v8681_v5 = vld [vmem:[%s11847_s15 + $0x12c] ss:$16 sps:$4 sm:$0xff]  }
 0x4dd   :  { %3825 = vmatpush1.bf16.msra.mxu1 %v8538_v16  ;;  %v8627_v16 = vld [vmem:[%s11847_s15 + $0xc] ss:$16 sps:$4 sm:$0xff]  }
 0x4de   :  { %3826 = vmatprep.subr.bf16.mxu1 %v8546_v17  ;;  %4558 = vmatpush1.bf16.msra.mxu0 %v8682_v7  ;;  %v8696_v17 = vld [vmem:[%s11847_s15 + $0x184] ss:$16 sps:$4 sm:$0xff]   ;;  %v8679_v7 = vld [vmem:[%s11847_s15 + $0x128] ss:$16 sps:$4 sm:$0xff]  }
 0x4df   :  { %4559 = vmatprep.subr.bf16.mxu0 %v8690_v9  ;;  %v8687_v9 = vld [vmem:[%s11847_s15 + $0x14c] ss:$16 sps:$4 sm:$0xff]  }
 0x4e1   :  { %3827 = vmatpush1.bf16.msra.mxu1 %v8544_v18  ;;  %v8625_v18 = vld [vmem:[%s11847_s15 + $0x8] ss:$16 sps:$4 sm:$0xff]  }
 0x4e2   :  { %3828 = vmatprep.subr.bf16.mxu1 %v8552_v20  ;;  %4560 = vmatpush1.bf16.msra.mxu0 %v8688_v13  ;;  %v8694_v20 = vld [vmem:[%s11847_s15 + $0x180] ss:$16 sps:$4 sm:$0xff]   ;;  %v8685_v13 = vld [vmem:[%s11847_s15 + $0x148] ss:$16 sps:$4 sm:$0xff]  }
 0x4e3   :  { %4561 = vmatprep.subr.bf16.mxu0 %v8696_v17  ;;  %v8693_v17 = vld [vmem:[%s11847_s15 + $0x16c] ss:$16 sps:$4 sm:$0xff]  }
 0x4e5   :  { %3829 = vmatpush1.bf16.msra.mxu1 %v8550_v42  ;;  %v8633_v42 = vld [vmem:[%s11847_s15 + $0x2c] ss:$16 sps:$4 sm:$0xff]  }
 0x4e6   :  { %3830 = vmatprep.subr.bf16.mxu1 %v8558_v21  ;;  %v8702_v21 = vld [vmem:[%s11847_s15 + $0x1a4] ss:$16 sps:$4 sm:$0xff]   ;;  %4562 = vmatpush1.bf16.msra.mxu0 %v8694_v20  ;;  %v8699_v20 = vld [vmem:[%s11847_s15 + $0x18c] ss:$16 sps:$4 sm:$0xff]  }
 0x4e7   :  { %4563 = vmatprep.subr.bf16.mxu0 %v8702_v21  ;;  %v8705_v21 = vld [vmem:[%s11847_s15 + $0x1ac] ss:$16 sps:$4 sm:$0xff]  }
 0x4e9   :  { %3831 = vmatpush1.bf16.msra.mxu1 %v8556_v10  ;;  %v10821_v10 = vld [vmem:[%s11846_s14] sm:$0xf] }
 0x4ea   :  { %3832 = vmatprep.subr.bf16.mxu1 %v8564_v23  ;;  %v8631_v23 = vld [vmem:[%s11847_s15 + $0x28] ss:$16 sps:$4 sm:$0xff]  }
 0x4ed   :  { %3833 = vmatpush1.bf16.msra.mxu1 %v8562_v24  ;;  %v8700_v24 = vld [vmem:[%s11847_s15 + $0x1a0] ss:$16 sps:$4 sm:$0xff]  }
 0x4ee   :  { %3834 = vmatprep.subr.bf16.mxu1 %v8567_v25  ;;  %v8708_v25 = vld [vmem:[%s11847_s15 + $0x1c4] ss:$16 sps:$4 sm:$0xff]   ;;  %4564 = vmatpush1.bf16.msra.mxu0 %v8700_v24  ;;  %v8711_v24 = vld [vmem:[%s11847_s15 + $0x1cc] ss:$16 sps:$4 sm:$0xff]  }
 0x4ef   :  { %4565 = vmatprep.subr.bf16.mxu0 %v8708_v25  ;;  %v8717_v25 = vld [vmem:[%s11847_s15 + $0x1ec] ss:$16 sps:$4 sm:$0xff]  }
 0x4f1   :  { %3835 = vmatpush1.bf16.msra.mxu1 %v8565_v26  ;;  %v3201_v26 = vrot.slane %v10821_v10, %v9989_v14 }
 0x4f2   :  { %3836 = vmatprep.subr.bf16.mxu1 %v8570_v27  ;;  %v3205_v27 = vrot.slane %v10821_v10, %v9992_v15 }
 0x4f5   :  { %3837 = vmatpush1.bf16.msra.mxu1 %v8568_v28  ;;  %v8637_v28 = vld [vmem:[%s11847_s15 + $0x48] ss:$16 sps:$4 sm:$0xff]  }
 0x4f6   :  { %3838 = vmatprep.subr.bf16.mxu1 %v8573_v29  ;;  %v8706_v29 = vld [vmem:[%s11847_s15 + $0x1c0] ss:$16 sps:$4 sm:$0xff]  }
 0x4f7   :  { %4566 = vmatpush1.bf16.msra.mxu0 %v8706_v29  ;;  %v8726_v29 = vld [vmem:[%s11847_s15 + $0x22c] ss:$16 sps:$4 sm:$0xff]  }
 0x4f9   :  { %3839 = vmatpush1.bf16.msra.mxu1 %v8571_v30  ;;  %v8645_v30 = vld [vmem:[%s11847_s15 + $0x6c] ss:$16 sps:$4 sm:$0xff]  }
 0x4fa   :  { %3840 = vmatprep.subr.bf16.mxu1 %v8576_v61 }
 0x4fd   :  { %3841 = vmatpush1.bf16.msra.mxu1 %v8574_v32  ;;  %v8714_v32 = vld [vmem:[%s11847_s15 + $0x1e4] ss:$16 sps:$4 sm:$0xff]  }
 0x4fe   :  { %3842 = vmatprep.subr.bf16.mxu1 %v8579_v33  ;;  %4567 = vmatprep.subr.bf16.mxu0 %v8714_v32  ;;  %v8730_v32 = vld [vmem:[%s11847_s15 + $0x248] ss:$16 sps:$4 sm:$0xff]  }
 0x501   :  { %3843 = vmatpush1.bf16.msra.mxu1 %v8577_v36 }
 0x502   :  { %3844 = vmatprep.subr.bf16.mxu1 %v8582_v37 }
 0x505   :  { %3845 = vmatpush1.bf16.msra.mxu1 %v8580_v38 }
 0x506   :  { %3846 = vmatprep.subr.bf16.mxu1 %v8585_v40  ;;  %v8643_v40 = vld [vmem:[%s11847_s15 + $0x68] ss:$16 sps:$4 sm:$0xff]  }
 0x509   :  { %3847 = vmatpush1.bf16.msra.mxu1 %v8583_v44 }
 0x50a   :  { %3848 = vmatprep.subr.bf16.mxu1 %v8588_v45 }
 0x50d   :  { %3849 = vmatpush1.bf16.msra.mxu1 %v8586_v47  ;;  %v8712_v47 = vld [vmem:[%s11847_s15 + $0x1e0] ss:$16 sps:$4 sm:$0xff]  }
 0x50e   :  { %3850 = vmatprep.subr.bf16.mxu1 %v8591_v34  ;;  %v8651_v34 = vld [vmem:[%s11847_s15 + $0x8c] ss:$16 sps:$4 sm:$0xff]   ;;  %4568 = vmatpush1.bf16.msra.mxu0 %v8712_v47  ;;  %v8765_v47 = vld [vmem:[%s11847_s15 + $0x2e4] ss:$16 sps:$4 sm:$0xff]  }
 0x511   :  { %3851 = vmatpush1.bf16.msra.mxu1 %v8589_v48 }
 0x512   :  { %3852 = vmatprep.subr.bf16.mxu1 %v8594_v50  ;;  %v8723_v50 = vld [vmem:[%s11847_s15 + $0x204] ss:$16 sps:$4 sm:$0xff]  }
 0x513   :  { %4578 = vmatprep.subr.bf16.mxu0 %v8723_v50  ;;  %v8762_v50 = vld [vmem:[%s11847_s15 + $0x2ec] ss:$16 sps:$4 sm:$0xff]  }
 0x515   :  { %3853 = vmatpush1.bf16.msra.mxu1 %v8592_v51 }
 0x516   :  { %3863 = vmatprep.subr.bf16.mxu1 %v8597_v52 }
 0x518   :  { %3855 = vmatmul.mubr.bf16.vlgmr.msra.gmra.mrb[36].mxu1 %v10495_v12  ;;  %v8606_v12 = vld [vmem:[%s11845_s13 + $0x26c] ss:$16 sps:$4 sm:$0xff]  }
 0x519   :  { %3864 = vmatpush1.bf16.msra.mxu1 %v8595_v53  ;;  %7424 = vmatprep.mubr.msk.bf16.mxu1 %vm3736_vm9, %v10560_v41  ;;  %v8604_v41 = vld [vmem:[%s11845_s13 + $0x268] ss:$16 sps:$4 sm:$0xff]  }
 0x51a   :  { %3865 = vmatprep.subr.bf16.mxu1 %v8600_v46  ;;  %v8649_v53 = vld [vmem:[%s11847_s15 + $0x88] ss:$16 sps:$4 sm:$0xff]   ;;  %v8721_v46 = vld [vmem:[%s11847_s15 + $0x200] ss:$16 sps:$4 sm:$0xff]  }
 0x51d   :  { %3866 = vmatpush1.bf16.msra.mxu1 %v8598_v54  ;;  %v8657_v54 = vld [vmem:[%s11847_s15 + $0xac] ss:$16 sps:$4 sm:$0xff]  }
 0x51e   :  { %3867 = vmatprep.subr.bf16.mxu1 %v8603_v55  ;;  %v8729_v55 = vld [vmem:[%s11847_s15 + $0x224] ss:$16 sps:$4 sm:$0xff]  }
 0x521   :  { %3868 = vmatpush1.bf16.msra.mxu1 %v8601_v56  ;;  %v8655_v56 = vld [vmem:[%s11847_s15 + $0xa8] ss:$16 sps:$4 sm:$0xff]  }
 0x522   :  { %3869 = vmatprep.subr.bf16.mxu1 %v8606_v12  ;;  %v8727_v12 = vld [vmem:[%s11847_s15 + $0x220] ss:$16 sps:$4 sm:$0xff]  }
 0x525   :  { %3870 = vmatpush1.bf16.msra.mxu1 %v8604_v41  ;;  %v8663_v41 = vld [vmem:[%s11847_s15 + $0xcc] ss:$16 sps:$4 sm:$0xff]  }
 0x526   :  { %3871 = vmatprep.subr.bf16.mxu1 %v8609_v57  ;;  %v8735_v57 = vld [vmem:[%s11847_s15 + $0x244] ss:$16 sps:$4 sm:$0xff]  }
 0x529   :  { %3872 = vmatpush1.bf16.msra.mxu1 %v8607_v58  ;;  %v8661_v58 = vld [vmem:[%s11847_s15 + $0xc8] ss:$16 sps:$4 sm:$0xff]  }
 0x52a   :  { %3873 = vmatprep.subr.bf16.mxu1 %v8612_v59  ;;  %v8733_v59 = vld [vmem:[%s11847_s15 + $0x240] ss:$16 sps:$4 sm:$0xff]  }
 0x52d   :  { %3874 = vmatpush1.bf16.msra.mxu1 %v8610_v60  ;;  %v8669_v60 = vld [vmem:[%s11847_s15 + $0xec] ss:$16 sps:$4 sm:$0xff]  }
 0x52e   :  { %3875 = vmatprep.subr.bf16.mxu1 %v8615_v62  ;;  %v8741_v62 = vld [vmem:[%s11847_s15 + $0x264] ss:$16 sps:$4 sm:$0xff]  }
 0x531   :  { %3876 = vmatpush1.bf16.msra.mxu1 %v8613_v1  ;;  %v8675_v1 = vld [vmem:[%s11847_s15 + $0x10c] ss:$16 sps:$4 sm:$0xff]  }
 0x532   :  { %3877 = vmatprep.subr.bf16.mxu1 %v8618_v2  ;;  %v8747_v2 = vld [vmem:[%s11847_s15 + $0x284] ss:$16 sps:$4 sm:$0xff]  }
 0x533   :  { %v3815_v61 = vpop.f32.mrb[16].mxu0 }
 0x534   :  { %v7986_v33 = vadd.f32 %v3815_v61, %v3201_v26  ;;  %v3817_v36 = vpop.f32.mrb[17].mxu0  ;;  %v8715_v26 = vld [vmem:[%s11847_s15 + $0x1e8] ss:$16 sps:$4 sm:$0xff]   ;;  %v8732_v61 = vld [vmem:[%s11847_s15 + $0x24c] ss:$16 sps:$4 sm:$0xff]  }
 0x535   :  { %3878 = vmatpush1.bf16.msra.mxu1 %v8616_v6  ;;  %v7987_v37 = vadd.f32 %v3817_v36, %v3205_v27  ;;  %v3819_v38 = vpop.f32.mrb[18].mxu0  ;;  %v8753_v6 = vld [vmem:[%s11847_s15 + $0x2a4] ss:$16 sps:$4 sm:$0xff]   ;;  %v8720_v27 = vld [vmem:[%s11847_s15 + $0x20c] ss:$16 sps:$4 sm:$0xff]  }
 0x536   :  { %3879 = vmatprep.subr.bf16.mxu1 %v8621_v8  ;;  %v3904_v44 = vmax.f32 %v7986_v33, 0.0  ;;  %v3820_v45 = vpop.f32.mrb[19].mxu0  ;;  %v8751_v8 = vld [vmem:[%s11847_s15 + $0x2a0] ss:$16 sps:$4 sm:$0xff]   ;;  %v8738_v33 = vld [vmem:[%s11847_s15 + $0x26c] ss:$16 sps:$4 sm:$0xff]  }
 0x537   :  { %v3905_v48 = vmax.f32 %v7987_v37, 0.0  ;;  %v8736_v36 = vld [vmem:[%s11847_s15 + $0x268] ss:$16 sps:$4 sm:$0xff]   ;;  %v8744_v37 = vld [vmem:[%s11847_s15 + $0x28c] ss:$16 sps:$4 sm:$0xff]  }
 0x538   :  { %v10863_v51 = vpack.c.bf16 %v3904_v44, %v3904_v44  ;;  %v8742_v38 = vld [vmem:[%s11847_s15 + $0x288] ss:$16 sps:$4 sm:$0xff]   ;;  %v8756_v45 = vld [vmem:[%s11847_s15 + $0x2cc] ss:$16 sps:$4 sm:$0xff]  }
 0x539   :  { %3880 = vmatpush1.bf16.msra.mxu1 %v8619_v11  ;;  %v3909_v52 = vpack.c.bf16 %v3905_v48, %v3905_v48  ;;  %v8759_v11 = vld [vmem:[%s11847_s15 + $0x2c4] ss:$16 sps:$4 sm:$0xff]   ;;  %v8748_v44 = vld [vmem:[%s11847_s15 + $0x2a8] ss:$16 sps:$4 sm:$0xff]  }
 0x53a   :  { %4619 = vmatprep.subr.bf16.mxu1 %v8627_v16  ;;  %v8757_v16 = vld [vmem:[%s11847_s15 + $0x2c0] ss:$16 sps:$4 sm:$0xff]   ;;  %v8754_v48 = vld [vmem:[%s11847_s15 + $0x2c8] ss:$16 sps:$4 sm:$0xff]  }
 0x53b   :  { %4569 = vmatprep.mubr.bf16.mxu0 %v3909_v52 }
 0x53c   :  { %3896 = vmatmul.mubr.bf16.vlgmr.msra.gmra.mrb[36].mxu1 %v10565_v43  ;;  %v8639_v43 = vld [vmem:[%s11847_s15 + $0x4c] ss:$16 sps:$4 sm:$0xff]   ;;  %4570 = vmatmul.mubr.bf16.vlgmr.msra.gmra.mrb[20].mxu0 %v10863_v51 }
 0x53d   :  { %4620 = vmatpush1.bf16.msra.mxu1 %v8625_v18  ;;  %4651 = vmatprep.mubr.bf16.mxu1 %v3909_v52  ;;  %v8691_v18 = vld [vmem:[%s11847_s15 + $0x168] ss:$16 sps:$4 sm:$0xff]   ;;  %v8769_v52 = vld [vmem:[%s11847_s15 + $0x300] ss:$16 sps:$4 sm:$0xff]  }
 0x53e   :  { %4621 = vmatprep.subr.bf16.mxu1 %v8633_v42  ;;  %4579 = vmatpush1.bf16.msra.mxu0 %v8721_v46  ;;  %v8697_v42 = vld [vmem:[%s11847_s15 + $0x188] ss:$16 sps:$4 sm:$0xff]   ;;  %v8768_v46 = vld [vmem:[%s11847_s15 + $0x30c] ss:$16 sps:$4 sm:$0xff]  }
 0x53f   :  { %4580 = vmatprep.subr.bf16.mxu0 %v8729_v55  ;;  %v8774_v55 = vld [vmem:[%s11852_s20 + $0x4] ss:$16 sps:$4 sm:$0xff]  }
 0x541   :  { %4622 = vmatpush1.bf16.msra.mxu1 %v8631_v23  ;;  %v8703_v23 = vld [vmem:[%s11847_s15 + $0x1a8] ss:$16 sps:$4 sm:$0xff]  }
 0x542   :  { %4623 = vmatprep.subr.bf16.mxu1 %v8639_v43  ;;  %4581 = vmatpush1.bf16.msra.mxu0 %v8727_v12  ;;  %v8709_v43 = vld [vmem:[%s11847_s15 + $0x1c8] ss:$16 sps:$4 sm:$0xff]  }
 0x543   :  { %4582 = vmatprep.subr.bf16.mxu0 %v8735_v57 }
 0x545   :  { %4624 = vmatpush1.bf16.msra.mxu1 %v8637_v28  ;;  %v8718_v28 = vld [vmem:[%s11847_s15 + $0x208] ss:$16 sps:$4 sm:$0xff]  }
 0x546   :  { %4625 = vmatprep.subr.bf16.mxu1 %v8645_v30  ;;  %4583 = vmatpush1.bf16.msra.mxu0 %v8733_v59  ;;  %v8724_v30 = vld [vmem:[%s11847_s15 + $0x228] ss:$16 sps:$4 sm:$0xff]   ;;  %v11048_v59 = vsub.s32 3, %v9924_v35  ;;  %v8772_v35 = vld [vmem:[%s11852_s20] ss:$16 sps:$4 sm:$0xff]  }
 0x547   :  { %4584 = vmatprep.subr.bf16.mxu0 %v8741_v62 }
 0x548   :  { %v3213_v62 = vrot.slane %v10821_v10, %v11048_v59 }
 0x549   :  { %4626 = vmatpush1.bf16.msra.mxu1 %v8643_v40  ;;  %v8750_v40 = vld [vmem:[%s11847_s15 + $0x2ac] ss:$16 sps:$4 sm:$0xff]  }
 0x54a   :  { %4627 = vmatprep.subr.bf16.mxu1 %v8651_v34  ;;  %4585 = vmatpush1.bf16.msra.mxu0 %v8739_v0  ;;  %v8763_v34 = vld [vmem:[%s11847_s15 + $0x2e0] ss:$16 sps:$4 sm:$0xff]  }
 0x54b   :  { %4586 = vmatprep.subr.bf16.mxu0 %v8747_v2 }
 0x54d   :  { %4628 = vmatpush1.bf16.msra.mxu1 %v8649_v53  ;;  %v8760_v53 = vld [vmem:[%s11847_s15 + $0x2e8] ss:$16 sps:$4 sm:$0xff]  }
 0x54e   :  { %4629 = vmatprep.subr.bf16.mxu1 %v8657_v54  ;;  %4587 = vmatpush1.bf16.msra.mxu0 %v8745_v4  ;;  %v8766_v54 = vld [vmem:[%s11847_s15 + $0x308] ss:$16 sps:$4 sm:$0xff]  }
 0x54f   :  { %4588 = vmatprep.subr.bf16.mxu0 %v8753_v6 }
 0x551   :  { %4630 = vmatpush1.bf16.msra.mxu1 %v8655_v56 }
 0x552   :  { %4631 = vmatprep.subr.bf16.mxu1 %v8663_v41  ;;  %4589 = vmatpush1.bf16.msra.mxu0 %v8751_v8 }
 0x553   :  { %4590 = vmatprep.subr.bf16.mxu0 %v8759_v11  ;;  %v5019_v11 = vld [vmem:[%s11852_s20 + $0x40] sm:$0x11] }
 0x555   :  { %4632 = vmatpush1.bf16.msra.mxu1 %v8661_v58  ;;  %v8796_v58 = vld [vmem:[%s11849_s17 + $0x40] sm:$0xff]  }
 0x556   :  { %4633 = vmatprep.subr.bf16.mxu1 %v8669_v60  ;;  %4591 = vmatpush1.bf16.msra.mxu0 %v8757_v16  ;;  %v3209_v60 = vrot.slane %v10821_v10, %v9938_v39  ;;  %v8797_v10 = vld [vmem:[%s11849_s17] sm:$0xff]  }
 0x557   :  { %4592 = vmatprep.subr.bf16.mxu0 %v8765_v47  ;;  %v8775_v16 = vld [vmem:[%s11852_s20 + $0x20] ss:$16 sps:$4 sm:$0xff]   ;;  %v8807_v47 = vld [vmem:[%s11849_s17 + $0x28] sm:$0xff]  }
 0x559   :  { %4634 = vmatpush1.bf16.msra.mxu1 %v8667_v63 }
 0x55a   :  { %4635 = vmatprep.subr.bf16.mxu1 %v8675_v1  ;;  %4593 = vmatpush1.bf16.msra.mxu0 %v8763_v34  ;;  %v8788_v34 = vld [vmem:[%s11851_s19] ss:$16 sps:$4 sm:$0xff]  }
 0x55d   :  { %4636 = vmatpush1.bf16.msra.mxu1 %v8673_v3 }
 0x55e   :  { %4637 = vmatprep.subr.bf16.mxu1 %v8681_v5 }
 0x561   :  { %4638 = vmatpush1.bf16.msra.mxu1 %v8679_v7 }
 0x562   :  { %4639 = vmatprep.subr.bf16.mxu1 %v8687_v9  ;;  %v8777_v9 = vld [vmem:[%s11852_s20 + $0x24] ss:$16 sps:$4 sm:$0xff]  }
 0x565   :  { %4640 = vmatpush1.bf16.msra.mxu1 %v8685_v13  ;;  %v8798_v13 = vld [vmem:[%s11849_s17 + $0x48] sm:$0xff]  }
 0x566   :  { %4641 = vmatprep.subr.bf16.mxu1 %v8693_v17  ;;  %v7563_v17 = vcombine.high %v5019_v11, %v5019_v11 }
 0x569   :  { %4642 = vmatpush1.bf16.msra.mxu1 %v8691_v18  ;;  %v7562_v18 = vcombine.low %v5019_v11, %v5019_v11  ;;  %v8812_v11 = vld [vmem:[%s11849_s17 + $0x80] sm:$0xff]  }
 0x56a   :  { %4643 = vmatprep.subr.bf16.mxu1 %v8699_v20  ;;  %v8799_v20 = vld [vmem:[%s11849_s17 + $0x8] sm:$0xff]  }
 0x56d   :  { %4644 = vmatpush1.bf16.msra.mxu1 %v8697_v42  ;;  %v7308_v42 = vld [vmem:[%s11893_s29] ss:$0 sm:$0xff] }
 0x56e   :  { %4645 = vmatprep.subr.bf16.mxu1 %v8705_v21  ;;  %v8800_v21 = vld [vmem:[%s11849_s17 + $0x50] sm:$0xff]  }
 0x571   :  { %4646 = vmatpush1.bf16.msra.mxu1 %v8703_v23 }
 0x572   :  { %4647 = vmatprep.subr.bf16.mxu1 %v8711_v24  ;;  %v5077_v24 = vsel %vm5075_vm10, %v7562_v18, 0 }
 0x575   :  { %4648 = vmatpush1.bf16.msra.mxu1 %v8709_v43  ;;  %v8782_v43 = vld [vmem:[%s11852_s20 + $0xc] ss:$16 sps:$4 sm:$0xff]  }
 0x576   :  { %4649 = vmatprep.subr.bf16.mxu1 %v8717_v25  ;;  %v8801_v25 = vld [vmem:[%s11849_s17 + $0x10] sm:$0xff]  }
 0x579   :  { %4650 = vmatpush1.bf16.msra.mxu1 %v8715_v26  ;;  %v8802_v26 = vld [vmem:[%s11849_s17 + $0x58] sm:$0xff]  }
 0x57a   :  { %4660 = vmatprep.subr.bf16.mxu1 %v8720_v27  ;;  %v8780_v27 = vld [vmem:[%s11852_s20 + $0x8] ss:$16 sps:$4 sm:$0xff]  }
 0x57c   :  { %4652 = vmatmul.mubr.bf16.vlgmr.msra.gmra.mrb[40].mxu1 %v10863_v51  ;;  %v8771_v51 = vld [vmem:[%s11847_s15 + $0x304] ss:$16 sps:$4 sm:$0xff]  }
 0x57d   :  { %4661 = vmatpush1.bf16.msra.mxu1 %v8718_v28  ;;  %4594 = vmatprep.subr.bf16.mxu0 %v8771_v51  ;;  %v8791_v51 = vld [vmem:[%s11851_s19 + $0x20] ss:$16 sps:$4 sm:$0xff]  }
 0x57e   :  { %4662 = vmatprep.subr.bf16.mxu1 %v8726_v29  ;;  %4595 = vmatpush1.bf16.msra.mxu0 %v8769_v52  ;;  %v8785_v29 = vld [vmem:[%s11852_s20 + $0x2c] ss:$16 sps:$4 sm:$0xff]  }
 0x57f   :  { %7896 = vmatprep.subr.bf16.mxu0 %v8796_v58 }
 0x581   :  { %4663 = vmatpush1.bf16.msra.mxu1 %v8724_v30  ;;  %v8803_v30 = vld [vmem:[%s11849_s17 + $0x18] sm:$0xff]  }
 0x582   :  { %4664 = vmatprep.subr.bf16.mxu1 %v8732_v61  ;;  %v5020_v61 = vld [vmem:[%s11852_s20 + $0x48] sm:$0x11] }
 0x585   :  { %4665 = vmatpush1.bf16.msra.mxu1 %v8730_v32  ;;  %v8804_v32 = vld [vmem:[%s11849_s17 + $0x60] sm:$0xff]  }
 0x586   :  { %4666 = vmatprep.subr.bf16.mxu1 %v8738_v33  ;;  %v8783_v33 = vld [vmem:[%s11852_s20 + $0x28] ss:$16 sps:$4 sm:$0xff]  }
 0x589   :  { %4667 = vmatpush1.bf16.msra.mxu1 %v8736_v36  ;;  %v7565_v36 = vcombine.high %v5020_v61, %v5020_v61 }
 0x58a   :  { %4668 = vmatprep.subr.bf16.mxu1 %v8744_v37  ;;  %v7564_v37 = vcombine.low %v5020_v61, %v5020_v61 }
 0x58d   :  { %4669 = vmatpush1.bf16.msra.mxu1 %v8742_v38  ;;  %v8805_v38 = vld [vmem:[%s11849_s17 + $0x20] sm:$0xff]  }
 0x58e   :  { %4670 = vmatprep.subr.bf16.mxu1 %v8750_v40  ;;  %v8806_v40 = vld [vmem:[%s11849_s17 + $0x68] sm:$0xff]  }
 0x591   :  { %4671 = vmatpush1.bf16.msra.mxu1 %v8748_v44  ;;  %v5083_v44 = vsel %vm5075_vm10, %v7564_v37, 0 }
 0x592   :  { %4672 = vmatprep.subr.bf16.mxu1 %v8756_v45  ;;  %v8790_v45 = vld [vmem:[%s11851_s19 + $0x4] ss:$16 sps:$4 sm:$0xff]  }
 0x595   :  { %4673 = vmatpush1.bf16.msra.mxu1 %v8754_v48  ;;  %v8793_v48 = vld [vmem:[%s11851_s19 + $0x24] ss:$16 sps:$4 sm:$0xff]  }
 0x596   :  { %4674 = vmatprep.subr.bf16.mxu1 %v8762_v50  ;;  %v5008_v50 = vld [vmem:[%s11851_s19 + $0x40] sm:$0x11] }
 0x597   :  { %v7579_v52 = vcombine.high %v5008_v50, %v5008_v50 }
 0x599   :  { %4675 = vmatpush1.bf16.msra.mxu1 %v8760_v53  ;;  %v7578_v53 = vcombine.low %v5008_v50, %v5008_v50  ;;  %v8821_v50 = vld [vmem:[%s11851_s19 + $0x8] ss:$16 sps:$4 sm:$0xff]  }
 0x59a   :  { %4676 = vmatprep.subr.bf16.mxu1 %v8768_v46 }
 0x59b   :  { %v5224_v46 = vsel %vm5075_vm10, %v7578_v53, 0  ;;  %v5009_v53 = vld [vmem:[%s11851_s19 + $0x48] sm:$0x11] }
 0x59d   :  { %4677 = vmatpush1.bf16.msra.mxu1 %v8766_v54  ;;  %v11147_v54 = vpack.c.bf16 %v10378_v19, %v10378_v19  ;;  %v8810_v19 = vld [vmem:[%s11849_s17 + $0x78] sm:$0xff]  }
 0x59e   :  { %5088 = vmatprep.subr.bf16.mxu1 %v8774_v55  ;;  %v8808_v55 = vld [vmem:[%s11849_s17 + $0x70] sm:$0xff]  }
 0x5ab   :  { %v3087_v56 = vpop.f32.mrb[32].mxu1 }
 0x5ac   :  { %v3089_v12 = vpop.f32.mrb[33].mxu1  ;;  %v3088_v23 = vadd.f32 %v7308_v42, %v3087_v56  ;;  %v8809_v56 = vld [vmem:[%s11849_s17 + $0x30] sm:$0xff]  }
 0x5ad   :  { %v3090_v41 = vpop.f32.mrb[34].mxu1  ;;  %v8811_v12 = vld [vmem:[%s11849_s17 + $0x38] sm:$0xff]  }
 0x5ae   :  { %v3091_v57 = vpop.f32.mrb[35].mxu1  ;;  %v5010_v28 = vpack.c.bf16 %v3088_v23, %v3088_v23  ;;  %v4012_v41 = vld [vmem:[%s11848_s16] sm:$0xf] }
 0x5af   :  { %v4017_v57 = vrot.slane %v4012_v41, %v9989_v14  ;;  %v4021_v58 = vrot.slane %v4012_v41, %v9992_v15  ;;  %v4025_v61 = vrot.slane %v4012_v41, %v9938_v39 }
 0x60f   :  { %v3897_v63 = vpop.f32.mrb[36].mxu1 }
 0x610   :  { %v7988_v0 = vadd.f32 %v3897_v63, %v3209_v60  ;;  %v3899_v1 = vpop.f32.mrb[37].mxu1  ;;  %v4029_v60 = vrot.slane %v4012_v41, %v11048_v59  ;;  %v8831_v41 = vld [vmem:[%s11853_s21 + $0x4] ss:$16 sps:$4 sm:$0xff]  }
 0x611   :  { %v7989_v2 = vadd.f32 %v3899_v1, %v3213_v62  ;;  %v3901_v3 = vpop.f32.mrb[38].mxu1 }
 0x612   :  { %v3906_v4 = vmax.f32 %v7988_v0, 0.0  ;;  %v3902_v5 = vpop.f32.mrb[39].mxu1 }
 0x613   :  { %v3907_v6 = vmax.f32 %v7989_v2, 0.0 }
 0x614   :  { %v3910_v8 = vpack.c.bf16 %v3906_v4, %v3906_v4 }
 0x615   :  { %v3911_v7 = vpack.c.bf16 %v3907_v6, %v3907_v6 }
 0x617   :  { %7525 = vmatprep.mubr.msk.bf16.mxu0 %vm3736_vm9, %v3911_v7  ;;  %7526 = vmatprep.mubr.msk.bf16.mxu1 %vm3736_vm9, %v3911_v7 }
 0x618   :  { %4611 = vmatmul.mubr.bf16.vlgmr.msra.gmra.mrb[20].mxu0 %v3910_v8  ;;  %4693 = vmatmul.mubr.bf16.vlgmr.msra.gmra.mrb[40].mxu1 %v3910_v8 }
 0x619   :  { %5089 = vmatpush1.bf16.msra.mxu1 %v8772_v35  ;;  %5120 = vmatprep.mubr.bf16.mxu1 %v9103_v49 }
 0x61a   :  { %5090 = vmatprep.subr.bf16.mxu1 %v8777_v9  ;;  %7897 = vmatpush3.bf16.msra.mxu0 %v8797_v10 }
 0x61b   :  { %7898 = vmatprep.subr.bf16.mxu0 %v8798_v13 }
 0x61d   :  { %5091 = vmatpush1.bf16.msra.mxu1 %v8775_v16 }
 0x61e   :  { %7566 = vmatprep.subr.msk.bf16.mxu1 %vm5075_vm10, %v7563_v17  ;;  %7899 = vmatpush3.bf16.msra.mxu0 %v8799_v20  ;;  %v8813_v17 = vld [vmem:[%s11849_s17 + $0x88] sm:$0xff]  }
 0x61f   :  { %7900 = vmatprep.subr.bf16.mxu0 %v8800_v21  ;;  %v8814_v21 = vld [vmem:[%s11849_s17 + $0x90] sm:$0xff]  }
 0x621   :  { %5093 = vmatpush1.bf16.msra.mxu1 %v5077_v24  ;;  %v8815_v24 = vld [vmem:[%s11849_s17 + $0x98] sm:$0xff]  }
 0x622   :  { %5129 = vmatprep.subr.bf16.mxu1 %v8782_v43  ;;  %7901 = vmatpush3.bf16.msra.mxu0 %v8801_v25  ;;  %v8816_v43 = vld [vmem:[%s11849_s17 + $0xa0] sm:$0xff]  }
 0x623   :  { %7902 = vmatprep.subr.bf16.mxu0 %v8802_v26 }
 0x624   :  { %7567 = vmatmul.mubr.msk.bf16.vlgmr.msra.gmra.mrb[44].mxu1 %vm5071_vm11, %v5010_v28 }
 0x625   :  { %5130 = vmatpush1.bf16.msra.mxu1 %v8780_v27  ;;  %5161 = vmatprep.mubr.bf16.mxu1 %v9103_v49 }
 0x626   :  { %5131 = vmatprep.subr.bf16.mxu1 %v8785_v29  ;;  %7903 = vmatpush3.bf16.msra.mxu0 %v8803_v30  ;;  %v8818_v30 = vld [vmem:[%s11849_s17 + $0xb0] sm:$0xff]  }
 0x627   :  { %7904 = vmatprep.subr.bf16.mxu0 %v8804_v32  ;;  %v8819_v32 = vld [vmem:[%s11849_s17 + $0xb8] sm:$0xff]  }
 0x629   :  { %5132 = vmatpush1.bf16.msra.mxu1 %v8783_v33 }
 0x62a   :  { %7568 = vmatprep.subr.msk.bf16.mxu1 %vm5075_vm10, %v7565_v36  ;;  %7905 = vmatpush3.bf16.msra.mxu0 %v8805_v38 }
 0x62b   :  { %7906 = vmatprep.subr.bf16.mxu0 %v8806_v40 }
 0x62d   :  { %5134 = vmatpush1.bf16.msra.mxu1 %v5083_v44 }
 0x62e   :  { %5235 = vmatprep.subr.bf16.mxu1 %v8790_v45  ;;  %7907 = vmatpush3.bf16.msra.mxu0 %v8807_v47  ;;  %v8820_v45 = vld [vmem:[%s11849_s17 + $0xc0] sm:$0xff]  }
 0x62f   :  { %7908 = vmatprep.subr.bf16.mxu0 %v8808_v55  ;;  %v7581_v55 = vcombine.high %v5009_v53, %v5009_v53 }
 0x630   :  { %7569 = vmatmul.mubr.msk.bf16.vlgmr.msra.gmra.mrb[48].mxu1 %vm5071_vm11, %v5010_v28  ;;  %v8817_v28 = vld [vmem:[%s11849_s17 + $0xa8] sm:$0xff]  }
 0x631   :  { %5236 = vmatpush1.bf16.msra.mxu1 %v8788_v34  ;;  %5267 = vmatprep.mubr.bf16.mxu1 %v9103_v49 }
 0x632   :  { %5237 = vmatprep.subr.bf16.mxu1 %v8793_v48  ;;  %7909 = vmatpush3.bf16.msra.mxu0 %v8809_v56  ;;  %v8823_v48 = vld [vmem:[%s11851_s19 + $0xc] ss:$16 sps:$4 sm:$0xff]   ;;  %v7580_v56 = vcombine.low %v5009_v53, %v5009_v53 }
 0x633   :  { %7910 = vmatprep.subr.bf16.mxu0 %v8810_v19 }
 0x634   :  { %v5230_v19 = vsel %vm5075_vm10, %v7580_v56, 0 }
 0x635   :  { %5238 = vmatpush1.bf16.msra.mxu1 %v8791_v51 }
 0x636   :  { %7582 = vmatprep.subr.msk.bf16.mxu1 %vm5075_vm10, %v7579_v52  ;;  %7911 = vmatpush3.bf16.msra.mxu0 %v8811_v12  ;;  %v8826_v52 = vld [vmem:[%s11851_s19 + $0x2c] ss:$16 sps:$4 sm:$0xff]   ;;  %v8829_v12 = vld [vmem:[%s11853_s21] ss:$16 sps:$4 sm:$0xff]  }
 0x637   :  { %4959 = vmatprep.subr.bf16.mxu0 %v9103_v49 }
 0x639   :  { %5240 = vmatpush1.bf16.msra.mxu1 %v5224_v46  ;;  %v8824_v46 = vld [vmem:[%s11851_s19 + $0x28] ss:$16 sps:$4 sm:$0xff]   ;;  %s9079_s19 = scalar_lea.vmem %s6983_s12, 128 }
 0x63a   :  { %5393 = vmatprep.subr.bf16.mxu1 %v8831_v41  ;;  %v8862_v41 = vld [vmem:[%s11856_s24 + $0xc] ss:$16 sps:$4 sm:$0xff]   ;;  %p9080_p0 = scmp.ne.s32.totalorder %s6983_s12, %s9079_s19  ;;  %p9085_p2 = scmp.lt.s32.totalorder %s9079_s19, %s9079_s19 }
 0x63c   :  { %7583 = vmatmul.mubr.msk.bf16.vlgmr.msra.gmra.mrb[52].mxu1 %vm5071_vm11, %v11147_v54  ;;  %p9086_p3 = por %p9085_p2, %p9084_p1 }
 0x63d   :  { %5425 = vmatprep.mubr.bf16.mxu1 %v9103_v49  ;;  %5394 = vmatpush1.bf16.msra.mxu1 %v8829_v12 }
 0x63e   :  { %p9087_p4 = pnand %p9086_p3, %p9080_p0 }
 0x6eb   :  { %v4612_v62 = vpop.f32.mrb[20].mxu0  ;;  %v4694_v63 = vpop.f32.mrb[40].mxu1 }
 0x6ec   :  { %v7990_v0 = vadd.f32 %v4612_v62, %v4017_v57  ;;  %v4614_v1 = vpop.f32.mrb[21].mxu0  ;;  %v4696_v2 = vpop.f32.mrb[41].mxu1  ;;  %v7992_v33 = vadd.f32 %v4694_v63, %v4025_v61  ;;  %v8832_v57 = vld [vmem:[%s11853_s21 + $0x8] ss:$16 sps:$4 sm:$0xff]   ;;  %v8835_v62 = vld [vmem:[%s11853_s21 + $0x20] ss:$16 sps:$4 sm:$0xff]  }
 0x6ed   :  { %v7991_v3 = vadd.f32 %v4614_v1, %v4021_v58  ;;  %v7993_v4 = vadd.f32 %v4696_v2, %v4029_v60  ;;  %v4616_v5 = vpop.f32.mrb[22].mxu0  ;;  %v4698_v6 = vpop.f32.mrb[42].mxu1  ;;  %v8834_v58 = vld [vmem:[%s11853_s21 + $0xc] ss:$16 sps:$4 sm:$0xff]   ;;  %v8838_v63 = vld [vmem:[%s11853_s21 + $0x28] ss:$16 sps:$4 sm:$0xff]  }
 0x6ee   :  { %v4701_v31 = vmax.f32 %v7990_v0, 0.0  ;;  %v4617_v7 = vpop.f32.mrb[23].mxu0  ;;  %v4699_v35 = vpop.f32.mrb[43].mxu1  ;;  %v4703_v47 = vmax.f32 %v7992_v33, 0.0  ;;  %v8840_v60 = vld [vmem:[%s11853_s21 + $0x2c] ss:$16 sps:$4 sm:$0xff]  }
 0x6ef   :  { %v4702_v8 = vmax.f32 %v7991_v3, 0.0  ;;  %v4704_v9 = vmax.f32 %v7993_v4, 0.0  ;;  %v5326_v0 = vld [vmem:[%s11853_s21 + $0x40] sm:$0x11]  ;;  %v5327_v1 = vld [vmem:[%s11853_s21 + $0x48] sm:$0x11] }
 0x6f0   :  { %v4705_v13 = vpack.c.bf16 %v4701_v31, %v4701_v31  ;;  %v4707_v51 = vpack.c.bf16 %v4703_v47, %v4703_v47  ;;  %v7595_v2 = vcombine.high %v5326_v0, %v5326_v0  ;;  %v7594_v3 = vcombine.low %v5326_v0, %v5326_v0  ;;  %v8847_v7 = vld [vmem:[%s11854_s22 + $0x4] ss:$16 sps:$4 sm:$0xff]   ;;  %v8857_v61 = vld [vmem:[%s11856_s24] ss:$16 sps:$4 sm:$0xff]   ;;  %v8853_v33 = vld [vmem:[%s11854_s22 + $0xc] ss:$16 sps:$4 sm:$0xff]  }
 0x6f1   :  { %v4706_v10 = vpack.c.bf16 %v4702_v8, %v4702_v8  ;;  %v4708_v16 = vpack.c.bf16 %v4704_v9, %v4704_v9  ;;  %v7597_v4 = vcombine.high %v5327_v1, %v5327_v1  ;;  %v7596_v5 = vcombine.low %v5327_v1, %v5327_v1  ;;  %v8859_v35 = vld [vmem:[%s11856_s24 + $0x4] ss:$16 sps:$4 sm:$0xff]   ;;  %v8851_v47 = vld [vmem:[%s11854_s22 + $0x8] ss:$16 sps:$4 sm:$0xff]  }
 0x6f2   :  { %v5382_v6 = vsel %vm5075_vm10, %v7594_v3, 0  ;;  %v8895_v0 = vld [vmem:[%s11856_s24 + $0xc4] ss:$16 sps:$4 sm:$0xff]   ;;  %v8872_v1 = vld [vmem:[%s11856_s24 + $0x48] ss:$16 sps:$4 sm:$0xff]  }
 0x6f3   :  { %4951 = vmatprep.mubr.bf16.mxu0 %v4706_v10  ;;  %v5388_v31 = vsel %vm5075_vm10, %v7596_v5, 0  ;;  %v8893_v3 = vld [vmem:[%s11856_s24 + $0xc0] ss:$16 sps:$4 sm:$0xff]   ;;  %v8878_v5 = vld [vmem:[%s11856_s24 + $0x68] ss:$16 sps:$4 sm:$0xff]  }
 0x6f4   :  { %4952 = vmatmul.mubr.bf16.vlgmr.msra.gmra.mrb[24].mxu0 %v4705_v13 }
 0x6f5   :  { %4960 = vmatpush1.bf16.msra.mxu0 %v8812_v11  ;;  %7553 = vmatprep.mubr.msk.bf16.mxu0 %vm3736_vm9, %v4708_v16  ;;  %v7527_v16 = vld [vmem:[%s11850_s18] ss:$0 sm:$0xff] }
 0x6f6   :  { %4961 = vmatprep.subr.bf16.mxu0 %v9103_v49 }
 0x6f7   :  { %v5122_v18 = vpop.f32.mrb[44].mxu1 }
 0x6f8   :  { %v5124_v20 = vpop.f32.mrb[45].mxu1 }
 0x6f9   :  { %4962 = vmatpush1.bf16.msra.mxu0 %v8813_v17  ;;  %v5126_v42 = vpop.f32.mrb[46].mxu1 }
 0x6fa   :  { %v5127_v23 = vpop.f32.mrb[47].mxu1  ;;  %4963 = vmatprep.subr.bf16.mxu0 %v9103_v49  ;;  %v5530_v42 = vsel %vm2061_vm2, %v10148_v22, 0  ;;  %v8865_v22 = vld [vmem:[%s11856_s24 + $0x24] ss:$16 sps:$4 sm:$0xff]  }
 0x6fd   :  { %4964 = vmatpush1.bf16.msra.mxu0 %v8814_v21 }
 0x6fe   :  { %4965 = vmatprep.subr.bf16.mxu0 %v9103_v49 }
 0x701   :  { %4966 = vmatpush1.bf16.msra.mxu0 %v8815_v24 }
 0x702   :  { %4967 = vmatprep.subr.bf16.mxu0 %v9103_v49 }
 0x703   :  { %v11192_v25 = vpop.f32.mrb[48].mxu1 }
 0x704   :  { %v11194_v26 = vpop.f32.mrb[49].mxu1 }
 0x705   :  { %4968 = vmatpush1.bf16.msra.mxu0 %v8816_v43  ;;  %v5167_v27 = vpop.f32.mrb[50].mxu1  ;;  %v8845_v43 = vld [vmem:[%s11854_s22] ss:$16 sps:$4 sm:$0xff]  }
 0x706   :  { %v5168_v29 = vpop.f32.mrb[51].mxu1  ;;  %4969 = vmatprep.subr.bf16.mxu0 %v9103_v49  ;;  %v8848_v27 = vld [vmem:[%s11854_s22 + $0x20] ss:$16 sps:$4 sm:$0x3f]  }
 0x709   :  { %4970 = vmatpush1.bf16.msra.mxu0 %v8817_v28 }
 0x70a   :  { %4971 = vmatprep.subr.bf16.mxu0 %v9103_v49 }
 0x70d   :  { %4972 = vmatpush1.bf16.msra.mxu0 %v8818_v30 }
 0x70e   :  { %4973 = vmatprep.subr.bf16.mxu0 %v9103_v49 }
 0x70f   :  { %v5269_v36 = vpop.f32.mrb[52].mxu1 }
 0x710   :  { %v11209_v37 = vadd.f32 %v5269_v36, %v5122_v18  ;;  %v5271_v38 = vpop.f32.mrb[53].mxu1  ;;  %v8850_v18 = vld [vmem:[%s11854_s22 + $0x24] ss:$16 sps:$4 sm:$0x3f]  }
 0x711   :  { %v11211_v40 = vadd.f32 %v5271_v38, %v5124_v20  ;;  %4974 = vmatpush1.bf16.msra.mxu0 %v8819_v32  ;;  %v5273_v44 = vpop.f32.mrb[54].mxu1  ;;  %v5535_v30 = vand.u32 %v8850_v18, %v5530_v42  ;;  %v5532_v32 = vand.u32 %v8848_v27, %v5530_v42  ;;  %v8856_v36 = vld [vmem:[%s11854_s22 + $0x2c] ss:$16 sps:$4 sm:$0x3f]   ;;  %v8863_v38 = vld [vmem:[%s11856_s24 + $0x20] ss:$16 sps:$4 sm:$0xff]  }
 0x712   :  { %v5274_v34 = vpop.f32.mrb[55].mxu1  ;;  %4975 = vmatprep.subr.bf16.mxu0 %v9103_v49  ;;  %v8871_v44 = vld [vmem:[%s11856_s24 + $0x44] ss:$16 sps:$4 sm:$0xff]   ;;  %v8896_v18 = vld [vmem:[%s11856_s24 + $0xc8] ss:$16 sps:$4 sm:$0xff]  }
 0x713   :  { %v8854_v34 = vld [vmem:[%s11854_s22 + $0x28] ss:$16 sps:$4 sm:$0x3f]  }
 0x714   :  { %v8908_v27 = vld [vmem:[%s11856_s24 + $0x108] ss:$16 sps:$4 sm:$0xff]  }
 0x715   :  { %4976 = vmatpush1.bf16.msra.mxu0 %v8820_v45  ;;  %v5488_v45 = vpop.permute.xlu1 %5487 }
 0x716   :  { %5276 = vmatprep.subr.bf16.mxu0 %v8823_v48  ;;  %v5541_v48 = vand.u32 %v8856_v36, %v5530_v42  ;;  %v8934_v36 = vld [vmem:[%s11856_s24 + $0x18c] ss:$16 sps:$4 sm:$0xff]  }
 0x718   :  { %4992 = vmatmul.mubr.bf16.vlgmr.msra.gmra.mrb[28].mxu0 %v4707_v51 }
 0x719   :  { %5277 = vmatpush1.bf16.msra.mxu0 %v8821_v50  ;;  %5308 = vmatprep.mubr.bf16.mxu0 %v9103_v49  ;;  %v8869_v50 = vld [vmem:[%s11856_s24 + $0x40] ss:$16 sps:$4 sm:$0xff]  }
 0x71a   :  { %5278 = vmatprep.subr.bf16.mxu0 %v8826_v52  ;;  %v8877_v52 = vld [vmem:[%s11856_s24 + $0x64] ss:$16 sps:$4 sm:$0xff]  }
 0x71d   :  { %5279 = vmatpush1.bf16.msra.mxu0 %v8824_v46 }
 0x71e   :  { %7584 = vmatprep.subr.msk.bf16.mxu0 %vm5075_vm10, %v7581_v55 }
 0x721   :  { %5281 = vmatpush1.bf16.msra.mxu0 %v5230_v19  ;;  %v5538_v19 = vand.u32 %v8854_v34, %v5530_v42  ;;  %v8917_v42 = vld [vmem:[%s11856_s24 + $0x140] ss:$16 sps:$4 sm:$0xff]   ;;  %v8938_v34 = vld [vmem:[%s11856_s24 + $0x1a8] ss:$16 sps:$4 sm:$0xff]  }
 0x722   :  { %5434 = vmatprep.subr.bf16.mxu0 %v8834_v58  ;;  %v8881_v58 = vld [vmem:[%s11856_s24 + $0x80] ss:$16 sps:$4 sm:$0xff]  }
 0x724   :  { %7585 = vmatmul.mubr.msk.bf16.vlgmr.msra.gmra.mrb[32].mxu0 %vm5071_vm11, %v11147_v54  ;;  %v8837_v54 = vld [vmem:[%s11853_s21 + $0x24] ss:$16 sps:$4 sm:$0xff]  }
 0x725   :  { %5466 = vmatprep.mubr.bf16.mxu0 %v9103_v49  ;;  %5435 = vmatpush1.bf16.msra.mxu0 %v8832_v57  ;;  %v8868_v57 = vld [vmem:[%s11856_s24 + $0x2c] ss:$16 sps:$4 sm:$0xff]  }
 0x726   :  { %5395 = vmatprep.subr.bf16.mxu1 %v8837_v54  ;;  %5436 = vmatprep.subr.bf16.mxu0 %v8840_v60  ;;  %v8889_v54 = vld [vmem:[%s11856_s24 + $0xa4] ss:$16 sps:$4 sm:$0xff]   ;;  %v8866_v60 = vld [vmem:[%s11856_s24 + $0x28] ss:$16 sps:$4 sm:$0xff]  }
 0x727   :  { %5396 = vmatpush1.bf16.msra.mxu1 %v8835_v62  ;;  %v8874_v62 = vld [vmem:[%s11856_s24 + $0x4c] ss:$16 sps:$4 sm:$0xff]  }
 0x728   :  { %7598 = vmatprep.subr.msk.bf16.mxu1 %vm5075_vm10, %v7595_v2  ;;  %v8880_v2 = vld [vmem:[%s11856_s24 + $0x6c] ss:$16 sps:$4 sm:$0xff]  }
 0x729   :  { %5437 = vmatpush1.bf16.msra.mxu0 %v8838_v63  ;;  %v8887_v63 = vld [vmem:[%s11856_s24 + $0xa0] ss:$16 sps:$4 sm:$0xff]  }
 0x72a   :  { %7600 = vmatprep.subr.msk.bf16.mxu0 %vm5075_vm10, %v7597_v4  ;;  %v8901_v4 = vld [vmem:[%s11856_s24 + $0xe4] ss:$16 sps:$4 sm:$0xff]  }
 0x72b   :  { %5398 = vmatpush1.bf16.msra.mxu1 %v5382_v6  ;;  %v8886_v6 = vld [vmem:[%s11856_s24 + $0x8c] ss:$16 sps:$4 sm:$0xff]  }
 0x72c   :  { %5543 = vmatprep.subr.bf16.mxu1 %v8847_v7  ;;  %v8907_v7 = vld [vmem:[%s11856_s24 + $0x104] ss:$16 sps:$4 sm:$0xff]  }
 0x72d   :  { %5439 = vmatpush1.bf16.msra.mxu0 %v5388_v31  ;;  %v8899_v31 = vld [vmem:[%s11856_s24 + $0xe0] ss:$16 sps:$4 sm:$0xff]  }
 0x72e   :  { %6458 = vmatprep.subr.bf16.mxu0 %v8859_v35  ;;  %v8884_v35 = vld [vmem:[%s11856_s24 + $0x88] ss:$16 sps:$4 sm:$0xff]  }
 0x7c7   :  { %v7912_v8 = vpop.f32.mrb[24].mxu0 }
 0x7c8   :  { %v7913_v9 = vpop.f32.mrb[25].mxu0 }
 0x7c9   :  { %v7914_v10 = vadd.f32 %v7913_v9, %v7912_v8  ;;  %v7915_v11 = vpop.f32.mrb[26].mxu0  ;;  %v8892_v8 = vld [vmem:[%s11856_s24 + $0xac] ss:$16 sps:$4 sm:$0xff]   ;;  %v8905_v9 = vld [vmem:[%s11856_s24 + $0x100] ss:$16 sps:$4 sm:$0xff]  }
 0x7ca   :  { %v7916_v13 = vpop.f32.mrb[27].mxu0  ;;  %v8890_v11 = vld [vmem:[%s11856_s24 + $0xa8] ss:$16 sps:$4 sm:$0xff]  }
 0x7cb   :  { %v4954_v17 = vadd.f32 %v7914_v10, %v7527_v16  ;;  %v8913_v10 = vld [vmem:[%s11856_s24 + $0x124] ss:$16 sps:$4 sm:$0xff]   ;;  %v8898_v13 = vld [vmem:[%s11856_s24 + $0xcc] ss:$16 sps:$4 sm:$0xff]   ;;  %v8911_v16 = vld [vmem:[%s11856_s24 + $0x120] ss:$16 sps:$4 sm:$0xff]  }
 0x7eb   :  { %v4993_v20 = vpop.f32.mrb[28].mxu0 }
 0x7ec   :  { %v4994_v21 = vadd.f32 %v4993_v20, %v4954_v17  ;;  %v4995_v23 = vpop.f32.mrb[29].mxu0  ;;  %v8919_v17 = vld [vmem:[%s11856_s24 + $0x144] ss:$16 sps:$4 sm:$0xff]   ;;  %v8904_v20 = vld [vmem:[%s11856_s24 + $0xec] ss:$16 sps:$4 sm:$0xff]  }
 0x7ed   :  { %v4996_v24 = vpop.f32.mrb[30].mxu0  ;;  %v8902_v23 = vld [vmem:[%s11856_s24 + $0xe8] ss:$16 sps:$4 sm:$0xff]  }
 0x7ee   :  { %v5317_v28 = vpack.c.bf16 %v4994_v21, %v4994_v21  ;;  %v4997_v29 = vpop.f32.mrb[31].mxu0  ;;  %v8925_v21 = vld [vmem:[%s11856_s24 + $0x164] ss:$16 sps:$4 sm:$0xff]   ;;  %v8910_v24 = vld [vmem:[%s11856_s24 + $0x10c] ss:$16 sps:$4 sm:$0xff]  }
 0x7ef   :  { %v8914_v29 = vld [vmem:[%s11856_s24 + $0x128] ss:$16 sps:$4 sm:$0xff]  }
 0x7f0   :  { %7599 = vmatmul.mubr.msk.bf16.vlgmr.msra.gmra.mrb[56].mxu1 %vm5071_vm11, %v5317_v28  ;;  %7601 = vmatmul.mubr.msk.bf16.vlgmr.msra.gmra.mrb[36].mxu0 %vm5071_vm11, %v5317_v28  ;;  %v8916_v28 = vld [vmem:[%s11856_s24 + $0x12c] ss:$16 sps:$4 sm:$0xff]  }
 0x7f1   :  { %5544 = vmatpush1.bf16.msra.mxu1 %v8845_v43  ;;  %5575 = vmatprep.mubr.bf16.mxu1 %v9103_v49  ;;  %v8923_v43 = vld [vmem:[%s11856_s24 + $0x160] ss:$16 sps:$4 sm:$0xff]  }
 0x7f2   :  { %5545 = vmatprep.subr.bf16.mxu1 %v5535_v30  ;;  %6459 = vmatpush1.bf16.msra.mxu0 %v8857_v61  ;;  %v8922_v30 = vld [vmem:[%s11856_s24 + $0x14c] ss:$16 sps:$4 sm:$0xff]   ;;  %v8920_v61 = vld [vmem:[%s11856_s24 + $0x148] ss:$16 sps:$4 sm:$0xff]  }
 0x7f3   :  { %6460 = vmatprep.subr.bf16.mxu0 %v8865_v22  ;;  %v8928_v22 = vld [vmem:[%s11856_s24 + $0x16c] ss:$16 sps:$4 sm:$0xff]  }
 0x7f5   :  { %5546 = vmatpush1.bf16.msra.mxu1 %v5532_v32  ;;  %v8926_v32 = vld [vmem:[%s11856_s24 + $0x168] ss:$16 sps:$4 sm:$0xff]  }
 0x7f6   :  { %5584 = vmatprep.subr.bf16.mxu1 %v8853_v33  ;;  %6461 = vmatpush1.bf16.msra.mxu0 %v8863_v38  ;;  %v8931_v33 = vld [vmem:[%s11856_s24 + $0x184] ss:$16 sps:$4 sm:$0xff]   ;;  %v8929_v38 = vld [vmem:[%s11856_s24 + $0x180] ss:$16 sps:$4 sm:$0xff]  }
 0x7f7   :  { %v5310_v51 = vpop.f32.mrb[32].mxu0  ;;  %6462 = vmatprep.subr.bf16.mxu0 %v8871_v44  ;;  %v8932_v44 = vld [vmem:[%s11856_s24 + $0x188] ss:$16 sps:$4 sm:$0xff]  }
 0x7f8   :  { %v11326_v53 = vadd.f32 %v5310_v51, %v11192_v25  ;;  %v5312_v46 = vpop.f32.mrb[33].mxu0  ;;  %7610 = vmatmul.mubr.msk.bf16.vlgmr.msra.gmra.mrb[60].mxu1 %vm5525_vm12, %v5488_v45  ;;  %v8875_v25 = vld [vmem:[%s11856_s24 + $0x60] ss:$16 sps:$4 sm:$0xff]   ;;  %v8946_v51 = vld [vmem:[%s11856_s24 + $0x1cc] ss:$16 sps:$4 sm:$0xff]  }
 0x7f9   :  { %v11330_v55 = vadd.f32 %v5312_v46, %v11194_v26  ;;  %v5314_v56 = vpop.f32.mrb[34].mxu0  ;;  %5585 = vmatpush1.bf16.msra.mxu1 %v8851_v47  ;;  %5616 = vmatprep.mubr.bf16.mxu1 %v9103_v49  ;;  %v8883_v26 = vld [vmem:[%s11856_s24 + $0x84] ss:$16 sps:$4 sm:$0xff]   ;;  %v8860_v49 = vld [vmem:[%s11856_s24 + $0x8] ss:$16 sps:$4 sm:$0xff]  }
 0x7fa   :  { %v5315_v12 = vpop.f32.mrb[35].mxu0  ;;  %5586 = vmatprep.subr.bf16.mxu1 %v5541_v48  ;;  %6463 = vmatpush1.bf16.msra.mxu0 %v8869_v50  ;;  %v8937_v47 = vld [vmem:[%s11856_s24 + $0x1a4] ss:$16 sps:$4 sm:$0xff]   ;;  %v8940_v48 = vld [vmem:[%s11856_s24 + $0x1ac] ss:$16 sps:$4 sm:$0xff]  }
 0x7fb   :  { %6464 = vmatprep.subr.bf16.mxu0 %v8877_v52  ;;  %v8943_v50 = vld [vmem:[%s11856_s24 + $0x1c4] ss:$16 sps:$4 sm:$0xff]   ;;  %v8941_v52 = vld [vmem:[%s11856_s24 + $0x1c0] ss:$16 sps:$4 sm:$0xff]   ;;  %v8944_v46 = vld [vmem:[%s11856_s24 + $0x1c8] ss:$16 sps:$4 sm:$0xff]  }
 0x7fc   :  { %v8949_v56 = vld [vmem:[%s11856_s24 + $0x1e4] ss:$16 sps:$4 sm:$0xff]   ;;  %v8947_v12 = vld [vmem:[%s11856_s24 + $0x1e0] ss:$16 sps:$4 sm:$0xff]  }
 0x7fd   :  { %5587 = vmatpush1.bf16.msra.mxu1 %v5538_v19  ;;  %v8952_v19 = vld [vmem:[%s11856_s24 + $0x1ec] ss:$16 sps:$4 sm:$0xff]  }
 0x7fe   :  { %6540 = vmatprep.subr.bf16.mxu1 %v8862_v41  ;;  %6465 = vmatpush1.bf16.msra.mxu0 %v8875_v25  ;;  %v8950_v41 = vld [vmem:[%s11856_s24 + $0x1e8] ss:$16 sps:$4 sm:$0xff]   ;;  %v8955_v25 = vld [vmem:[%s11856_s24 + $0x204] ss:$16 sps:$4 sm:$0xff]  }
 0x7ff   :  { %6466 = vmatprep.subr.bf16.mxu0 %v8883_v26  ;;  %v8958_v26 = vld [vmem:[%s11856_s24 + $0x20c] ss:$16 sps:$4 sm:$0xff]  }
 0x800   :  { %7611 = vmatmul.mubr.msk.bf16.vlgmr.msra.gmra.mrb[64].mxu1 %vm5525_vm12, %v5488_v45  ;;  %v8935_v45 = vld [vmem:[%s11856_s24 + $0x1a0] ss:$16 sps:$4 sm:$0xff]  }
 0x801   :  { %6541 = vmatpush1.bf16.msra.mxu1 %v8860_v49 }
 0x802   :  { %6542 = vmatprep.subr.bf16.mxu1 %v8868_v57  ;;  %6467 = vmatpush1.bf16.msra.mxu0 %v8881_v58 }
 0x803   :  { %6468 = vmatprep.subr.bf16.mxu0 %v8889_v54 }
 0x805   :  { %6543 = vmatpush1.bf16.msra.mxu1 %v8866_v60 }
 0x806   :  { %6544 = vmatprep.subr.bf16.mxu1 %v8874_v62  ;;  %6469 = vmatpush1.bf16.msra.mxu0 %v8887_v63 }
 0x807   :  { %6470 = vmatprep.subr.bf16.mxu0 %v8895_v0 }
 0x809   :  { %6545 = vmatpush1.bf16.msra.mxu1 %v8872_v1 }
 0x80a   :  { %6546 = vmatprep.subr.bf16.mxu1 %v8880_v2  ;;  %6471 = vmatpush1.bf16.msra.mxu0 %v8893_v3 }
 0x80b   :  { %6472 = vmatprep.subr.bf16.mxu0 %v8901_v4 }
 0x80d   :  { %6547 = vmatpush1.bf16.msra.mxu1 %v8878_v5  ;;  %v5629_v5 = vld [vmem:[%s11855_s23] sm:$0xf] }
 0x80e   :  { %6548 = vmatprep.subr.bf16.mxu1 %v8886_v6  ;;  %6473 = vmatpush1.bf16.msra.mxu0 %v8899_v31  ;;  %v5634_v6 = vrot.slane %v5629_v5, %v9989_v14 }
 0x80f   :  { %6474 = vmatprep.subr.bf16.mxu0 %v8907_v7 }
 0x811   :  { %6549 = vmatpush1.bf16.msra.mxu1 %v8884_v35 }
 0x812   :  { %6550 = vmatprep.subr.bf16.mxu1 %v8892_v8  ;;  %6475 = vmatpush1.bf16.msra.mxu0 %v8905_v9 }
 0x813   :  { %6476 = vmatprep.subr.bf16.mxu0 %v8913_v10 }
 0x815   :  { %6551 = vmatpush1.bf16.msra.mxu1 %v8890_v11 }
 0x816   :  { %6552 = vmatprep.subr.bf16.mxu1 %v8898_v13  ;;  %6477 = vmatpush1.bf16.msra.mxu0 %v8911_v16  ;;  %v5642_v13 = vrot.slane %v5629_v5, %v9938_v39 }
 0x817   :  { %6478 = vmatprep.subr.bf16.mxu0 %v8919_v17 }
 0x819   :  { %6553 = vmatpush1.bf16.msra.mxu1 %v8896_v18  ;;  %v5646_v18 = vrot.slane %v5629_v5, %v11048_v59 }
 0x81a   :  { %6554 = vmatprep.subr.bf16.mxu1 %v8904_v20  ;;  %6479 = vmatpush1.bf16.msra.mxu0 %v8917_v42  ;;  %v8953_v20 = vld [vmem:[%s11856_s24 + $0x200] ss:$16 sps:$4 sm:$0xff]   ;;  %v8956_v42 = vld [vmem:[%s11856_s24 + $0x208] ss:$16 sps:$4 sm:$0xff]  }
 0x81b   :  { %6480 = vmatprep.subr.bf16.mxu0 %v8925_v21 }
 0x81d   :  { %6555 = vmatpush1.bf16.msra.mxu1 %v8902_v23 }
 0x81e   :  { %6556 = vmatprep.subr.bf16.mxu1 %v8910_v24  ;;  %6481 = vmatpush1.bf16.msra.mxu0 %v8923_v43  ;;  %v8961_v43 = vld [vmem:[%s11856_s24 + $0x224] ss:$16 sps:$4 sm:$0xff]  }
 0x81f   :  { %6482 = vmatprep.subr.bf16.mxu0 %v8931_v33  ;;  %v8962_v33 = vld [vmem:[%s11856_s24 + $0x228] ss:$16 sps:$4 sm:$0xff]  }
 0x821   :  { %6557 = vmatpush1.bf16.msra.mxu1 %v8908_v27  ;;  %v8964_v27 = vld [vmem:[%s11856_s24 + $0x22c] ss:$16 sps:$4 sm:$0xff]  }
 0x822   :  { %6558 = vmatprep.subr.bf16.mxu1 %v8916_v28  ;;  %6483 = vmatpush1.bf16.msra.mxu0 %v8929_v38  ;;  %v8970_v38 = vld [vmem:[%s11856_s24 + $0x24c] ss:$16 sps:$4 sm:$0xff]  }
 0x823   :  { %6484 = vmatprep.subr.bf16.mxu0 %v8937_v47  ;;  %v8965_v47 = vld [vmem:[%s11856_s24 + $0x240] ss:$16 sps:$4 sm:$0xff]  }
 0x825   :  { %6559 = vmatpush1.bf16.msra.mxu1 %v8914_v29 }
 0x826   :  { %6560 = vmatprep.subr.bf16.mxu1 %v8922_v30  ;;  %6485 = vmatpush1.bf16.msra.mxu0 %v8935_v45 }
 0x827   :  { %6486 = vmatprep.subr.bf16.mxu0 %v8943_v50  ;;  %v8976_v50 = vld [vmem:[%s11856_s24 + $0x26c] ss:$16 sps:$4 sm:$0xff]  }
 0x829   :  { %6561 = vmatpush1.bf16.msra.mxu1 %v8920_v61 }
 0x82a   :  { %6562 = vmatprep.subr.bf16.mxu1 %v8928_v22  ;;  %6487 = vmatpush1.bf16.msra.mxu0 %v8941_v52  ;;  %v8974_v52 = vld [vmem:[%s11856_s24 + $0x268] ss:$16 sps:$4 sm:$0xff]  }
 0x82b   :  { %6488 = vmatprep.subr.bf16.mxu0 %v8949_v56  ;;  %v8982_v56 = vld [vmem:[%s11856_s24 + $0x28c] ss:$16 sps:$4 sm:$0xff]  }
 0x82d   :  { %6563 = vmatpush1.bf16.msra.mxu1 %v8926_v32  ;;  %v8959_v32 = vld [vmem:[%s11856_s24 + $0x220] ss:$16 sps:$4 sm:$0xff]  }
 0x82e   :  { %6564 = vmatprep.subr.bf16.mxu1 %v8934_v36  ;;  %6489 = vmatpush1.bf16.msra.mxu0 %v8947_v12  ;;  %v8967_v36 = vld [vmem:[%s11856_s24 + $0x244] ss:$16 sps:$4 sm:$0xff]   ;;  %v8980_v12 = vld [vmem:[%s11856_s24 + $0x288] ss:$16 sps:$4 sm:$0xff]  }
 0x82f   :  { %6499 = vmatprep.subr.bf16.mxu0 %v8955_v25  ;;  %v8988_v25 = vld [vmem:[%s11856_s24 + $0x2ac] ss:$16 sps:$4 sm:$0xff]  }
 0x831   :  { %6565 = vmatpush1.bf16.msra.mxu1 %v8932_v44 }
 0x832   :  { %6566 = vmatprep.subr.bf16.mxu1 %v8940_v48  ;;  %v8973_v48 = vld [vmem:[%s11856_s24 + $0x264] ss:$16 sps:$4 sm:$0xff]  }
 0x835   :  { %6567 = vmatpush1.bf16.msra.mxu1 %v8938_v34  ;;  %v8968_v34 = vld [vmem:[%s11856_s24 + $0x248] ss:$16 sps:$4 sm:$0xff]  }
 0x836   :  { %6568 = vmatprep.subr.bf16.mxu1 %v8946_v51  ;;  %v8971_v51 = vld [vmem:[%s11856_s24 + $0x260] ss:$16 sps:$4 sm:$0xff]  }
 0x839   :  { %6569 = vmatpush1.bf16.msra.mxu1 %v8944_v46  ;;  %v8979_v46 = vld [vmem:[%s11856_s24 + $0x284] ss:$16 sps:$4 sm:$0xff]  }
 0x83a   :  { %6570 = vmatprep.subr.bf16.mxu1 %v8952_v19  ;;  %v8977_v19 = vld [vmem:[%s11856_s24 + $0x280] ss:$16 sps:$4 sm:$0xff]  }
 0x83d   :  { %6571 = vmatpush1.bf16.msra.mxu1 %v8950_v41  ;;  %v8985_v41 = vld [vmem:[%s11856_s24 + $0x2a4] ss:$16 sps:$4 sm:$0xff]  }
 0x83e   :  { %6581 = vmatprep.subr.bf16.mxu1 %v8958_v26  ;;  %v8983_v26 = vld [vmem:[%s11856_s24 + $0x2a0] ss:$16 sps:$4 sm:$0xff]  }
 0x8c3   :  { %v5427_v49 = vpop.f32.mrb[56].mxu1  ;;  %v5468_v57 = vpop.f32.mrb[36].mxu0 }
 0x8c4   :  { %v5475_v58 = vadd.f32 %v5427_v49, %v11209_v37  ;;  %v5477_v54 = vadd.f32 %v5468_v57, %v11326_v53  ;;  %v5429_v60 = vpop.f32.mrb[57].mxu1  ;;  %v5470_v62 = vpop.f32.mrb[37].mxu0  ;;  %v5638_v37 = vrot.slane %v5629_v5, %v9992_v15  ;;  %v8986_v49 = vld [vmem:[%s11856_s24 + $0x2a8] ss:$16 sps:$4 sm:$0xff]   ;;  %v8991_v57 = vld [vmem:[%s11856_s24 + $0x2c4] ss:$16 sps:$4 sm:$0xff]  }
 0x8c5   :  { %v5476_v63 = vadd.f32 %v5429_v60, %v11211_v40  ;;  %v5478_v0 = vadd.f32 %v5470_v62, %v11330_v55  ;;  %v5431_v1 = vpop.f32.mrb[58].mxu1  ;;  %v5472_v2 = vpop.f32.mrb[38].mxu0  ;;  %v8992_v60 = vld [vmem:[%s11856_s24 + $0x2c8] ss:$16 sps:$4 sm:$0xff]   ;;  %v8997_v62 = vld [vmem:[%s11856_s24 + $0x2e4] ss:$16 sps:$4 sm:$0xff]  }
 0x8c6   :  { %v5432_v3 = vpop.f32.mrb[59].mxu1  ;;  %v5473_v4 = vpop.f32.mrb[39].mxu0  ;;  %v8998_v1 = vld [vmem:[%s11856_s24 + $0x2e8] ss:$16 sps:$4 sm:$0xff]   ;;  %v9003_v2 = vld [vmem:[%s11856_s24 + $0x304] ss:$16 sps:$4 sm:$0xff]  }
 0x8c7   :  { %v9006_v3 = vld [vmem:[%s11856_s24 + $0x30c] ss:$16 sps:$4 sm:$0xff]   ;;  %v9001_v4 = vld [vmem:[%s11856_s24 + $0x300] ss:$16 sps:$4 sm:$0xff]   ;;  %v9004_v5 = vld [vmem:[%s11856_s24 + $0x308] ss:$16 sps:$4 sm:$0xff]  }
 0x8cb   :  { %v5577_v31 = vpop.f32.mrb[60].mxu1 }
 0x8cc   :  { %v5625_v53 = vadd.f32 %v5577_v31, %v5475_v58  ;;  %v5579_v7 = vpop.f32.mrb[61].mxu1  ;;  %v8994_v58 = vld [vmem:[%s11856_s24 + $0x2cc] ss:$16 sps:$4 sm:$0xff]  }
 0x8cd   :  { %v5626_v35 = vadd.f32 %v5579_v7, %v5476_v63  ;;  %v5581_v8 = vpop.f32.mrb[62].mxu1  ;;  %v9000_v63 = vld [vmem:[%s11856_s24 + $0x2ec] ss:$16 sps:$4 sm:$0xff]   ;;  %v9015_v7 = vld [vmem:[%s11856_s24 + $0x344] ss:$16 sps:$4 sm:$0xff]  }
 0x8ce   :  { %v5651_v40 = vadd.f32 %v5634_v6, %v5625_v53  ;;  %v5582_v9 = vpop.f32.mrb[63].mxu1  ;;  %v9009_v6 = vld [vmem:[%s11856_s24 + $0x324] ss:$16 sps:$4 sm:$0xff]   ;;  %v9012_v31 = vld [vmem:[%s11856_s24 + $0x32c] ss:$16 sps:$4 sm:$0xff]  }
 0x8cf   :  { %v5652_v55 = vadd.f32 %v5638_v37, %v5626_v35  ;;  %v9007_v37 = vld [vmem:[%s11856_s24 + $0x320] ss:$16 sps:$4 sm:$0xff]   ;;  %v9010_v53 = vld [vmem:[%s11856_s24 + $0x328] ss:$16 sps:$4 sm:$0xff]   ;;  %v9018_v35 = vld [vmem:[%s11856_s24 + $0x34c] ss:$16 sps:$4 sm:$0xff]  }
 0x8d0   :  { %v5655_v10 = vmax.f32 %v5651_v40, 0.0  ;;  %v9013_v8 = vld [vmem:[%s11856_s24 + $0x340] ss:$16 sps:$4 sm:$0xff]   ;;  %v9016_v40 = vld [vmem:[%s11856_s24 + $0x348] ss:$16 sps:$4 sm:$0xff]  }
 0x8d1   :  { %v5656_v11 = vmax.f32 %v5652_v55, 0.0  ;;  %v9021_v9 = vld [vmem:[%s11856_s24 + $0x364] ss:$16 sps:$4 sm:$0xff]   ;;  %v9024_v55 = vld [vmem:[%s11856_s24 + $0x36c] ss:$16 sps:$4 sm:$0xff]  }
 0x8d2   :  { %v5659_v21 = vpack.c.bf16 %v5655_v10, %v5655_v10  ;;  %v9019_v10 = vld [vmem:[%s11856_s24 + $0x360] ss:$16 sps:$4 sm:$0xff]  }
 0x8d3   :  { %v5660_v16 = vpack.c.bf16 %v5656_v11, %v5656_v11  ;;  %v5618_v17 = vpop.f32.mrb[64].mxu1  ;;  %v9022_v11 = vld [vmem:[%s11856_s24 + $0x368] ss:$16 sps:$4 sm:$0xff]  }
 0x8d4   :  { %v5627_v23 = vadd.f32 %v5618_v17, %v5477_v54  ;;  %v5620_v24 = vpop.f32.mrb[65].mxu1  ;;  %v8989_v54 = vld [vmem:[%s11856_s24 + $0x2c0] ss:$16 sps:$4 sm:$0xff]  }
 0x8d5   :  { %v5628_v28 = vadd.f32 %v5620_v24, %v5478_v0  ;;  %v5622_v29 = vpop.f32.mrb[66].mxu1  ;;  %6490 = vmatprep.mubr.bf16.mxu0 %v5660_v16  ;;  %6572 = vmatprep.mubr.bf16.mxu1 %v5660_v16  ;;  %v8995_v0 = vld [vmem:[%s11856_s24 + $0x2e0] ss:$16 sps:$4 sm:$0xff]   ;;  %v9030_v16 = vld [vmem:[%s11856_s24 + $0x38c] ss:$16 sps:$4 sm:$0xff]  }
 0x8d6   :  { %v11534_v30 = vadd.f32 %v5642_v13, %v5627_v23  ;;  %v5623_v61 = vpop.f32.mrb[67].mxu1  ;;  %6491 = vmatmul.mubr.bf16.vlgmr.msra.gmra.mrb[40].mxu0 %v5659_v21  ;;  %6573 = vmatmul.mubr.bf16.vlgmr.msra.gmra.mrb[68].mxu1 %v5659_v21  ;;  %v9027_v13 = vld [vmem:[%s11856_s24 + $0x384] ss:$16 sps:$4 sm:$0xff]   ;;  %v9025_v17 = vld [vmem:[%s11856_s24 + $0x380] ss:$16 sps:$4 sm:$0xff]  }
 0x8d7   :  { %v5654_v22 = vadd.f32 %v5646_v18, %v5628_v28  ;;  %6500 = vmatpush1.bf16.msra.mxu0 %v8953_v20  ;;  %6582 = vmatpush1.bf16.msra.mxu1 %v8956_v42  ;;  %v9028_v18 = vld [vmem:[%s11856_s24 + $0x388] ss:$16 sps:$4 sm:$0xff]   ;;  %v9033_v20 = vld [vmem:[%s11856_s24 + $0x3a4] ss:$16 sps:$4 sm:$0xff]   ;;  %v9036_v42 = vld [vmem:[%s11856_s24 + $0x3ac] ss:$16 sps:$4 sm:$0xff]  }
 0x8d8   :  { %6501 = vmatprep.subr.bf16.mxu0 %v8961_v43  ;;  %6583 = vmatprep.subr.bf16.mxu1 %v8964_v27  ;;  %v9031_v21 = vld [vmem:[%s11856_s24 + $0x3a0] ss:$16 sps:$4 sm:$0xff]   ;;  %v9034_v23 = vld [vmem:[%s11856_s24 + $0x3a8] ss:$16 sps:$4 sm:$0xff]   ;;  %v9039_v24 = vld [vmem:[%s11856_s24 + $0x3c4] ss:$16 sps:$4 sm:$0xff]  }
 0x8d9   :  { %v5658_v44 = vmax.f32 %v5654_v22, 0.0  ;;  %v9042_v43 = vld [vmem:[%s11856_s24 + $0x3cc] ss:$16 sps:$4 sm:$0xff]   ;;  %v5787_v27 = vld [vmem:[%s11856_s24 + $0x3e0] sm:$0x33] }
 0x8da   :  { %v5788_v28 = vld [vmem:[%s11856_s24 + $0x3e8] sm:$0x33]  ;;  %v9037_v29 = vld [vmem:[%s11856_s24 + $0x3c0] ss:$16 sps:$4 sm:$0xff]   ;;  %v7737_v22 = vcombine.high %v5787_v27, %v5787_v27 }
 0x8db   :  { %v5662_v45 = vpack.c.bf16 %v5658_v44, %v5658_v44  ;;  %6502 = vmatpush1.bf16.msra.mxu0 %v8959_v32  ;;  %6584 = vmatpush1.bf16.msra.mxu1 %v8962_v33  ;;  %v9040_v61 = vld [vmem:[%s11856_s24 + $0x3c8] ss:$16 sps:$4 sm:$0xff]   ;;  %v7739_v32 = vcombine.high %v5788_v28, %v5788_v28  ;;  %v7736_v33 = vcombine.low %v5787_v27, %v5787_v27 }
 0x8dc   :  { %6503 = vmatprep.subr.bf16.mxu0 %v8967_v36  ;;  %6585 = vmatprep.subr.bf16.mxu1 %v8970_v38  ;;  %v7738_v36 = vcombine.low %v5788_v28, %v5788_v28  ;;  %v5657_v38 = vmax.f32 %v11534_v30, 0.0  ;;  %v9049_v30 = vld [vmem:[%s11858_s26] sm:$0xff]  }
 0x8dd   :  { %7741 = vmatprep.mubr.msk.bf16.mxu0 %vm6441_vm13, %v5662_v45  ;;  %7743 = vmatprep.mubr.msk.bf16.mxu1 %vm6441_vm13, %v5662_v45  ;;  %v6447_v44 = vsel %vm6445_vm14, %v7736_v33, 0 }
 0x8de   :  { %v6453_v45 = vsel %vm6445_vm14, %v7738_v36, 0  ;;  %v7744_v36 = vld [vmem:[%s11859_s27] ss:$0 sm:$0xff] }
 0x8df   :  { %6504 = vmatpush1.bf16.msra.mxu0 %v8965_v47  ;;  %6586 = vmatpush1.bf16.msra.mxu1 %v8968_v34  ;;  %v9047_v47 = vld [vmem:[%s11858_s26 + $0x40] sm:$0xff]  }
 0x8e0   :  { %6505 = vmatprep.subr.bf16.mxu0 %v8973_v48  ;;  %6587 = vmatprep.subr.bf16.mxu1 %v8976_v50  ;;  %v9048_v34 = vld [vmem:[%s11858_s26 + $0xc0] sm:$0xff]   ;;  %v5661_v50 = vpack.c.bf16 %v5657_v38, %v5657_v38 }
 0x8e1   :  { %v9050_v48 = vld [vmem:[%s11858_s26 + $0x80] sm:$0xff]  }
 0x8e3   :  { %6506 = vmatpush1.bf16.msra.mxu0 %v8971_v51  ;;  %6588 = vmatpush1.bf16.msra.mxu1 %v8974_v52  ;;  %v9051_v51 = vld [vmem:[%s11858_s26 + $0x48] sm:$0xff]  }
 0x8e4   :  { %6507 = vmatprep.subr.bf16.mxu0 %v8979_v46  ;;  %6589 = vmatprep.subr.bf16.mxu1 %v8982_v56  ;;  %v9052_v52 = vld [vmem:[%s11858_s26 + $0xc8] sm:$0xff]  }
 0x8e5   :  { %v9053_v46 = vld [vmem:[%s11858_s26 + $0x8] sm:$0xff]  }
 0x8e6   :  { %v9054_v56 = vld [vmem:[%s11858_s26 + $0x88] sm:$0xff]  }
 0x8e7   :  { %6508 = vmatpush1.bf16.msra.mxu0 %v8977_v19  ;;  %6590 = vmatpush1.bf16.msra.mxu1 %v8980_v12  ;;  %v9055_v19 = vld [vmem:[%s11858_s26 + $0x50] sm:$0xff]  }
 0x8e8   :  { %6509 = vmatprep.subr.bf16.mxu0 %v8985_v41  ;;  %6591 = vmatprep.subr.bf16.mxu1 %v8988_v25  ;;  %v9056_v12 = vld [vmem:[%s11858_s26 + $0xd0] sm:$0xff]  }
 0x8e9   :  { %v9057_v41 = vld [vmem:[%s11858_s26 + $0x10] sm:$0xff]  }
 0x8ea   :  { %v9058_v25 = vld [vmem:[%s11858_s26 + $0x90] sm:$0xff]  }
 0x8eb   :  { %6510 = vmatpush1.bf16.msra.mxu0 %v8983_v26  ;;  %6592 = vmatpush1.bf16.msra.mxu1 %v8986_v49  ;;  %v9059_v26 = vld [vmem:[%s11858_s26 + $0x58] sm:$0xff]  }
 0x8ec   :  { %6511 = vmatprep.subr.bf16.mxu0 %v8991_v57  ;;  %6593 = vmatprep.subr.bf16.mxu1 %v8994_v58  ;;  %v9060_v49 = vld [vmem:[%s11858_s26 + $0xd8] sm:$0xff]  }
 0x8ed   :  { %v9061_v57 = vld [vmem:[%s11858_s26 + $0x18] sm:$0xff]  }
 0x8ee   :  { %v9062_v58 = vld [vmem:[%s11858_s26 + $0x98] sm:$0xff]  }
 0x8ef   :  { %6512 = vmatpush1.bf16.msra.mxu0 %v8989_v54  ;;  %6594 = vmatpush1.bf16.msra.mxu1 %v8992_v60  ;;  %v9063_v54 = vld [vmem:[%s11858_s26 + $0x60] sm:$0xff]  }
 0x8f0   :  { %6513 = vmatprep.subr.bf16.mxu0 %v8997_v62  ;;  %6595 = vmatprep.subr.bf16.mxu1 %v9000_v63  ;;  %v9064_v60 = vld [vmem:[%s11858_s26 + $0xe0] sm:$0xff]  }
 0x8f1   :  { %v9065_v62 = vld [vmem:[%s11858_s26 + $0x20] sm:$0xff]  }
 0x8f2   :  { %v9066_v63 = vld [vmem:[%s11858_s26 + $0xa0] sm:$0xff]  }
 0x8f3   :  { %6514 = vmatpush1.bf16.msra.mxu0 %v8995_v0  ;;  %6596 = vmatpush1.bf16.msra.mxu1 %v8998_v1  ;;  %v9067_v0 = vld [vmem:[%s11858_s26 + $0x68] sm:$0xff]  }
 0x8f4   :  { %6515 = vmatprep.subr.bf16.mxu0 %v9003_v2  ;;  %6597 = vmatprep.subr.bf16.mxu1 %v9006_v3  ;;  %v9068_v1 = vld [vmem:[%s11858_s26 + $0xe8] sm:$0xff]  }
 0x8f5   :  { %v9069_v2 = vld [vmem:[%s11858_s26 + $0x28] sm:$0xff]  }
 0x8f6   :  { %v9070_v3 = vld [vmem:[%s11858_s26 + $0xa8] sm:$0xff]  }
 0x8f7   :  { %6516 = vmatpush1.bf16.msra.mxu0 %v9001_v4  ;;  %6598 = vmatpush1.bf16.msra.mxu1 %v9004_v5  ;;  %v9071_v4 = vld [vmem:[%s11858_s26 + $0x70] sm:$0xff]  }
 0x8f8   :  { %6517 = vmatprep.subr.bf16.mxu0 %v9009_v6  ;;  %6599 = vmatprep.subr.bf16.mxu1 %v9012_v31  ;;  %v9072_v5 = vld [vmem:[%s11858_s26 + $0xf0] sm:$0xff]  }
 0x8f9   :  { %v9073_v6 = vld [vmem:[%s11858_s26 + $0x30] sm:$0xff]  }
 0x8fa   :  { %v9074_v31 = vld [vmem:[%s11858_s26 + $0xb0] sm:$0xff]  }
 0x8fb   :  { %6518 = vmatpush1.bf16.msra.mxu0 %v9007_v37  ;;  %6600 = vmatpush1.bf16.msra.mxu1 %v9010_v53  ;;  %v9075_v37 = vld [vmem:[%s11858_s26 + $0x78] sm:$0xff]  }
 0x8fc   :  { %6519 = vmatprep.subr.bf16.mxu0 %v9015_v7  ;;  %6601 = vmatprep.subr.bf16.mxu1 %v9018_v35  ;;  %v9076_v53 = vld [vmem:[%s11858_s26 + $0xf8] ss:$0 sps:$4 sm:$0x33]  }
 0x8fd   :  { %v9077_v7 = vld [vmem:[%s11858_s26 + $0x38] sm:$0xff]  }
 0x8fe   :  { %v9078_v35 = vld [vmem:[%s11858_s26 + $0xb8] sm:$0xff]  }
 0x8ff   :  { %6520 = vmatpush1.bf16.msra.mxu0 %v9013_v8  ;;  %6602 = vmatpush1.bf16.msra.mxu1 %v9016_v40  ;;  %v5789_v8 = vld [vmem:[%s11857_s25] sm:$0xf] }
 0x900   :  { %6521 = vmatprep.subr.bf16.mxu0 %v9021_v9  ;;  %6603 = vmatprep.subr.bf16.mxu1 %v9024_v55  ;;  %v5794_v40 = vrot.slane %v5789_v8, %v9989_v14  ;;  %v5802_v9 = vrot.slane %v5789_v8, %v9938_v39  ;;  %v5798_v55 = vrot.slane %v5789_v8, %v9992_v15 }
 0x903   :  { %6522 = vmatpush1.bf16.msra.mxu0 %v9019_v10  ;;  %6604 = vmatpush1.bf16.msra.mxu1 %v9022_v11  ;;  %v5806_v10 = vrot.slane %v5789_v8, %v11048_v59 }
 0x904   :  { %6523 = vmatprep.subr.bf16.mxu0 %v9027_v13  ;;  %6605 = vmatprep.subr.bf16.mxu1 %v9030_v16 }
 0x907   :  { %6524 = vmatpush1.bf16.msra.mxu0 %v9025_v17  ;;  %6606 = vmatpush1.bf16.msra.mxu1 %v9028_v18 }
 0x908   :  { %6525 = vmatprep.subr.bf16.mxu0 %v9033_v20  ;;  %6607 = vmatprep.subr.bf16.mxu1 %v9036_v42 }
 0x90b   :  { %6526 = vmatpush1.bf16.msra.mxu0 %v9031_v21  ;;  %6608 = vmatpush1.bf16.msra.mxu1 %v9034_v23 }
 0x90c   :  { %6527 = vmatprep.subr.bf16.mxu0 %v9039_v24  ;;  %6609 = vmatprep.subr.bf16.mxu1 %v9042_v43 }
 0x90f   :  { %6528 = vmatpush1.bf16.msra.mxu0 %v9037_v29  ;;  %6610 = vmatpush1.bf16.msra.mxu1 %v9040_v61 }
 0x910   :  { %7740 = vmatprep.subr.msk.bf16.mxu0 %vm6445_vm14, %v7737_v22  ;;  %7742 = vmatprep.subr.msk.bf16.mxu1 %vm6445_vm14, %v7739_v32 }
 0x913   :  { %6530 = vmatpush1.bf16.msra.mxu0 %v6447_v44  ;;  %6612 = vmatpush1.bf16.msra.mxu1 %v6453_v45 }
 0x914   :  { %7918 = vmatprep.subr.bf16.mxu0 %v9047_v47  ;;  %7940 = vmatprep.subr.bf16.mxu1 %v9048_v34 }
 0x916   :  { %6532 = vmatmul.mubr.bf16.vlgmr.msra.gmra.mrb[40].mxu0 %v5661_v50  ;;  %6614 = vmatmul.mubr.bf16.vlgmr.msra.gmra.mrb[68].mxu1 %v5661_v50 }
 0x917   :  { %7919 = vmatpush3.bf16.msra.mxu0 %v9049_v30  ;;  %7941 = vmatpush3.bf16.msra.mxu1 %v9050_v48 }
 0x918   :  { %7920 = vmatprep.subr.bf16.mxu0 %v9051_v51  ;;  %7942 = vmatprep.subr.bf16.mxu1 %v9052_v52 }
 0x91b   :  { %7921 = vmatpush3.bf16.msra.mxu0 %v9053_v46  ;;  %7943 = vmatpush3.bf16.msra.mxu1 %v9054_v56 }
 0x91c   :  { %7922 = vmatprep.subr.bf16.mxu0 %v9055_v19  ;;  %7944 = vmatprep.subr.bf16.mxu1 %v9056_v12 }
 0x91f   :  { %7923 = vmatpush3.bf16.msra.mxu0 %v9057_v41  ;;  %7945 = vmatpush3.bf16.msra.mxu1 %v9058_v25 }
 0x920   :  { %7924 = vmatprep.subr.bf16.mxu0 %v9059_v26  ;;  %7946 = vmatprep.subr.bf16.mxu1 %v9060_v49 }
 0x923   :  { %7925 = vmatpush3.bf16.msra.mxu0 %v9061_v57  ;;  %7947 = vmatpush3.bf16.msra.mxu1 %v9062_v58 }
 0x924   :  { %7926 = vmatprep.subr.bf16.mxu0 %v9063_v54  ;;  %7948 = vmatprep.subr.bf16.mxu1 %v9064_v60 }
 0x927   :  { %7927 = vmatpush3.bf16.msra.mxu0 %v9065_v62  ;;  %7949 = vmatpush3.bf16.msra.mxu1 %v9066_v63 }
 0x928   :  { %7928 = vmatprep.subr.bf16.mxu0 %v9067_v0  ;;  %7950 = vmatprep.subr.bf16.mxu1 %v9068_v1 }
 0x92b   :  { %7929 = vmatpush3.bf16.msra.mxu0 %v9069_v2  ;;  %7951 = vmatpush3.bf16.msra.mxu1 %v9070_v3 }
 0x92c   :  { %7930 = vmatprep.subr.bf16.mxu0 %v9071_v4  ;;  %7952 = vmatprep.subr.bf16.mxu1 %v9072_v5 }
 0x92f   :  { %7931 = vmatpush3.bf16.msra.mxu0 %v9073_v6  ;;  %7953 = vmatpush3.bf16.msra.mxu1 %v9074_v31 }
 0x930   :  { %7932 = vmatprep.subr.bf16.mxu0 %v9075_v37  ;;  %8038 = vmatprep.subr.msk.bf16.mxu1 %vm6445_vm14, %v9076_v53 }
 0x933   :  { %7933 = vmatpush3.bf16.msra.mxu0 %v9077_v7  ;;  %7955 = vmatpush3.bf16.msra.mxu1 %v9078_v35 }
 0x9e9   :  { %v6533_v11 = vpop.f32.mrb[40].mxu0  ;;  %v6615_v13 = vpop.f32.mrb[68].mxu1 }
 0x9ea   :  { %v7994_v16 = vadd.f32 %v6533_v11, %v5794_v40  ;;  %v7996_v17 = vadd.f32 %v6615_v13, %v5802_v9  ;;  %v6535_v18 = vpop.f32.mrb[41].mxu0  ;;  %v6617_v20 = vpop.f32.mrb[69].mxu1 }
 0x9eb   :  { %v7995_v42 = vadd.f32 %v6535_v18, %v5798_v55  ;;  %v7997_v21 = vadd.f32 %v6617_v20, %v5806_v10  ;;  %v6537_v23 = vpop.f32.mrb[42].mxu0  ;;  %v6619_v24 = vpop.f32.mrb[70].mxu1 }
 0x9ec   :  { %v6622_v43 = vmax.f32 %v7994_v16, 0.0  ;;  %v6624_v27 = vmax.f32 %v7996_v17, 0.0  ;;  %v6538_v28 = vpop.f32.mrb[43].mxu0  ;;  %v6620_v14 = vpop.f32.mrb[71].mxu1 }
 0x9ed   :  { %v6623_v29 = vmax.f32 %v7995_v42, 0.0  ;;  %v6625_v39 = vmax.f32 %v7997_v21, 0.0 }
 0x9ee   :  { %v6626_v22 = vpack.c.bf16 %v6622_v43, %v6622_v43  ;;  %v6628_v59 = vpack.c.bf16 %v6624_v27, %v6624_v27 }
 0x9ef   :  { %v6627_v61 = vpack.c.bf16 %v6623_v29, %v6623_v29  ;;  %v6629_v15 = vpack.c.bf16 %v6625_v39, %v6625_v39 }
 0x9f1   :  { %6927 = vmatprep.mubr.bf16.mxu0 %v6627_v61  ;;  %7777 = vmatprep.mubr.msk.bf16.mxu1 %vm6441_vm13, %v6629_v15 }
 0x9f2   :  { %6928 = vmatmul.mubr.bf16.vlgmr.msra.gmra.mrb[44].mxu0 %v6626_v22  ;;  %6968 = vmatmul.mubr.bf16.vlgmr.msra.gmra.mrb[72].mxu1 %v6628_v59 }
 0xac5   :  { %v7934_v32 = vpop.f32.mrb[44].mxu0  ;;  %v7956_v33 = vpop.f32.mrb[72].mxu1 }
 0xac6   :  { %v7935_v38 = vpop.f32.mrb[45].mxu0  ;;  %v7957_v44 = vpop.f32.mrb[73].mxu1 }
 0xac7   :  { %v7936_v45 = vadd.f32 %v7935_v38, %v7934_v32  ;;  %v7958_v47 = vadd.f32 %v7957_v44, %v7956_v33  ;;  %v7937_v34 = vpop.f32.mrb[46].mxu0  ;;  %v7959_v30 = vpop.f32.mrb[74].mxu1 }
 0xac8   :  { %v7938_v48 = vpop.f32.mrb[47].mxu0  ;;  %v7960_v50 = vpop.f32.mrb[75].mxu1 }
 0xac9   :  { %v6930_v51 = vadd.f32 %v7936_v45, %v7744_v36 }
 0xacb   :  { %v6970_v52 = vadd.f32 %v7958_v47, %v6930_v51 }
 0xacd   :  { %6975 = vst.msk [vmem:[#allocation2] sm:$0xff] %vm5071_vm11, %v6970_v52 }
 0xace   :  { %9090 = shalt.err (!%p9087_p4)
}
 0xacf   :  { %s9091_s2 = scalar_lea.hbm %s11860_s28, 128 }
 0xad0   :  { %p9092_p5 = scmp.ne.s32.totalorder %s11860_s28, %s9091_s2  ;;  %p9095_p6 = scmp.lt.u32.totalorder %s9091_s2, %s11860_s28 }
 0xad2   :  { %p9097_p7 = pnand %p9095_p6, %p9092_p5 }
 0xad4   :  { %9100 = shalt.err (!%p9097_p7)
}
 0xad5   :  { %6985 = dma.vmem_to_hbm [thread:$0]  %s6983_s12, 128, %s11860_s28, [#allocation3]  }
 0xad6   :  { %9101 = dma.done.wait [#allocation3], 128  }
 0xad7   :  { %9102 = vsyncadd [#allocation3], 4294967168 }
 0xad8   :  { %6989 = vsyncpa [#allocation3], 1 }

</bundles_post_ra>
